<compile_context>
chip_gen: v7x
topology: tpu7x:2x2x1
jax: 0.10.0
libtpu: 0.0.40
codegen_flags: <defaults>
</compile_context>

<pallas_src>
import functools
import math

import numpy as np
import jax
import jax.numpy as jnp
from jax.experimental import pallas as pl
from jax.experimental.pallas import tpu as pltpu


NB = 8  # images per grid step; multiple of 8 keeps every row slice vreg-aligned.


# ----------------------------------------------------------------------------
# Fused kernel: NB images per grid step, rows ordered (spatial_row * NB + img).
# ----------------------------------------------------------------------------
def _lenet5_kernel(x_ref,                    # (28*NB, 480) bf16 im2col'd conv1 input
                   t1_ref, b1_ref,           # (480, 256) bf16, (1, 256) f32
                   c0_ref, c1_ref,           # (256, 128) bf16 pool1 width selectors
                   t2_ref, b2_ref,           # (5, 128, 256) bf16, (1, 256) f32
                   d0_ref, d1_ref,           # (256, 128) bf16 pool2 width selectors
                   f1_ref, fb1_ref,          # (640, 128) bf16, (1, 128) f32
                   f2_ref, fb2_ref,          # (128, 128) bf16, (1, 128) f32
                   f3_ref, fb3_ref,          # (128, 128) bf16, (1, 128) f32
                   o_ref,                    # (NB, 128) f32 padded logits
                   m1_s, p1_s, m2_s, fc_s):  # VMEM scratch
    f32 = jnp.float32
    bf16 = jnp.bfloat16
    nb = o_ref.shape[0]

    # ---- conv1 + bias + ReLU: one K=480 matmul (kh, c unrolled into lanes) ----
    y1 = jnp.dot(x_ref[...], t1_ref[...], preferred_element_type=f32)
    y1 = jnp.maximum(y1 + b1_ref[...], 0.0).astype(bf16)          # (28*nb, 256)

    # ---- pool1 width pairs via exact one-hot selection matmuls ----
    m1_s[...] = jnp.maximum(
        jnp.dot(y1, c0_ref[...], preferred_element_type=f32),
        jnp.dot(y1, c1_ref[...], preferred_element_type=f32))     # (28*nb, 128)

    # ---- pool1 height pairs: aligned NB-row block maxes (rows = oh*nb + n) ----
    for h in range(14):
        p1_s[pl.ds(h * nb, nb), :] = jnp.maximum(
            m1_s[pl.ds((2 * h) * nb, nb), :],
            m1_s[pl.ds((2 * h + 1) * nb, nb), :])                 # (14*nb, 128)

    # ---- conv2 + bias + ReLU: 5 shifted K=128 matmuls accumulated in f32 ----
    acc2 = jnp.zeros((10 * nb, 256), f32)
    for kh in range(5):
        acc2 = acc2 + jnp.dot(
            p1_s[pl.ds(kh * nb, 10 * nb), :].astype(bf16),
            t2_ref[kh], preferred_element_type=f32)
    y2 = jnp.maximum(acc2 + b2_ref[...], 0.0).astype(bf16)        # (10*nb, 256)

    # ---- pool2 width pairs ----
    m2_s[...] = jnp.maximum(
        jnp.dot(y2, d0_ref[...], preferred_element_type=f32),
        jnp.dot(y2, d1_ref[...], preferred_element_type=f32))     # (10*nb, 128)

    # ---- pool2 height pairs, scattered to lane offset h*128 of the fc1 input ----
    for h in range(5):
        fc_s[:, pl.ds(h * 128, 128)] = jnp.maximum(
            m2_s[pl.ds((2 * h) * nb, nb), :],
            m2_s[pl.ds((2 * h + 1) * nb, nb), :])                 # (nb, 640)

    # ---- fc1 (single K=640 matmul) + ReLU, fc2 + ReLU, fc3 ----
    h1 = jnp.dot(fc_s[...].astype(bf16), f1_ref[...], preferred_element_type=f32)
    h1 = jnp.maximum(h1 + fb1_ref[...], 0.0).astype(bf16)         # (nb, 128)
    h2 = jnp.dot(h1, f2_ref[...], preferred_element_type=f32)
    h2 = jnp.maximum(h2 + fb2_ref[...], 0.0).astype(bf16)
    o_ref[...] = (jnp.dot(h2, f3_ref[...], preferred_element_type=f32)
                  + fb3_ref[...])                                 # (nb, 128)


# ----------------------------------------------------------------------------
# Parameter init (deterministic; mirrors PyTorch xavier_normal_ + zeros_)
# ----------------------------------------------------------------------------
def _xavier_normal(key, shape, fan_in, fan_out):
    std = math.sqrt(2.0 / (fan_in + fan_out))
    return std * jax.random.normal(key, shape, dtype=jnp.float32)


def init_lenet5_params(key, output_dim):
    ks = jax.random.split(key, 5)
    return {
        "conv1_w": _xavier_normal(ks[0], (6, 3, 5, 5), 3 * 25, 6 * 25),
        "conv1_b": jnp.zeros((6,), jnp.float32),
        "conv2_w": _xavier_normal(ks[1], (16, 6, 5, 5), 6 * 25, 16 * 25),
        "conv2_b": jnp.zeros((16,), jnp.float32),
        "fc1_w": _xavier_normal(ks[2], (120, 400), 400, 120),
        "fc1_b": jnp.zeros((120,), jnp.float32),
        "fc2_w": _xavier_normal(ks[3], (84, 120), 120, 84),
        "fc2_b": jnp.zeros((84,), jnp.float32),
        "fc3_w": _xavier_normal(ks[4], (output_dim, 84), 84, output_dim),
        "fc3_b": jnp.zeros((output_dim,), jnp.float32),
    }


# ----------------------------------------------------------------------------
# One-time packing of PyTorch-shaped params into lane-dense bf16 MXU operands.
# ----------------------------------------------------------------------------
def pack_operands(params, output_dim):
    f32 = np.float32
    w1 = np.asarray(params["conv1_w"], f32); b1 = np.asarray(params["conv1_b"], f32)
    w2 = np.asarray(params["conv2_w"], f32); b2 = np.asarray(params["conv2_b"], f32)
    fw1 = np.asarray(params["fc1_w"], f32);  fb1 = np.asarray(params["fc1_b"], f32)
    fw2 = np.asarray(params["fc2_w"], f32);  fb2 = np.asarray(params["fc2_b"], f32)
    fw3 = np.asarray(params["fc3_w"], f32);  fb3 = np.asarray(params["fc3_b"], f32)

    # conv1 Toeplitz over the 480-wide im2col lanes:
    # T1[(kh*3+c)*32 + ow + kw, oc*28 + ow] = w1[oc, c, kh, kw]
    ow = np.arange(28)
    T1 = np.zeros((480, 256), f32)
    for kh in range(5):
        for c in range(3):
            for kw in range(5):
                for oc in range(6):
                    T1[(kh * 3 + c) * 32 + ow + kw, oc * 28 + ow] = w1[oc, c, kh, kw]
    B1 = np.zeros((1, 256), f32)
    for oc in range(6):
        B1[0, oc * 28:(oc + 1) * 28] = b1[oc]

    # pool1 width one-hot selectors (even / odd columns)
    C0 = np.zeros((256, 128), f32); C1 = np.zeros((256, 128), f32)
    for c in range(6):
        for w in range(14):
            C0[c * 28 + 2 * w, c * 14 + w] = 1.0
            C1[c * 28 + 2 * w + 1, c * 14 + w] = 1.0

    # conv2 Toeplitz per kernel row: T2[kh, c*14+ow+kw, oc*10+ow] = w2[oc,c,kh,kw]
    ow = np.arange(10)
    T2 = np.zeros((5, 128, 256), f32)
    for kh in range(5):
        for c in range(6):
            for kw in range(5):
                for oc in range(16):
                    T2[kh, c * 14 + ow + kw, oc * 10 + ow] = w2[oc, c, kh, kw]
    B2 = np.zeros((1, 256), f32)
    for oc in range(16):
        B2[0, oc * 10:(oc + 1) * 10] = b2[oc]

    # pool2 width one-hot selectors
    D0 = np.zeros((256, 128), f32); D1 = np.zeros((256, 128), f32)
    for oc in range(16):
        for w in range(5):
            D0[oc * 10 + 2 * w, oc * 5 + w] = 1.0
            D1[oc * 10 + 2 * w + 1, oc * 5 + w] = 1.0

    # fc1 packed to a single (640,128) RHS; folds the PyTorch .view(-1,400)
    # order: F1[h*128 + oc*5 + w, n] = fc1_w[n, oc*25 + h*5 + w]
    F1 = np.zeros((640, 128), f32)
    fw1_4 = fw1.reshape(120, 16, 5, 5)               # (n, oc, h, w)
    for h in range(5):
        F1[h * 128:h * 128 + 80, :120] = (
            fw1_4[:, :, h, :].transpose(1, 2, 0).reshape(80, 120))
    FB1 = np.zeros((1, 128), f32); FB1[0, :120] = fb1

    F2 = np.zeros((128, 128), f32); F2[:120, :84] = fw2.T
    FB2 = np.zeros((1, 128), f32); FB2[0, :84] = fb2

    F3 = np.zeros((128, 128), f32); F3[:84, :output_dim] = fw3.T
    FB3 = np.zeros((1, 128), f32); FB3[0, :output_dim] = fb3

    bf = lambda a: jnp.asarray(a, jnp.bfloat16)
    fj = lambda a: jnp.asarray(a, jnp.float32)
    return {
        "T1": bf(T1), "B1": fj(B1), "C0": bf(C0), "C1": bf(C1),
        "T2": bf(T2), "B2": fj(B2), "D0": bf(D0), "D1": bf(D1),
        "F1": bf(F1), "FB1": fj(FB1), "F2": bf(F2), "FB2": fj(FB2),
        "F3": bf(F3), "FB3": fj(FB3),
    }


# ----------------------------------------------------------------------------
# Wrapper-side layout plumbing: im2col conv1's 5 kernel rows + 3 channels into
# a 480-wide lane dim and interleave images image-minor within each NB group.
# ----------------------------------------------------------------------------
def _pack_input(x, nb):
    """x: (Bp,3,32,32) f32 with Bp % nb == 0 ->
    (Bp//nb * 28*nb, 480) bf16, row = (g*28 + oh)*nb + n, lane = (kh*3+c)*32 + w,
    value = x[g*nb + n, c, oh + kh, w]."""
    bp = x.shape[0]
    g = bp // nb
    xs = jnp.stack([x[:, :, kh:kh + 28, :] for kh in range(5)], axis=1)  # (Bp,5,3,28,32)
    xs = xs.reshape(g, nb, 5, 3, 28, 32).transpose(0, 4, 1, 2, 3, 5)      # (g,28,nb,5,3,32)
    return xs.reshape(g * 28 * nb, 480).astype(jnp.bfloat16)


# ----------------------------------------------------------------------------
# Forward pass: one fused pallas_call, NB images per (parallel) grid step.
# ----------------------------------------------------------------------------
def lenet5_forward(ops, x, output_dim, nb=NB):
    """x: (B, 3, 32, 32) float32 NCHW -> logits (B, output_dim)."""
    b = x.shape[0]
    bp = ((b + nb - 1) // nb) * nb
    if bp != b:
        x = jnp.concatenate(
            [x, jnp.zeros((bp - b,) + x.shape[1:], x.dtype)], axis=0)
    g = bp // nb
    xp = _pack_input(x, nb)

    def full(shape):
        return pl.BlockSpec(shape, lambda i, _n=len(shape): (0,) * _n)

    out = pl.pallas_call(
        _lenet5_kernel,
        out_shape=jax.ShapeDtypeStruct((bp, 128), jnp.float32),
        grid=(g,),
        in_specs=[
            pl.BlockSpec((28 * nb, 480), lambda i: (i, 0)),      # packed images
            full((480, 256)), full((1, 256)),                    # T1, B1
            full((256, 128)), full((256, 128)),                  # C0, C1
            full((5, 128, 256)), full((1, 256)),                 # T2, B2
            full((256, 128)), full((256, 128)),                  # D0, D1
            full((640, 128)), full((1, 128)),                    # F1, FB1
            full((128, 128)), full((1, 128)),                    # F2, FB2
            full((128, 128)), full((1, 128)),                    # F3, FB3
        ],
        out_specs=pl.BlockSpec((nb, 128), lambda i: (i, 0)),
        scratch_shapes=[
            pltpu.VMEM((28 * nb, 128), jnp.float32),   # m1_s: pool1 width result
            pltpu.VMEM((14 * nb, 128), jnp.float32),   # p1_s: pool1 output
            pltpu.VMEM((10 * nb, 128), jnp.float32),   # m2_s: pool2 width result
            pltpu.VMEM((nb, 640), jnp.float32),        # fc_s: fc1 input
        ],
        compiler_params=pltpu.CompilerParams(
            dimension_semantics=("parallel",)),
    )(xp, ops["T1"], ops["B1"], ops["C0"], ops["C1"],
      ops["T2"], ops["B2"], ops["D0"], ops["D1"],
      ops["F1"], ops["FB1"], ops["F2"], ops["FB2"], ops["F3"], ops["FB3"])

    # padded logits -> (B, output_dim)
    return out[:b, :output_dim]


# ----------------------------------------------------------------------------
# Plain-JAX reference of the original PyTorch module (for the self-check).
# ----------------------------------------------------------------------------
def lenet5_reference(params, x):
    dn = ("NCHW", "OIHW", "NCHW")
    y = jax.lax.conv_general_dilated(x, params["conv1_w"], (1, 1), "VALID",
                                     dimension_numbers=dn)
    y = jax.nn.relu(y + params["conv1_b"][None, :, None, None])
    y = jax.lax.reduce_window(y, -jnp.inf, jax.lax.max,
                              (1, 1, 2, 2), (1, 1, 2, 2), "VALID")
    y = jax.lax.conv_general_dilated(y, params["conv2_w"], (1, 1), "VALID",
                                     dimension_numbers=dn)
    y = jax.nn.relu(y + params["conv2_b"][None, :, None, None])
    y = jax.lax.reduce_window(y, -jnp.inf, jax.lax.max,
                              (1, 1, 2, 2), (1, 1, 2, 2), "VALID")
    y = y.reshape(y.shape[0], -1)
    y = jax.nn.relu(y @ params["fc1_w"].T + params["fc1_b"])
    y = jax.nn.relu(y @ params["fc2_w"].T + params["fc2_b"])
    return y @ params["fc3_w"].T + params["fc3_b"]


if __name__ == "__main__":
    key = jax.random.PRNGKey(0)
    k_params, k_x = jax.random.split(key)

    output_dim = 10
    batch = 16                      # grid = batch/NB = 2 -> both v7x TCs get work
    # LeNet5's .view(-1, 16*5*5) fixes the input at 3x32x32.
    x = jax.random.normal(k_x, (batch, 3, 32, 32), dtype=jnp.float32)

    params = init_lenet5_params(k_params, output_dim)
    ops = pack_operands(params, output_dim)

    fwd = jax.jit(functools.partial(lenet5_forward, output_dim=output_dim))
    out = jax.block_until_ready(fwd(ops, x))
    assert out.shape == (batch, output_dim), out.shape

    # Numerical self-check against the plain-JAX reference of the PyTorch model.
    # (bf16 MXU operands -> a few percent tolerance.)
    ref = jax.block_until_ready(jax.jit(lenet5_reference)(params, x))
    np.testing.assert_allclose(np.asarray(out), np.asarray(ref),
                               rtol=5e-2, atol=5e-2)

    print("KERNEL_OK")
</pallas_src>

<mosaic_0001>
module attributes {stable_mosaic.version = 11 : i64} {
  func.func @_lenet5_kernel(%arg0: i32, %arg1: memref<224x480xbf16, #tpu.memory_space<vmem>>, %arg2: memref<480x256xbf16, #tpu.memory_space<vmem>>, %arg3: memref<1x256xf32, #tpu.memory_space<vmem>>, %arg4: memref<256x128xbf16, #tpu.memory_space<vmem>>, %arg5: memref<256x128xbf16, #tpu.memory_space<vmem>>, %arg6: memref<5x128x256xbf16, #tpu.memory_space<vmem>>, %arg7: memref<1x256xf32, #tpu.memory_space<vmem>>, %arg8: memref<256x128xbf16, #tpu.memory_space<vmem>>, %arg9: memref<256x128xbf16, #tpu.memory_space<vmem>>, %arg10: memref<640x128xbf16, #tpu.memory_space<vmem>>, %arg11: memref<1x128xf32, #tpu.memory_space<vmem>>, %arg12: memref<128x128xbf16, #tpu.memory_space<vmem>>, %arg13: memref<1x128xf32, #tpu.memory_space<vmem>>, %arg14: memref<128x128xbf16, #tpu.memory_space<vmem>>, %arg15: memref<1x128xf32, #tpu.memory_space<vmem>>, %arg16: memref<8x128xf32, #tpu.memory_space<vmem>>, %arg17: memref<224x128xf32, #tpu.memory_space<vmem>>, %arg18: memref<112x128xf32, #tpu.memory_space<vmem>>, %arg19: memref<80x128xf32, #tpu.memory_space<vmem>>, %arg20: memref<8x640xf32, #tpu.memory_space<vmem>>) attributes {dimension_semantics = [#tpu.dimension_semantics<parallel>], iteration_bounds = array<i64: 2>, scalar_prefetch = 0 : i64, scratch_operands = 4 : i64, tpu.core_type = #tpu.core_type<tc>, window_params = [{transform_indices = @transform_0, window_bounds = array<i64: 224, 480>}, {pipeline_mode = #tpu.pipeline_mode<synchronous>, transform_indices = @transform_1, window_bounds = array<i64: 480, 256>}, {pipeline_mode = #tpu.pipeline_mode<synchronous>, transform_indices = @transform_2, window_bounds = array<i64: 1, 256>}, {pipeline_mode = #tpu.pipeline_mode<synchronous>, transform_indices = @transform_3, window_bounds = array<i64: 256, 128>}, {pipeline_mode = #tpu.pipeline_mode<synchronous>, transform_indices = @transform_4, window_bounds = array<i64: 256, 128>}, {pipeline_mode = #tpu.pipeline_mode<synchronous>, transform_indices = @transform_5, window_bounds = array<i64: 5, 128, 256>}, {pipeline_mode = #tpu.pipeline_mode<synchronous>, transform_indices = @transform_6, window_bounds = array<i64: 1, 256>}, {pipeline_mode = #tpu.pipeline_mode<synchronous>, transform_indices = @transform_7, window_bounds = array<i64: 256, 128>}, {pipeline_mode = #tpu.pipeline_mode<synchronous>, transform_indices = @transform_8, window_bounds = array<i64: 256, 128>}, {pipeline_mode = #tpu.pipeline_mode<synchronous>, transform_indices = @transform_9, window_bounds = array<i64: 640, 128>}, {pipeline_mode = #tpu.pipeline_mode<synchronous>, transform_indices = @transform_10, window_bounds = array<i64: 1, 128>}, {pipeline_mode = #tpu.pipeline_mode<synchronous>, transform_indices = @transform_11, window_bounds = array<i64: 128, 128>}, {pipeline_mode = #tpu.pipeline_mode<synchronous>, transform_indices = @transform_12, window_bounds = array<i64: 1, 128>}, {pipeline_mode = #tpu.pipeline_mode<synchronous>, transform_indices = @transform_13, window_bounds = array<i64: 128, 128>}, {pipeline_mode = #tpu.pipeline_mode<synchronous>, transform_indices = @transform_14, window_bounds = array<i64: 1, 128>}, {transform_indices = @transform_15, window_bounds = array<i64: 8, 128>}]} {
    %c0 = arith.constant 0 : index
    %c0_0 = arith.constant 0 : index
    %0 = vector.load %arg1[%c0, %c0_0] : memref<224x480xbf16, #tpu.memory_space<vmem>>, vector<224x480xbf16>
    %c0_1 = arith.constant 0 : index
    %c0_2 = arith.constant 0 : index
    %1 = vector.load %arg2[%c0_1, %c0_2] : memref<480x256xbf16, #tpu.memory_space<vmem>>, vector<480x256xbf16>
    %cst = arith.constant dense<0.000000e+00> : vector<224x256xf32>
    %2 = tpu.matmul %0, %1, %cst {dimension_numbers = #tpu.dot_dimension_numbers<[1], [0], [0], [1], [0, 0, 1, 1], [], []>} : vector<224x480xbf16>, vector<480x256xbf16>, vector<224x256xf32> -> vector<224x256xf32>
    %c0_3 = arith.constant 0 : index
    %c0_4 = arith.constant 0 : index
    %3 = vector.load %arg3[%c0_3, %c0_4] : memref<1x256xf32, #tpu.memory_space<vmem>>, vector<1x256xf32>
    %4 = vector.broadcast %3 : vector<1x256xf32> to vector<224x256xf32>
    %5 = arith.addf %2, %4 : vector<224x256xf32>
    %cst_5 = arith.constant 0.000000e+00 : f32
    %6 = vector.broadcast %cst_5 : f32 to vector<224x256xf32>
    %7 = arith.maximumf %5, %6 : vector<224x256xf32>
    %8 = arith.truncf %7 : vector<224x256xf32> to vector<224x256xbf16>
    %c0_6 = arith.constant 0 : index
    %c0_7 = arith.constant 0 : index
    %9 = vector.load %arg4[%c0_6, %c0_7] : memref<256x128xbf16, #tpu.memory_space<vmem>>, vector<256x128xbf16>
    %cst_8 = arith.constant dense<0.000000e+00> : vector<224x128xf32>
    %10 = tpu.matmul %8, %9, %cst_8 {dimension_numbers = #tpu.dot_dimension_numbers<[1], [0], [0], [1], [0, 0, 1, 1], [], []>} : vector<224x256xbf16>, vector<256x128xbf16>, vector<224x128xf32> -> vector<224x128xf32>
    %c0_9 = arith.constant 0 : index
    %c0_10 = arith.constant 0 : index
    %11 = vector.load %arg5[%c0_9, %c0_10] : memref<256x128xbf16, #tpu.memory_space<vmem>>, vector<256x128xbf16>
    %cst_11 = arith.constant dense<0.000000e+00> : vector<224x128xf32>
    %12 = tpu.matmul %8, %11, %cst_11 {dimension_numbers = #tpu.dot_dimension_numbers<[1], [0], [0], [1], [0, 0, 1, 1], [], []>} : vector<224x256xbf16>, vector<256x128xbf16>, vector<224x128xf32> -> vector<224x128xf32>
    %13 = arith.maximumf %10, %12 : vector<224x128xf32>
    %c0_12 = arith.constant 0 : index
    %c0_13 = arith.constant 0 : index
    %14 = vector.load %arg17[%c0_12, %c0_13] : memref<224x128xf32, #tpu.memory_space<vmem>>, vector<224x128xf32>
    tpu.vector_store %arg17[%c0_12, %c0_13], %13 {strides = array<i32>} : memref<224x128xf32, #tpu.memory_space<vmem>>, vector<224x128xf32>,
    %c0_14 = arith.constant 0 : index
    %c0_15 = arith.constant 0 : index
    %15 = vector.load %arg17[%c0_14, %c0_15] : memref<224x128xf32, #tpu.memory_space<vmem>>, vector<8x128xf32>
    %c8 = arith.constant 8 : index
    %c0_16 = arith.constant 0 : index
    %16 = vector.load %arg17[%c8, %c0_16] : memref<224x128xf32, #tpu.memory_space<vmem>>, vector<8x128xf32>
    %17 = arith.maximumf %15, %16 : vector<8x128xf32>
    %c0_17 = arith.constant 0 : index
    %c0_18 = arith.constant 0 : index
    %18 = vector.load %arg18[%c0_17, %c0_18] : memref<112x128xf32, #tpu.memory_space<vmem>>, vector<8x128xf32>
    tpu.vector_store %arg18[%c0_17, %c0_18], %17 {strides = array<i32>} : memref<112x128xf32, #tpu.memory_space<vmem>>, vector<8x128xf32>,
    %c16 = arith.constant 16 : index
    %c0_19 = arith.constant 0 : index
    %19 = vector.load %arg17[%c16, %c0_19] : memref<224x128xf32, #tpu.memory_space<vmem>>, vector<8x128xf32>
    %c24 = arith.constant 24 : index
    %c0_20 = arith.constant 0 : index
    %20 = vector.load %arg17[%c24, %c0_20] : memref<224x128xf32, #tpu.memory_space<vmem>>, vector<8x128xf32>
    %21 = arith.maximumf %19, %20 : vector<8x128xf32>
    %c8_21 = arith.constant 8 : index
    %c0_22 = arith.constant 0 : index
    %22 = vector.load %arg18[%c8_21, %c0_22] : memref<112x128xf32, #tpu.memory_space<vmem>>, vector<8x128xf32>
    tpu.vector_store %arg18[%c8_21, %c0_22], %21 {strides = array<i32>} : memref<112x128xf32, #tpu.memory_space<vmem>>, vector<8x128xf32>,
    %c32 = arith.constant 32 : index
    %c0_23 = arith.constant 0 : index
    %23 = vector.load %arg17[%c32, %c0_23] : memref<224x128xf32, #tpu.memory_space<vmem>>, vector<8x128xf32>
    %c40 = arith.constant 40 : index
    %c0_24 = arith.constant 0 : index
    %24 = vector.load %arg17[%c40, %c0_24] : memref<224x128xf32, #tpu.memory_space<vmem>>, vector<8x128xf32>
    %25 = arith.maximumf %23, %24 : vector<8x128xf32>
    %c16_25 = arith.constant 16 : index
    %c0_26 = arith.constant 0 : index
    %26 = vector.load %arg18[%c16_25, %c0_26] : memref<112x128xf32, #tpu.memory_space<vmem>>, vector<8x128xf32>
    tpu.vector_store %arg18[%c16_25, %c0_26], %25 {strides = array<i32>} : memref<112x128xf32, #tpu.memory_space<vmem>>, vector<8x128xf32>,
    %c48 = arith.constant 48 : index
    %c0_27 = arith.constant 0 : index
    %27 = vector.load %arg17[%c48, %c0_27] : memref<224x128xf32, #tpu.memory_space<vmem>>, vector<8x128xf32>
    %c56 = arith.constant 56 : index
    %c0_28 = arith.constant 0 : index
    %28 = vector.load %arg17[%c56, %c0_28] : memref<224x128xf32, #tpu.memory_space<vmem>>, vector<8x128xf32>
    %29 = arith.maximumf %27, %28 : vector<8x128xf32>
    %c24_29 = arith.constant 24 : index
    %c0_30 = arith.constant 0 : index
    %30 = vector.load %arg18[%c24_29, %c0_30] : memref<112x128xf32, #tpu.memory_space<vmem>>, vector<8x128xf32>
    tpu.vector_store %arg18[%c24_29, %c0_30], %29 {strides = array<i32>} : memref<112x128xf32, #tpu.memory_space<vmem>>, vector<8x128xf32>,
    %c64 = arith.constant 64 : index
    %c0_31 = arith.constant 0 : index
    %31 = vector.load %arg17[%c64, %c0_31] : memref<224x128xf32, #tpu.memory_space<vmem>>, vector<8x128xf32>
    %c72 = arith.constant 72 : index
    %c0_32 = arith.constant 0 : index
    %32 = vector.load %arg17[%c72, %c0_32] : memref<224x128xf32, #tpu.memory_space<vmem>>, vector<8x128xf32>
    %33 = arith.maximumf %31, %32 : vector<8x128xf32>
    %c32_33 = arith.constant 32 : index
    %c0_34 = arith.constant 0 : index
    %34 = vector.load %arg18[%c32_33, %c0_34] : memref<112x128xf32, #tpu.memory_space<vmem>>, vector<8x128xf32>
    tpu.vector_store %arg18[%c32_33, %c0_34], %33 {strides = array<i32>} : memref<112x128xf32, #tpu.memory_space<vmem>>, vector<8x128xf32>,
    %c80 = arith.constant 80 : index
    %c0_35 = arith.constant 0 : index
    %35 = vector.load %arg17[%c80, %c0_35] : memref<224x128xf32, #tpu.memory_space<vmem>>, vector<8x128xf32>
    %c88 = arith.constant 88 : index
    %c0_36 = arith.constant 0 : index
    %36 = vector.load %arg17[%c88, %c0_36] : memref<224x128xf32, #tpu.memory_space<vmem>>, vector<8x128xf32>
    %37 = arith.maximumf %35, %36 : vector<8x128xf32>
    %c40_37 = arith.constant 40 : index
    %c0_38 = arith.constant 0 : index
    %38 = vector.load %arg18[%c40_37, %c0_38] : memref<112x128xf32, #tpu.memory_space<vmem>>, vector<8x128xf32>
    tpu.vector_store %arg18[%c40_37, %c0_38], %37 {strides = array<i32>} : memref<112x128xf32, #tpu.memory_space<vmem>>, vector<8x128xf32>,
    %c96 = arith.constant 96 : index
    %c0_39 = arith.constant 0 : index
    %39 = vector.load %arg17[%c96, %c0_39] : memref<224x128xf32, #tpu.memory_space<vmem>>, vector<8x128xf32>
    %c104 = arith.constant 104 : index
    %c0_40 = arith.constant 0 : index
    %40 = vector.load %arg17[%c104, %c0_40] : memref<224x128xf32, #tpu.memory_space<vmem>>, vector<8x128xf32>
    %41 = arith.maximumf %39, %40 : vector<8x128xf32>
    %c48_41 = arith.constant 48 : index
    %c0_42 = arith.constant 0 : index
    %42 = vector.load %arg18[%c48_41, %c0_42] : memref<112x128xf32, #tpu.memory_space<vmem>>, vector<8x128xf32>
    tpu.vector_store %arg18[%c48_41, %c0_42], %41 {strides = array<i32>} : memref<112x128xf32, #tpu.memory_space<vmem>>, vector<8x128xf32>,
    %c112 = arith.constant 112 : index
    %c0_43 = arith.constant 0 : index
    %43 = vector.load %arg17[%c112, %c0_43] : memref<224x128xf32, #tpu.memory_space<vmem>>, vector<8x128xf32>
    %c120 = arith.constant 120 : index
    %c0_44 = arith.constant 0 : index
    %44 = vector.load %arg17[%c120, %c0_44] : memref<224x128xf32, #tpu.memory_space<vmem>>, vector<8x128xf32>
    %45 = arith.maximumf %43, %44 : vector<8x128xf32>
    %c56_45 = arith.constant 56 : index
    %c0_46 = arith.constant 0 : index
    %46 = vector.load %arg18[%c56_45, %c0_46] : memref<112x128xf32, #tpu.memory_space<vmem>>, vector<8x128xf32>
    tpu.vector_store %arg18[%c56_45, %c0_46], %45 {strides = array<i32>} : memref<112x128xf32, #tpu.memory_space<vmem>>, vector<8x128xf32>,
    %c128 = arith.constant 128 : index
    %c0_47 = arith.constant 0 : index
    %47 = vector.load %arg17[%c128, %c0_47] : memref<224x128xf32, #tpu.memory_space<vmem>>, vector<8x128xf32>
    %c136 = arith.constant 136 : index
    %c0_48 = arith.constant 0 : index
    %48 = vector.load %arg17[%c136, %c0_48] : memref<224x128xf32, #tpu.memory_space<vmem>>, vector<8x128xf32>
    %49 = arith.maximumf %47, %48 : vector<8x128xf32>
    %c64_49 = arith.constant 64 : index
    %c0_50 = arith.constant 0 : index
    %50 = vector.load %arg18[%c64_49, %c0_50] : memref<112x128xf32, #tpu.memory_space<vmem>>, vector<8x128xf32>
    tpu.vector_store %arg18[%c64_49, %c0_50], %49 {strides = array<i32>} : memref<112x128xf32, #tpu.memory_space<vmem>>, vector<8x128xf32>,
    %c144 = arith.constant 144 : index
    %c0_51 = arith.constant 0 : index
    %51 = vector.load %arg17[%c144, %c0_51] : memref<224x128xf32, #tpu.memory_space<vmem>>, vector<8x128xf32>
    %c152 = arith.constant 152 : index
    %c0_52 = arith.constant 0 : index
    %52 = vector.load %arg17[%c152, %c0_52] : memref<224x128xf32, #tpu.memory_space<vmem>>, vector<8x128xf32>
    %53 = arith.maximumf %51, %52 : vector<8x128xf32>
    %c72_53 = arith.constant 72 : index
    %c0_54 = arith.constant 0 : index
    %54 = vector.load %arg18[%c72_53, %c0_54] : memref<112x128xf32, #tpu.memory_space<vmem>>, vector<8x128xf32>
    tpu.vector_store %arg18[%c72_53, %c0_54], %53 {strides = array<i32>} : memref<112x128xf32, #tpu.memory_space<vmem>>, vector<8x128xf32>,
    %c160 = arith.constant 160 : index
    %c0_55 = arith.constant 0 : index
    %55 = vector.load %arg17[%c160, %c0_55] : memref<224x128xf32, #tpu.memory_space<vmem>>, vector<8x128xf32>
    %c168 = arith.constant 168 : index
    %c0_56 = arith.constant 0 : index
    %56 = vector.load %arg17[%c168, %c0_56] : memref<224x128xf32, #tpu.memory_space<vmem>>, vector<8x128xf32>
    %57 = arith.maximumf %55, %56 : vector<8x128xf32>
    %c80_57 = arith.constant 80 : index
    %c0_58 = arith.constant 0 : index
    %58 = vector.load %arg18[%c80_57, %c0_58] : memref<112x128xf32, #tpu.memory_space<vmem>>, vector<8x128xf32>
    tpu.vector_store %arg18[%c80_57, %c0_58], %57 {strides = array<i32>} : memref<112x128xf32, #tpu.memory_space<vmem>>, vector<8x128xf32>,
    %c176 = arith.constant 176 : index
    %c0_59 = arith.constant 0 : index
    %59 = vector.load %arg17[%c176, %c0_59] : memref<224x128xf32, #tpu.memory_space<vmem>>, vector<8x128xf32>
    %c184 = arith.constant 184 : index
    %c0_60 = arith.constant 0 : index
    %60 = vector.load %arg17[%c184, %c0_60] : memref<224x128xf32, #tpu.memory_space<vmem>>, vector<8x128xf32>
    %61 = arith.maximumf %59, %60 : vector<8x128xf32>
    %c88_61 = arith.constant 88 : index
    %c0_62 = arith.constant 0 : index
    %62 = vector.load %arg18[%c88_61, %c0_62] : memref<112x128xf32, #tpu.memory_space<vmem>>, vector<8x128xf32>
    tpu.vector_store %arg18[%c88_61, %c0_62], %61 {strides = array<i32>} : memref<112x128xf32, #tpu.memory_space<vmem>>, vector<8x128xf32>,
    %c192 = arith.constant 192 : index
    %c0_63 = arith.constant 0 : index
    %63 = vector.load %arg17[%c192, %c0_63] : memref<224x128xf32, #tpu.memory_space<vmem>>, vector<8x128xf32>
    %c200 = arith.constant 200 : index
    %c0_64 = arith.constant 0 : index
    %64 = vector.load %arg17[%c200, %c0_64] : memref<224x128xf32, #tpu.memory_space<vmem>>, vector<8x128xf32>
    %65 = arith.maximumf %63, %64 : vector<8x128xf32>
    %c96_65 = arith.constant 96 : index
    %c0_66 = arith.constant 0 : index
    %66 = vector.load %arg18[%c96_65, %c0_66] : memref<112x128xf32, #tpu.memory_space<vmem>>, vector<8x128xf32>
    tpu.vector_store %arg18[%c96_65, %c0_66], %65 {strides = array<i32>} : memref<112x128xf32, #tpu.memory_space<vmem>>, vector<8x128xf32>,
    %c208 = arith.constant 208 : index
    %c0_67 = arith.constant 0 : index
    %67 = vector.load %arg17[%c208, %c0_67] : memref<224x128xf32, #tpu.memory_space<vmem>>, vector<8x128xf32>
    %c216 = arith.constant 216 : index
    %c0_68 = arith.constant 0 : index
    %68 = vector.load %arg17[%c216, %c0_68] : memref<224x128xf32, #tpu.memory_space<vmem>>, vector<8x128xf32>
    %69 = arith.maximumf %67, %68 : vector<8x128xf32>
    %c104_69 = arith.constant 104 : index
    %c0_70 = arith.constant 0 : index
    %70 = vector.load %arg18[%c104_69, %c0_70] : memref<112x128xf32, #tpu.memory_space<vmem>>, vector<8x128xf32>
    tpu.vector_store %arg18[%c104_69, %c0_70], %69 {strides = array<i32>} : memref<112x128xf32, #tpu.memory_space<vmem>>, vector<8x128xf32>,
    %cst_71 = arith.constant 0.000000e+00 : f32
    %71 = vector.broadcast %cst_71 : f32 to vector<80x256xf32>
    %c0_72 = arith.constant 0 : index
    %c0_73 = arith.constant 0 : index
    %72 = vector.load %arg18[%c0_72, %c0_73] : memref<112x128xf32, #tpu.memory_space<vmem>>, vector<80x128xf32>
    %73 = arith.truncf %72 : vector<80x128xf32> to vector<80x128xbf16>
    %c0_74 = arith.constant 0 : index
    %c0_75 = arith.constant 0 : index
    %c0_76 = arith.constant 0 : index
    %74 = vector.load %arg6[%c0_74, %c0_75, %c0_76] : memref<5x128x256xbf16, #tpu.memory_space<vmem>>, vector<1x128x256xbf16>
    %75 = vector.shape_cast %74 : vector<1x128x256xbf16> to vector<128x256xbf16>
    %cst_77 = arith.constant dense<0.000000e+00> : vector<80x256xf32>
    %76 = tpu.matmul %73, %75, %cst_77 {dimension_numbers = #tpu.dot_dimension_numbers<[1], [0], [0], [1], [0, 0, 1, 1], [], []>} : vector<80x128xbf16>, vector<128x256xbf16>, vector<80x256xf32> -> vector<80x256xf32>
    %77 = arith.addf %71, %76 : vector<80x256xf32>
    %c8_78 = arith.constant 8 : index
    %c0_79 = arith.constant 0 : index
    %78 = vector.load %arg18[%c8_78, %c0_79] : memref<112x128xf32, #tpu.memory_space<vmem>>, vector<80x128xf32>
    %79 = arith.truncf %78 : vector<80x128xf32> to vector<80x128xbf16>
    %c1 = arith.constant 1 : index
    %c0_80 = arith.constant 0 : index
    %c0_81 = arith.constant 0 : index
    %80 = vector.load %arg6[%c1, %c0_80, %c0_81] : memref<5x128x256xbf16, #tpu.memory_space<vmem>>, vector<1x128x256xbf16>
    %81 = vector.shape_cast %80 : vector<1x128x256xbf16> to vector<128x256xbf16>
    %cst_82 = arith.constant dense<0.000000e+00> : vector<80x256xf32>
    %82 = tpu.matmul %79, %81, %cst_82 {dimension_numbers = #tpu.dot_dimension_numbers<[1], [0], [0], [1], [0, 0, 1, 1], [], []>} : vector<80x128xbf16>, vector<128x256xbf16>, vector<80x256xf32> -> vector<80x256xf32>
    %83 = arith.addf %77, %82 : vector<80x256xf32>
    %c16_83 = arith.constant 16 : index
    %c0_84 = arith.constant 0 : index
    %84 = vector.load %arg18[%c16_83, %c0_84] : memref<112x128xf32, #tpu.memory_space<vmem>>, vector<80x128xf32>
    %85 = arith.truncf %84 : vector<80x128xf32> to vector<80x128xbf16>
    %c2 = arith.constant 2 : index
    %c0_85 = arith.constant 0 : index
    %c0_86 = arith.constant 0 : index
    %86 = vector.load %arg6[%c2, %c0_85, %c0_86] : memref<5x128x256xbf16, #tpu.memory_space<vmem>>, vector<1x128x256xbf16>
    %87 = vector.shape_cast %86 : vector<1x128x256xbf16> to vector<128x256xbf16>
    %cst_87 = arith.constant dense<0.000000e+00> : vector<80x256xf32>
    %88 = tpu.matmul %85, %87, %cst_87 {dimension_numbers = #tpu.dot_dimension_numbers<[1], [0], [0], [1], [0, 0, 1, 1], [], []>} : vector<80x128xbf16>, vector<128x256xbf16>, vector<80x256xf32> -> vector<80x256xf32>
    %89 = arith.addf %83, %88 : vector<80x256xf32>
    %c24_88 = arith.constant 24 : index
    %c0_89 = arith.constant 0 : index
    %90 = vector.load %arg18[%c24_88, %c0_89] : memref<112x128xf32, #tpu.memory_space<vmem>>, vector<80x128xf32>
    %91 = arith.truncf %90 : vector<80x128xf32> to vector<80x128xbf16>
    %c3 = arith.constant 3 : index
    %c0_90 = arith.constant 0 : index
    %c0_91 = arith.constant 0 : index
    %92 = vector.load %arg6[%c3, %c0_90, %c0_91] : memref<5x128x256xbf16, #tpu.memory_space<vmem>>, vector<1x128x256xbf16>
    %93 = vector.shape_cast %92 : vector<1x128x256xbf16> to vector<128x256xbf16>
    %cst_92 = arith.constant dense<0.000000e+00> : vector<80x256xf32>
    %94 = tpu.matmul %91, %93, %cst_92 {dimension_numbers = #tpu.dot_dimension_numbers<[1], [0], [0], [1], [0, 0, 1, 1], [], []>} : vector<80x128xbf16>, vector<128x256xbf16>, vector<80x256xf32> -> vector<80x256xf32>
    %95 = arith.addf %89, %94 : vector<80x256xf32>
    %c32_93 = arith.constant 32 : index
    %c0_94 = arith.constant 0 : index
    %96 = vector.load %arg18[%c32_93, %c0_94] : memref<112x128xf32, #tpu.memory_space<vmem>>, vector<80x128xf32>
    %97 = arith.truncf %96 : vector<80x128xf32> to vector<80x128xbf16>
    %c4 = arith.constant 4 : index
    %c0_95 = arith.constant 0 : index
    %c0_96 = arith.constant 0 : index
    %98 = vector.load %arg6[%c4, %c0_95, %c0_96] : memref<5x128x256xbf16, #tpu.memory_space<vmem>>, vector<1x128x256xbf16>
    %99 = vector.shape_cast %98 : vector<1x128x256xbf16> to vector<128x256xbf16>
    %cst_97 = arith.constant dense<0.000000e+00> : vector<80x256xf32>
    %100 = tpu.matmul %97, %99, %cst_97 {dimension_numbers = #tpu.dot_dimension_numbers<[1], [0], [0], [1], [0, 0, 1, 1], [], []>} : vector<80x128xbf16>, vector<128x256xbf16>, vector<80x256xf32> -> vector<80x256xf32>
    %101 = arith.addf %95, %100 : vector<80x256xf32>
    %c0_98 = arith.constant 0 : index
    %c0_99 = arith.constant 0 : index
    %102 = vector.load %arg7[%c0_98, %c0_99] : memref<1x256xf32, #tpu.memory_space<vmem>>, vector<1x256xf32>
    %103 = vector.broadcast %102 : vector<1x256xf32> to vector<80x256xf32>
    %104 = arith.addf %101, %103 : vector<80x256xf32>
    %cst_100 = arith.constant 0.000000e+00 : f32
    %105 = vector.broadcast %cst_100 : f32 to vector<80x256xf32>
    %106 = arith.maximumf %104, %105 : vector<80x256xf32>
    %107 = arith.truncf %106 : vector<80x256xf32> to vector<80x256xbf16>
    %c0_101 = arith.constant 0 : index
    %c0_102 = arith.constant 0 : index
    %108 = vector.load %arg8[%c0_101, %c0_102] : memref<256x128xbf16, #tpu.memory_space<vmem>>, vector<256x128xbf16>
    %cst_103 = arith.constant dense<0.000000e+00> : vector<80x128xf32>
    %109 = tpu.matmul %107, %108, %cst_103 {dimension_numbers = #tpu.dot_dimension_numbers<[1], [0], [0], [1], [0, 0, 1, 1], [], []>} : vector<80x256xbf16>, vector<256x128xbf16>, vector<80x128xf32> -> vector<80x128xf32>
    %c0_104 = arith.constant 0 : index
    %c0_105 = arith.constant 0 : index
    %110 = vector.load %arg9[%c0_104, %c0_105] : memref<256x128xbf16, #tpu.memory_space<vmem>>, vector<256x128xbf16>
    %cst_106 = arith.constant dense<0.000000e+00> : vector<80x128xf32>
    %111 = tpu.matmul %107, %110, %cst_106 {dimension_numbers = #tpu.dot_dimension_numbers<[1], [0], [0], [1], [0, 0, 1, 1], [], []>} : vector<80x256xbf16>, vector<256x128xbf16>, vector<80x128xf32> -> vector<80x128xf32>
    %112 = arith.maximumf %109, %111 : vector<80x128xf32>
    %c0_107 = arith.constant 0 : index
    %c0_108 = arith.constant 0 : index
    %113 = vector.load %arg19[%c0_107, %c0_108] : memref<80x128xf32, #tpu.memory_space<vmem>>, vector<80x128xf32>
    tpu.vector_store %arg19[%c0_107, %c0_108], %112 {strides = array<i32>} : memref<80x128xf32, #tpu.memory_space<vmem>>, vector<80x128xf32>,
    %c0_109 = arith.constant 0 : index
    %c0_110 = arith.constant 0 : index
    %114 = vector.load %arg19[%c0_109, %c0_110] : memref<80x128xf32, #tpu.memory_space<vmem>>, vector<8x128xf32>
    %c8_111 = arith.constant 8 : index
    %c0_112 = arith.constant 0 : index
    %115 = vector.load %arg19[%c8_111, %c0_112] : memref<80x128xf32, #tpu.memory_space<vmem>>, vector<8x128xf32>
    %116 = arith.maximumf %114, %115 : vector<8x128xf32>
    %c0_113 = arith.constant 0 : index
    %c0_114 = arith.constant 0 : index
    %117 = vector.load %arg20[%c0_113, %c0_114] : memref<8x640xf32, #tpu.memory_space<vmem>>, vector<8x128xf32>
    tpu.vector_store %arg20[%c0_113, %c0_114], %116 {strides = array<i32>} : memref<8x640xf32, #tpu.memory_space<vmem>>, vector<8x128xf32>,
    %c16_115 = arith.constant 16 : index
    %c0_116 = arith.constant 0 : index
    %118 = vector.load %arg19[%c16_115, %c0_116] : memref<80x128xf32, #tpu.memory_space<vmem>>, vector<8x128xf32>
    %c24_117 = arith.constant 24 : index
    %c0_118 = arith.constant 0 : index
    %119 = vector.load %arg19[%c24_117, %c0_118] : memref<80x128xf32, #tpu.memory_space<vmem>>, vector<8x128xf32>
    %120 = arith.maximumf %118, %119 : vector<8x128xf32>
    %c0_119 = arith.constant 0 : index
    %c128_120 = arith.constant 128 : index
    %121 = vector.load %arg20[%c0_119, %c128_120] : memref<8x640xf32, #tpu.memory_space<vmem>>, vector<8x128xf32>
    tpu.vector_store %arg20[%c0_119, %c128_120], %120 {strides = array<i32>} : memref<8x640xf32, #tpu.memory_space<vmem>>, vector<8x128xf32>,
    %c32_121 = arith.constant 32 : index
    %c0_122 = arith.constant 0 : index
    %122 = vector.load %arg19[%c32_121, %c0_122] : memref<80x128xf32, #tpu.memory_space<vmem>>, vector<8x128xf32>
    %c40_123 = arith.constant 40 : index
    %c0_124 = arith.constant 0 : index
    %123 = vector.load %arg19[%c40_123, %c0_124] : memref<80x128xf32, #tpu.memory_space<vmem>>, vector<8x128xf32>
    %124 = arith.maximumf %122, %123 : vector<8x128xf32>
    %c0_125 = arith.constant 0 : index
    %c256 = arith.constant 256 : index
    %125 = vector.load %arg20[%c0_125, %c256] : memref<8x640xf32, #tpu.memory_space<vmem>>, vector<8x128xf32>
    tpu.vector_store %arg20[%c0_125, %c256], %124 {strides = array<i32>} : memref<8x640xf32, #tpu.memory_space<vmem>>, vector<8x128xf32>,
    %c48_126 = arith.constant 48 : index
    %c0_127 = arith.constant 0 : index
    %126 = vector.load %arg19[%c48_126, %c0_127] : memref<80x128xf32, #tpu.memory_space<vmem>>, vector<8x128xf32>
    %c56_128 = arith.constant 56 : index
    %c0_129 = arith.constant 0 : index
    %127 = vector.load %arg19[%c56_128, %c0_129] : memref<80x128xf32, #tpu.memory_space<vmem>>, vector<8x128xf32>
    %128 = arith.maximumf %126, %127 : vector<8x128xf32>
    %c0_130 = arith.constant 0 : index
    %c384 = arith.constant 384 : index
    %129 = vector.load %arg20[%c0_130, %c384] : memref<8x640xf32, #tpu.memory_space<vmem>>, vector<8x128xf32>
    tpu.vector_store %arg20[%c0_130, %c384], %128 {strides = array<i32>} : memref<8x640xf32, #tpu.memory_space<vmem>>, vector<8x128xf32>,
    %c64_131 = arith.constant 64 : index
    %c0_132 = arith.constant 0 : index
    %130 = vector.load %arg19[%c64_131, %c0_132] : memref<80x128xf32, #tpu.memory_space<vmem>>, vector<8x128xf32>
    %c72_133 = arith.constant 72 : index
    %c0_134 = arith.constant 0 : index
    %131 = vector.load %arg19[%c72_133, %c0_134] : memref<80x128xf32, #tpu.memory_space<vmem>>, vector<8x128xf32>
    %132 = arith.maximumf %130, %131 : vector<8x128xf32>
    %c0_135 = arith.constant 0 : index
    %c512 = arith.constant 512 : index
    %133 = vector.load %arg20[%c0_135, %c512] : memref<8x640xf32, #tpu.memory_space<vmem>>, vector<8x128xf32>
    tpu.vector_store %arg20[%c0_135, %c512], %132 {strides = array<i32>} : memref<8x640xf32, #tpu.memory_space<vmem>>, vector<8x128xf32>,
    %c0_136 = arith.constant 0 : index
    %c0_137 = arith.constant 0 : index
    %134 = vector.load %arg20[%c0_136, %c0_137] : memref<8x640xf32, #tpu.memory_space<vmem>>, vector<8x640xf32>
    %135 = arith.truncf %134 : vector<8x640xf32> to vector<8x640xbf16>
    %c0_138 = arith.constant 0 : index
    %c0_139 = arith.constant 0 : index
    %136 = vector.load %arg10[%c0_138, %c0_139] : memref<640x128xbf16, #tpu.memory_space<vmem>>, vector<640x128xbf16>
    %cst_140 = arith.constant dense<0.000000e+00> : vector<8x128xf32>
    %137 = tpu.matmul %135, %136, %cst_140 {dimension_numbers = #tpu.dot_dimension_numbers<[1], [0], [0], [1], [0, 0, 1, 1], [], []>} : vector<8x640xbf16>, vector<640x128xbf16>, vector<8x128xf32> -> vector<8x128xf32>
    %c0_141 = arith.constant 0 : index
    %c0_142 = arith.constant 0 : index
    %138 = vector.load %arg11[%c0_141, %c0_142] : memref<1x128xf32, #tpu.memory_space<vmem>>, vector<1x128xf32>
    %139 = vector.broadcast %138 : vector<1x128xf32> to vector<8x128xf32>
    %140 = arith.addf %137, %139 : vector<8x128xf32>
    %cst_143 = arith.constant 0.000000e+00 : f32
    %141 = vector.broadcast %cst_143 : f32 to vector<8x128xf32>
    %142 = arith.maximumf %140, %141 : vector<8x128xf32>
    %143 = arith.truncf %142 : vector<8x128xf32> to vector<8x128xbf16>
    %c0_144 = arith.constant 0 : index
    %c0_145 = arith.constant 0 : index
    %144 = vector.load %arg12[%c0_144, %c0_145] : memref<128x128xbf16, #tpu.memory_space<vmem>>, vector<128x128xbf16>
    %cst_146 = arith.constant dense<0.000000e+00> : vector<8x128xf32>
    %145 = tpu.matmul %143, %144, %cst_146 {dimension_numbers = #tpu.dot_dimension_numbers<[1], [0], [0], [1], [0, 0, 1, 1], [], []>} : vector<8x128xbf16>, vector<128x128xbf16>, vector<8x128xf32> -> vector<8x128xf32>
    %c0_147 = arith.constant 0 : index
    %c0_148 = arith.constant 0 : index
    %146 = vector.load %arg13[%c0_147, %c0_148] : memref<1x128xf32, #tpu.memory_space<vmem>>, vector<1x128xf32>
    %147 = vector.broadcast %146 : vector<1x128xf32> to vector<8x128xf32>
    %148 = arith.addf %145, %147 : vector<8x128xf32>
    %cst_149 = arith.constant 0.000000e+00 : f32
    %149 = vector.broadcast %cst_149 : f32 to vector<8x128xf32>
    %150 = arith.maximumf %148, %149 : vector<8x128xf32>
    %151 = arith.truncf %150 : vector<8x128xf32> to vector<8x128xbf16>
    %c0_150 = arith.constant 0 : index
    %c0_151 = arith.constant 0 : index
    %152 = vector.load %arg14[%c0_150, %c0_151] : memref<128x128xbf16, #tpu.memory_space<vmem>>, vector<128x128xbf16>
    %cst_152 = arith.constant dense<0.000000e+00> : vector<8x128xf32>
    %153 = tpu.matmul %151, %152, %cst_152 {dimension_numbers = #tpu.dot_dimension_numbers<[1], [0], [0], [1], [0, 0, 1, 1], [], []>} : vector<8x128xbf16>, vector<128x128xbf16>, vector<8x128xf32> -> vector<8x128xf32>
    %c0_153 = arith.constant 0 : index
    %c0_154 = arith.constant 0 : index
    %154 = vector.load %arg15[%c0_153, %c0_154] : memref<1x128xf32, #tpu.memory_space<vmem>>, vector<1x128xf32>
    %155 = vector.broadcast %154 : vector<1x128xf32> to vector<8x128xf32>
    %156 = arith.addf %153, %155 : vector<8x128xf32>
    %c0_155 = arith.constant 0 : index
    %c0_156 = arith.constant 0 : index
    %157 = vector.load %arg16[%c0_155, %c0_156] : memref<8x128xf32, #tpu.memory_space<vmem>>, vector<8x128xf32>
    tpu.vector_store %arg16[%c0_155, %c0_156], %156 {strides = array<i32>} : memref<8x128xf32, #tpu.memory_space<vmem>>, vector<8x128xf32>,
    return
  }
  func.func @transform_0(%arg0: i32) -> (i32, i32) {
    %c0_i32 = arith.constant 0 : i32
    %c0_i32_0 = arith.constant 0 : i32
    return %arg0, %c0_i32 : i32, i32
  }
  func.func @transform_1(%arg0: i32) -> (i32, i32) {
    %c0_i32 = arith.constant 0 : i32
    %c0_i32_0 = arith.constant 0 : i32
    %c0_i32_1 = arith.constant 0 : i32
    return %c0_i32, %c0_i32_0 : i32, i32
  }
  func.func @transform_2(%arg0: i32) -> (i32, i32) {
    %c0_i32 = arith.constant 0 : i32
    %c0_i32_0 = arith.constant 0 : i32
    %c0_i32_1 = arith.constant 0 : i32
    return %c0_i32, %c0_i32_0 : i32, i32
  }
  func.func @transform_3(%arg0: i32) -> (i32, i32) {
    %c0_i32 = arith.constant 0 : i32
    %c0_i32_0 = arith.constant 0 : i32
    %c0_i32_1 = arith.constant 0 : i32
    return %c0_i32, %c0_i32_0 : i32, i32
  }
  func.func @transform_4(%arg0: i32) -> (i32, i32) {
    %c0_i32 = arith.constant 0 : i32
    %c0_i32_0 = arith.constant 0 : i32
    %c0_i32_1 = arith.constant 0 : i32
    return %c0_i32, %c0_i32_0 : i32, i32
  }
  func.func @transform_5(%arg0: i32) -> (i32, i32, i32) {
    %c0_i32 = arith.constant 0 : i32
    %c0_i32_0 = arith.constant 0 : i32
    %c0_i32_1 = arith.constant 0 : i32
    %c0_i32_2 = arith.constant 0 : i32
    return %c0_i32, %c0_i32_0, %c0_i32_1 : i32, i32, i32
  }
  func.func @transform_6(%arg0: i32) -> (i32, i32) {
    %c0_i32 = arith.constant 0 : i32
    %c0_i32_0 = arith.constant 0 : i32
    %c0_i32_1 = arith.constant 0 : i32
    return %c0_i32, %c0_i32_0 : i32, i32
  }
  func.func @transform_7(%arg0: i32) -> (i32, i32) {
    %c0_i32 = arith.constant 0 : i32
    %c0_i32_0 = arith.constant 0 : i32
    %c0_i32_1 = arith.constant 0 : i32
    return %c0_i32, %c0_i32_0 : i32, i32
  }
  func.func @transform_8(%arg0: i32) -> (i32, i32) {
    %c0_i32 = arith.constant 0 : i32
    %c0_i32_0 = arith.constant 0 : i32
    %c0_i32_1 = arith.constant 0 : i32
    return %c0_i32, %c0_i32_0 : i32, i32
  }
  func.func @transform_9(%arg0: i32) -> (i32, i32) {
    %c0_i32 = arith.constant 0 : i32
    %c0_i32_0 = arith.constant 0 : i32
    %c0_i32_1 = arith.constant 0 : i32
    return %c0_i32, %c0_i32_0 : i32, i32
  }
  func.func @transform_10(%arg0: i32) -> (i32, i32) {
    %c0_i32 = arith.constant 0 : i32
    %c0_i32_0 = arith.constant 0 : i32
    %c0_i32_1 = arith.constant 0 : i32
    return %c0_i32, %c0_i32_0 : i32, i32
  }
  func.func @transform_11(%arg0: i32) -> (i32, i32) {
    %c0_i32 = arith.constant 0 : i32
    %c0_i32_0 = arith.constant 0 : i32
    %c0_i32_1 = arith.constant 0 : i32
    return %c0_i32, %c0_i32_0 : i32, i32
  }
  func.func @transform_12(%arg0: i32) -> (i32, i32) {
    %c0_i32 = arith.constant 0 : i32
    %c0_i32_0 = arith.constant 0 : i32
    %c0_i32_1 = arith.constant 0 : i32
    return %c0_i32, %c0_i32_0 : i32, i32
  }
  func.func @transform_13(%arg0: i32) -> (i32, i32) {
    %c0_i32 = arith.constant 0 : i32
    %c0_i32_0 = arith.constant 0 : i32
    %c0_i32_1 = arith.constant 0 : i32
    return %c0_i32, %c0_i32_0 : i32, i32
  }
  func.func @transform_14(%arg0: i32) -> (i32, i32) {
    %c0_i32 = arith.constant 0 : i32
    %c0_i32_0 = arith.constant 0 : i32
    %c0_i32_1 = arith.constant 0 : i32
    return %c0_i32, %c0_i32_0 : i32, i32
  }
  func.func @transform_15(%arg0: i32) -> (i32, i32) {
    %c0_i32 = arith.constant 0 : i32
    %c0_i32_0 = arith.constant 0 : i32
    return %arg0, %c0_i32 : i32, i32
  }
}

</mosaic_0001>

<bundles_post_ra>
// kernel: lenet5_forward.1
= control target key start
LH: loop header
LB: loop body
LE: loop exit
PB: predicated region body
PF: predicated region fallthrough
CT: control target
= control target key end

     0   :  { %20 = vsyncpa [#allocation7], 0  ;;  %s7634_s0 = inlined_call_operand.vmem [shape: bf16[448,480], index: 0, kind: input, shape index: {}]   ;;  %s7635_s1 = inlined_call_operand.vmem [shape: bf16[480,256], index: 1, kind: input, shape index: {}]   ;;  %s7636_s2 = inlined_call_operand.vmem [shape: f32[1,256], index: 2, kind: input, shape index: {}]   ;;  %s7637_s3 = inlined_call_operand.vmem [shape: bf16[256,128], index: 3, kind: input, shape index: {}]   ;;  %s7638_s4 = inlined_call_operand.vmem [shape: bf16[256,128], index: 4, kind: input, shape index: {}]   ;;  %s7639_s5 = inlined_call_operand.vmem [shape: bf16[5,128,256], index: 5, kind: input, shape index: {}]   ;;  %s7640_s6 = inlined_call_operand.vmem [shape: f32[1,256], index: 6, kind: input, shape index: {}]   ;;  %s7641_s7 = inlined_call_operand.vmem [shape: bf16[256,128], index: 7, kind: input, shape index: {}]   ;;  %s7642_s8 = inlined_call_operand.vmem [shape: bf16[256,128], index: 8, kind: input, shape index: {}]   ;;  %s7643_s9 = inlined_call_operand.vmem [shape: bf16[640,128], index: 9, kind: input, shape index: {}]   ;;  %s7644_s10 = inlined_call_operand.vmem [shape: f32[1,128], index: 10, kind: input, shape index: {}]   ;;  %s7645_s11 = inlined_call_operand.vmem [shape: bf16[128,128], index: 11, kind: input, shape index: {}]   ;;  %s7646_s12 = inlined_call_operand.vmem [shape: f32[1,128], index: 12, kind: input, shape index: {}]   ;;  %s7647_s13 = inlined_call_operand.vmem [shape: bf16[128,128], index: 13, kind: input, shape index: {}]   ;;  %s7648_s14 = inlined_call_operand.vmem [shape: f32[1,128], index: 14, kind: input, shape index: {}]   ;;  %s7649_s15 = inlined_call_operand.hbm [shape: f32[16,128], index: 15, kind: output, shape index: {}]  }
   0x1   :  { %22 = vsyncpa [#allocation7 + $0x1], 0  ;;  %s6238_s18 = smov 0   ;;  %s6240_s19 = smov 0  }
   0x2   :  { %s6242_s20 = smov 0   ;;  %s6244_s21 = smov 0  }
   0x3 LB: > { %7655 = sst [smem:[#allocation9_spill]] %s6140_s18  ;;  %s6259_s22 = sadd.s32 4294967295, %s6152_s21   ;;  %s6152_s21 = sphi %s6244_s21, %s7664_s21   ;;  %s6148_s20 = sphi %s6242_s20, %s7666_s20   ;;  %s6144_s19 = sphi %s6240_s19, %s7668_s19   ;;  %s6140_s18 = sphi %s6238_s18, %s7667_s18  }
   0x4   : > { %7656 = sst [smem:[#allocation10_spill]] %s6148_s20  ;;  %s4610_s23 = sadd.s32 4294967294, %s6152_s21  }
   0x5   : > { %s6263_s24 = sadd.s32 1, %s6152_s21   ;;  %s355_s25 = sadd.s32 1, %s6148_s20 }
   0x6   : > { %7657 = sst [smem:[#allocation11_spill]] %s6263_s24  ;;  %s352_s26 = ssub.s32 %s6152_s21, %s6263_s24 }
   0x7   : > { %p365_p0 = scmp.ne.s32.totalorder %s6148_s20, %s6144_s19  ;;  %p353_p1 = scmp.eq.s32.totalorder %s352_s26, 0 }
   0x8   : > { %p366_p2 = scmp.eq.s32.totalorder %s6259_s22, 1  ;;  %p371_p3 = scmp.ne.s32.totalorder %s6144_s19, %s6140_s18 }
   0x9   : > { %p372_p4 = scmp.eq.s32.totalorder %s4610_s23, 1  ;;  %p4613_p7 = scmp.ge.s32.totalorder %s6152_s21, 1 }
   0xa   : > { %s6274_s27 = scalar_select %p353_p1, %s6148_s20, %s355_s25  }
   0xb   : > { %p6276_p5 = por %p366_p2, %p365_p0  ;;  %p6280_p6 = por %p372_p4, %p371_p3 }
   0xc   : > { %7658 = sst [smem:[#allocation12_spill]] %s6274_s27  ;;  %p442_p8 = scmp.lt.s32.totalorder %s6152_s21, 3 }
   0xd   : > { %s7660_s29 = scalar_select %p6280_p6, 1, 0 }
   0xe   : > { %p443_p9 = pnand %p4613_p7, %p442_p8 }
   0xf   : > { %7661 = sst [smem:[#allocation13_spill]] %s7660_s29  ;;  %v5676_v0 = vld [vmem:[%s7635_s1 + $0x4] ss:$8 sps:$4 sm:$0xff] (!%p443_p9)   ;;  %v5678_v1 = vld [vmem:[%s7635_s1] ss:$8 sps:$4 sm:$0xff] (!%p443_p9)   ;;  %s491_s30 = smul.u32 (!%p443_p9), 28, %s6259_s22 }
  0x10   : > { %446 = sbr.rel (%p443_p9) target bundleno = 2179 (0x883), region = 80  ;;  %1236 = vmatprep.subr.bf16.mxu0 (!%p443_p9), %v5676_v0  ;;  %v5679_v2 = vld [vmem:[%s7635_s1 + $0x14] ss:$8 sps:$4 sm:$0xff] (!%p443_p9)   ;;  %v5681_v3 = vld [vmem:[%s7635_s1 + $0x10] ss:$8 sps:$4 sm:$0xff] (!%p443_p9)   ;;  %vm1193_vm0 = vcmask (!%p443_p9), 785408  }
  0x11   : > { %1237 = vmatpush1.bf16.msra.mxu0 (!%p443_p9), %v5678_v1  ;;  %v5682_v4 = vld [vmem:[%s7635_s1 + $0x24] ss:$8 sps:$4 sm:$0xff] (!%p443_p9)   ;;  %v5684_v5 = vld [vmem:[%s7635_s1 + $0x20] ss:$8 sps:$4 sm:$0xff] (!%p443_p9)   ;;  %v5685_v6 = vld [vmem:[%s7635_s1 + $0x34] ss:$8 sps:$4 sm:$0xff] (!%p443_p9)  }
  0x12   : > { %1238 = vmatprep.subr.bf16.mxu0 (!%p443_p9), %v5679_v2  ;;  %p492_p10 = scmp.lt.s32.totalorder (!%p443_p9), %s491_s30, 55  ;;  %v5687_v7 = vld [vmem:[%s7635_s1 + $0x30] ss:$8 sps:$4 sm:$0xff] (!%p443_p9)   ;;  %v5688_v8 = vld [vmem:[%s7635_s1 + $0x44] ss:$8 sps:$4 sm:$0xff] (!%p443_p9)   ;;  %vm6156_vm1 = vmmov (!%p443_p9), 0  }
  0x13   : > { %v5690_v9 = vld [vmem:[%s7635_s1 + $0x40] ss:$8 sps:$4 sm:$0xff] (!%p443_p9)   ;;  %v5691_v10 = vld [vmem:[%s7635_s1 + $0x54] ss:$8 sps:$4 sm:$0xff] (!%p443_p9)   ;;  %v5693_v11 = vld [vmem:[%s7635_s1 + $0x50] ss:$8 sps:$4 sm:$0xff] (!%p443_p9)  }
  0x14   : > { %v5694_v12 = vld [vmem:[%s7635_s1 + $0x64] ss:$8 sps:$4 sm:$0xff] (!%p443_p9)   ;;  %v5696_v14 = vld [vmem:[%s7635_s1 + $0x60] ss:$8 sps:$4 sm:$0xff] (!%p443_p9)   ;;  %v5697_v15 = vld [vmem:[%s7635_s1 + $0x74] ss:$8 sps:$4 sm:$0xff] (!%p443_p9)  }
  0x15   : > { %1239 = vmatpush1.bf16.msra.mxu0 (!%p443_p9), %v5681_v3  ;;  %v5699_v16 = vld [vmem:[%s7635_s1 + $0x70] ss:$8 sps:$4 sm:$0xff] (!%p443_p9)   ;;  %v5700_v17 = vld [vmem:[%s7635_s1 + $0x84] ss:$8 sps:$4 sm:$0xff] (!%p443_p9)   ;;  %v5702_v18 = vld [vmem:[%s7635_s1 + $0x80] ss:$8 sps:$4 sm:$0xff] (!%p443_p9)  }
  0x16   : > { %1240 = vmatprep.subr.bf16.mxu0 (!%p443_p9), %v5682_v4  ;;  %v5703_v19 = vld [vmem:[%s7635_s1 + $0x94] ss:$8 sps:$4 sm:$0xff] (!%p443_p9)   ;;  %v5705_v20 = vld [vmem:[%s7635_s1 + $0x90] ss:$8 sps:$4 sm:$0xff] (!%p443_p9)   ;;  %v5706_v21 = vld [vmem:[%s7635_s1 + $0xa4] ss:$8 sps:$4 sm:$0xff] (!%p443_p9)  }
  0x17   : > { %s7670_s30 = smov (!%p492_p10, %s491_s30), 55  ;;  %v5708_v22 = vld [vmem:[%s7635_s1 + $0xa0] ss:$8 sps:$4 sm:$0xff]   ;;  %v5709_v23 = vld [vmem:[%s7635_s1 + $0xb4] ss:$8 sps:$4 sm:$0xff]   ;;  %s488_s26 = sand.u32 1, %s6144_s19  }
  0x18   : > { %s5018_s25 = sshll.u32 %s7670_s30, 4  ;;  %v5711_v24 = vld [vmem:[%s7635_s1 + $0xb0] ss:$8 sps:$4 sm:$0xff]   ;;  %v5712_v25 = vld [vmem:[%s7635_s1 + $0xc4] ss:$8 sps:$4 sm:$0xff]   ;;  %s4614_s16 = sshll.u32 %s488_s26, 3 }
  0x19   : > { %1241 = vmatpush1.bf16.msra.mxu0 %v5684_v5  ;;  %s6326_s29 = scalar_lea.vmem %s7634_s0, %s5018_s25  ;;  %v5714_v26 = vld [vmem:[%s7635_s1 + $0xc0] ss:$8 sps:$4 sm:$0xff]   ;;  %v5715_v27 = vld [vmem:[%s7635_s1 + $0xd4] ss:$8 sps:$4 sm:$0xff]   ;;  %v5717_v28 = vld [vmem:[%s7635_s1 + $0xd0] ss:$8 sps:$4 sm:$0xff]  }
  0x1a   : > { %1242 = vmatprep.subr.bf16.mxu0 %v5685_v6  ;;  %v5726_v13 = vld [vmem:[%s6326_s29 + $0x4] ss:$16 sps:$4 sm:$0xff]   ;;  %v5720_v30 = vld [vmem:[%s7635_s1 + $0xe0] ss:$8 sps:$4 sm:$0xff]   ;;  %v5723_v32 = vld [vmem:[%s7635_s1 + $0xf0] ss:$8 sps:$4 sm:$0xff]  }
  0x1b   : > { %1268 = vmatprep.mubr.bf16.mxu0 %v5726_v13  ;;  %v5718_v29 = vld [vmem:[%s7635_s1 + $0xe4] ss:$8 sps:$4 sm:$0xff]   ;;  %v5721_v31 = vld [vmem:[%s7635_s1 + $0xf4] ss:$8 sps:$4 sm:$0xff]   ;;  %v5724_v33 = vld [vmem:[%s6326_s29] ss:$16 sps:$4 sm:$0xff]  }
  0x1c   : > { %v5729_v34 = vld [vmem:[%s7635_s1 + $0x104] ss:$8 sps:$4 sm:$0xff]   ;;  %v5727_v35 = vld [vmem:[%s7635_s1 + $0x100] ss:$8 sps:$4 sm:$0xff]   ;;  %v5735_v37 = vld [vmem:[%s7635_s1 + $0x114] ss:$8 sps:$4 sm:$0xff]  }
  0x1d   : > { %1243 = vmatpush1.bf16.msra.mxu0 %v5687_v7  ;;  %v5730_v36 = vld [vmem:[%s6326_s29 + $0x24] ss:$16 sps:$4 sm:$0xff]   ;;  %v5733_v38 = vld [vmem:[%s7635_s1 + $0x110] ss:$8 sps:$4 sm:$0xff]   ;;  %v5739_v42 = vld [vmem:[%s7635_s1 + $0x120] ss:$8 sps:$4 sm:$0xff]  }
  0x1e   : > { %1244 = vmatprep.subr.bf16.mxu0 %v5688_v8  ;;  %v5741_v39 = vld [vmem:[%s7635_s1 + $0x124] ss:$8 sps:$4 sm:$0xff]   ;;  %v5732_v40 = vld [vmem:[%s6326_s29 + $0x20] ss:$16 sps:$4 sm:$0xff]   ;;  %v5747_v43 = vld [vmem:[%s7635_s1 + $0x134] ss:$8 sps:$4 sm:$0xff]  }
  0x1f   : > { %v5736_v41 = vld [vmem:[%s6326_s29 + $0x44] ss:$16 sps:$4 sm:$0xff]   ;;  %v5745_v44 = vld [vmem:[%s7635_s1 + $0x130] ss:$8 sps:$4 sm:$0xff]   ;;  %v5751_v48 = vld [vmem:[%s7635_s1 + $0x140] ss:$8 sps:$4 sm:$0xff]  }
  0x20   : > { %v5753_v45 = vld [vmem:[%s7635_s1 + $0x144] ss:$8 sps:$4 sm:$0xff]   ;;  %v5738_v46 = vld [vmem:[%s6326_s29 + $0x40] ss:$16 sps:$4 sm:$0xff]   ;;  %v5759_v49 = vld [vmem:[%s7635_s1 + $0x154] ss:$8 sps:$4 sm:$0xff]  }
  0x21   : > { %1245 = vmatpush1.bf16.msra.mxu0 %v5690_v9  ;;  %v5742_v47 = vld [vmem:[%s6326_s29 + $0x64] ss:$16 sps:$4 sm:$0xff]   ;;  %v5757_v50 = vld [vmem:[%s7635_s1 + $0x150] ss:$8 sps:$4 sm:$0xff]   ;;  %v5763_v54 = vld [vmem:[%s7635_s1 + $0x160] ss:$8 sps:$4 sm:$0xff]  }
  0x22   : > { %1246 = vmatprep.subr.bf16.mxu0 %v5691_v10  ;;  %v5765_v51 = vld [vmem:[%s7635_s1 + $0x164] ss:$8 sps:$4 sm:$0xff]   ;;  %v5744_v52 = vld [vmem:[%s6326_s29 + $0x60] ss:$16 sps:$4 sm:$0xff]   ;;  %v5771_v55 = vld [vmem:[%s7635_s1 + $0x174] ss:$8 sps:$4 sm:$0xff]  }
  0x23   : > { %v5748_v53 = vld [vmem:[%s6326_s29 + $0x84] ss:$16 sps:$4 sm:$0xff]   ;;  %v5769_v56 = vld [vmem:[%s7635_s1 + $0x170] ss:$8 sps:$4 sm:$0xff]   ;;  %v5775_v60 = vld [vmem:[%s7635_s1 + $0x180] ss:$8 sps:$4 sm:$0xff]  }
  0x24   : > { %v5777_v57 = vld [vmem:[%s7635_s1 + $0x184] ss:$8 sps:$4 sm:$0xff]   ;;  %v5750_v58 = vld [vmem:[%s6326_s29 + $0x80] ss:$16 sps:$4 sm:$0xff]   ;;  %v5783_v61 = vld [vmem:[%s7635_s1 + $0x194] ss:$8 sps:$4 sm:$0xff]  }
  0x25   : > { %1247 = vmatpush1.bf16.msra.mxu0 %v5693_v11  ;;  %v5754_v59 = vld [vmem:[%s6326_s29 + $0xa4] ss:$16 sps:$4 sm:$0xff]   ;;  %v5781_v62 = vld [vmem:[%s7635_s1 + $0x190] ss:$8 sps:$4 sm:$0xff]   ;;  %v5787_v2 = vld [vmem:[%s7635_s1 + $0x1a0] ss:$8 sps:$4 sm:$0xff]  }
  0x26   : > { %1248 = vmatprep.subr.bf16.mxu0 %v5694_v12  ;;  %v5789_v63 = vld [vmem:[%s7635_s1 + $0x1a4] ss:$8 sps:$4 sm:$0xff]   ;;  %v5756_v0 = vld [vmem:[%s6326_s29 + $0xa0] ss:$16 sps:$4 sm:$0xff]   ;;  %v5795_v3 = vld [vmem:[%s7635_s1 + $0x1b4] ss:$8 sps:$4 sm:$0xff]  }
  0x27   : > { %v5760_v1 = vld [vmem:[%s6326_s29 + $0xc4] ss:$16 sps:$4 sm:$0xff]   ;;  %v5793_v4 = vld [vmem:[%s7635_s1 + $0x1b0] ss:$8 sps:$4 sm:$0xff]   ;;  %v5799_v8 = vld [vmem:[%s7635_s1 + $0x1c0] ss:$8 sps:$4 sm:$0xff]  }
  0x28   : > { %v5801_v5 = vld [vmem:[%s7635_s1 + $0x1c4] ss:$8 sps:$4 sm:$0xff]   ;;  %v5762_v6 = vld [vmem:[%s6326_s29 + $0xc0] ss:$16 sps:$4 sm:$0xff]   ;;  %v5807_v9 = vld [vmem:[%s7635_s1 + $0x1d4] ss:$8 sps:$4 sm:$0xff]  }
  0x29   : > { %1249 = vmatpush1.bf16.msra.mxu0 %v5696_v14  ;;  %v5766_v7 = vld [vmem:[%s6326_s29 + $0xe4] ss:$16 sps:$4 sm:$0xff]   ;;  %v5805_v10 = vld [vmem:[%s7635_s1 + $0x1d0] ss:$8 sps:$4 sm:$0xff]   ;;  %s5015_s30 = sshll.u32 %s6259_s22, 7  ;;  %s490_s23 = scalar_lea.vmem [#allocation6], %s4614_s16 }
  0x2a   : > { %1250 = vmatprep.subr.bf16.mxu0 %v5697_v15  ;;  %v5768_v11 = vld [vmem:[%s6326_s29 + $0xe0] ss:$16 sps:$4 sm:$0xff]   ;;  %v5772_v12 = vld [vmem:[%s6326_s29 + $0x104] ss:$16 sps:$4 sm:$0xff]   ;;  %s4551_s20 = sshll.u32 %s490_s23, 4  ;;  %s7592_s27 = scalar_lea.hbm %s7649_s15, %s5015_s30  ;;  %s7594_s20 = int_to_ptr.vmem [resolvable:$true] %s4551_s20 }
  0x2b   : > { %v5774_v13 = vld [vmem:[%s6326_s29 + $0x100] ss:$16 sps:$4 sm:$0xff]   ;;  %v5778_v14 = vld [vmem:[%s6326_s29 + $0x124] ss:$16 sps:$4 sm:$0xff]   ;;  %s4538_s24 = scalar_lea.sflag [#allocation7], %s488_s26  ;;  %s6090_s22 = scalar_lea.vmem %s7594_s20, 128 }
  0x2c   : > { %v5780_v15 = vld [vmem:[%s6326_s29 + $0x120] ss:$16 sps:$4 sm:$0xff]   ;;  %p6091_p11 = scmp.ne.s32.totalorder %s7594_s20, %s6090_s22  ;;  %s6157_s16 = smov [#allocation6]  }
  0x2d   : > { %1251 = vmatpush1.bf16.msra.mxu0 %v5699_v16  ;;  %v5784_v16 = vld [vmem:[%s6326_s29 + $0x144] ss:$16 sps:$4 sm:$0xff]  }
  0x2e   : > { %1252 = vmatprep.subr.bf16.mxu0 %v5700_v17  ;;  %v5786_v17 = vld [vmem:[%s6326_s29 + $0x140] ss:$16 sps:$4 sm:$0xff]   ;;  %p6092_p12 = pnand %p6091_p11, %p6276_p5 }
  0x30   : > { %p6093_p13 = pneg %p6092_p12 }
  0x31   : > { %1253 = vmatpush1.bf16.msra.mxu0 %v5702_v18  ;;  %v5790_v18 = vld [vmem:[%s6326_s29 + $0x164] ss:$16 sps:$4 sm:$0xff]  }
  0x32   : > { %1254 = vmatprep.subr.bf16.mxu0 %v5703_v19  ;;  %v5792_v19 = vld [vmem:[%s6326_s29 + $0x160] ss:$16 sps:$4 sm:$0xff]  }
  0x35   : > { %1255 = vmatpush1.bf16.msra.mxu0 %v5705_v20  ;;  %v5796_v20 = vld [vmem:[%s6326_s29 + $0x184] ss:$16 sps:$4 sm:$0xff]  }
  0x36   : > { %1256 = vmatprep.subr.bf16.mxu0 %v5706_v21  ;;  %v5850_v21 = vld [vmem:[%s7637_s3 + $0x40] sm:$0xff]  }
  0x37   : > { %5019 = vmatprep.subr.bf16.mxu1 %v5850_v21 }
  0x39   : > { %1257 = vmatpush1.bf16.msra.mxu0 %v5708_v22  ;;  %v5851_v22 = vld [vmem:[%s7637_s3] sm:$0xff]  }
  0x3a   : > { %1258 = vmatprep.subr.bf16.mxu0 %v5709_v23  ;;  %v5852_v23 = vld [vmem:[%s7637_s3 + $0x48] sm:$0xff]   ;;  %5020 = vmatpush3.bf16.msra.mxu1 %v5851_v22 }
  0x3b   : > { %5021 = vmatprep.subr.bf16.mxu1 %v5852_v23 }
  0x3d   : > { %1259 = vmatpush1.bf16.msra.mxu0 %v5711_v24  ;;  %v5798_v24 = vld [vmem:[%s6326_s29 + $0x180] ss:$16 sps:$4 sm:$0xff]  }
  0x3e   : > { %1260 = vmatprep.subr.bf16.mxu0 %v5712_v25  ;;  %v5802_v25 = vld [vmem:[%s6326_s29 + $0x1a4] ss:$16 sps:$4 sm:$0xff]  }
  0x41   : > { %1261 = vmatpush1.bf16.msra.mxu0 %v5714_v26  ;;  %v5853_v26 = vld [vmem:[%s7637_s3 + $0x8] sm:$0xff]  }
  0x42   : > { %1262 = vmatprep.subr.bf16.mxu0 %v5715_v27  ;;  %v5854_v27 = vld [vmem:[%s7637_s3 + $0x50] sm:$0xff]   ;;  %5022 = vmatpush3.bf16.msra.mxu1 %v5853_v26 }
  0x43   : > { %5023 = vmatprep.subr.bf16.mxu1 %v5854_v27  ;;  %v5867_v27 = vld [vmem:[%s7638_s4] sm:$0xff]  }
  0x45   : > { %1263 = vmatpush1.bf16.msra.mxu0 %v5717_v28  ;;  %v5855_v28 = vld [vmem:[%s7637_s3 + $0x10] sm:$0xff]  }
  0x46   : > { %1264 = vmatprep.subr.bf16.mxu0 %v5718_v29  ;;  %v5856_v29 = vld [vmem:[%s7637_s3 + $0x58] sm:$0xff]   ;;  %5024 = vmatpush3.bf16.msra.mxu1 %v5855_v28 }
  0x47   : > { %5025 = vmatprep.subr.bf16.mxu1 %v5856_v29 }
  0x49   : > { %1265 = vmatpush1.bf16.msra.mxu0 %v5720_v30  ;;  %v5857_v30 = vld [vmem:[%s7637_s3 + $0x18] sm:$0xff]  }
  0x4a   : > { %1266 = vmatprep.subr.bf16.mxu0 %v5721_v31  ;;  %v5804_v31 = vld [vmem:[%s6326_s29 + $0x1a0] ss:$16 sps:$4 sm:$0xff]   ;;  %5026 = vmatpush3.bf16.msra.mxu1 %v5857_v30  ;;  %v5868_v30 = vld [vmem:[%s7638_s4 + $0x48] sm:$0xff]  }
  0x4d   : > { %1267 = vmatpush1.bf16.msra.mxu0 %v5723_v32  ;;  %v5858_v32 = vld [vmem:[%s7637_s3 + $0x60] sm:$0xff]  }
  0x4e   : > { %1409 = vmatprep.subr.bf16.mxu0 %v5729_v34  ;;  %v5859_v34 = vld [vmem:[%s7637_s3 + $0x20] sm:$0xff]   ;;  %5027 = vmatprep.subr.bf16.mxu1 %v5858_v32 }
  0x4f   : > { %5028 = vmatpush3.bf16.msra.mxu1 %v5859_v34 }
  0x50   : > { %1269 = vmatmul.mubr.bf16.vlgmr.msra.gmra.mrb[0].mxu0 %v5724_v33  ;;  %v5810_v33 = vld [vmem:[%s6326_s29 + $0xc] ss:$16 sps:$4 sm:$0xff]  }
  0x51   : > { %1410 = vmatpush1.bf16.msra.mxu0 %v5727_v35  ;;  %1278 = vmatprep.mubr.bf16.mxu0 %v5730_v36  ;;  %v5860_v35 = vld [vmem:[%s7637_s3 + $0x68] sm:$0xff]  }
  0x52   : > { %1411 = vmatprep.subr.bf16.mxu0 %v5735_v37  ;;  %v5808_v36 = vld [vmem:[%s6326_s29 + $0x8] ss:$16 sps:$4 sm:$0xff]   ;;  %v5811_v37 = vld [vmem:[%s6326_s29 + $0x2c] ss:$16 sps:$4 sm:$0xff]   ;;  %5029 = vmatprep.subr.bf16.mxu1 %v5860_v35 }
  0x55   : > { %1412 = vmatpush1.bf16.msra.mxu0 %v5733_v38  ;;  %v5813_v38 = vld [vmem:[%s6326_s29 + $0x28] ss:$16 sps:$4 sm:$0xff]  }
  0x56   : > { %1413 = vmatprep.subr.bf16.mxu0 %v5741_v39  ;;  %v5814_v39 = vld [vmem:[%s6326_s29 + $0x4c] ss:$16 sps:$4 sm:$0xff]  }
  0x58   : > { %1279 = vmatmul.mubr.bf16.gmra.mrb[4].mxu0 %v5732_v40  ;;  %v5816_v40 = vld [vmem:[%s6326_s29 + $0x48] ss:$16 sps:$4 sm:$0xff]  }
  0x59   : > { %1288 = vmatprep.mubr.bf16.mxu0 %v5736_v41  ;;  %1414 = vmatpush1.bf16.msra.mxu0 %v5739_v42  ;;  %v5817_v41 = vld [vmem:[%s6326_s29 + $0x6c] ss:$16 sps:$4 sm:$0xff]   ;;  %v5819_v42 = vld [vmem:[%s6326_s29 + $0x68] ss:$16 sps:$4 sm:$0xff]  }
  0x5a   : > { %1415 = vmatprep.subr.bf16.mxu0 %v5747_v43  ;;  %v5820_v43 = vld [vmem:[%s6326_s29 + $0x8c] ss:$16 sps:$4 sm:$0xff]  }
  0x5d   : > { %1416 = vmatpush1.bf16.msra.mxu0 %v5745_v44  ;;  %v5822_v44 = vld [vmem:[%s6326_s29 + $0x88] ss:$16 sps:$4 sm:$0xff]  }
  0x5e   : > { %1417 = vmatprep.subr.bf16.mxu0 %v5753_v45  ;;  %v5823_v45 = vld [vmem:[%s6326_s29 + $0xac] ss:$16 sps:$4 sm:$0xff]  }
  0x60   : > { %1289 = vmatmul.mubr.bf16.gmra.mrb[8].mxu0 %v5738_v46  ;;  %v5825_v46 = vld [vmem:[%s6326_s29 + $0xa8] ss:$16 sps:$4 sm:$0xff]  }
  0x61   : > { %1298 = vmatprep.mubr.bf16.mxu0 %v5742_v47  ;;  %1418 = vmatpush1.bf16.msra.mxu0 %v5751_v48  ;;  %v5826_v47 = vld [vmem:[%s6326_s29 + $0xcc] ss:$16 sps:$4 sm:$0xff]   ;;  %v5828_v48 = vld [vmem:[%s6326_s29 + $0xc8] ss:$16 sps:$4 sm:$0xff]  }
  0x62   : > { %1419 = vmatprep.subr.bf16.mxu0 %v5759_v49  ;;  %v5829_v49 = vld [vmem:[%s6326_s29 + $0xec] ss:$16 sps:$4 sm:$0xff]  }
  0x65   : > { %1420 = vmatpush1.bf16.msra.mxu0 %v5757_v50  ;;  %v5831_v50 = vld [vmem:[%s6326_s29 + $0xe8] ss:$16 sps:$4 sm:$0xff]  }
  0x66   : > { %1421 = vmatprep.subr.bf16.mxu0 %v5765_v51  ;;  %v5832_v51 = vld [vmem:[%s6326_s29 + $0x10c] ss:$16 sps:$4 sm:$0xff]  }
  0x68   : > { %1299 = vmatmul.mubr.bf16.gmra.mrb[12].mxu0 %v5744_v52  ;;  %v5834_v52 = vld [vmem:[%s6326_s29 + $0x108] ss:$16 sps:$4 sm:$0xff]  }
  0x69   : > { %1308 = vmatprep.mubr.bf16.mxu0 %v5748_v53  ;;  %1422 = vmatpush1.bf16.msra.mxu0 %v5763_v54  ;;  %v5835_v53 = vld [vmem:[%s6326_s29 + $0x12c] ss:$16 sps:$4 sm:$0xff]   ;;  %v5837_v54 = vld [vmem:[%s6326_s29 + $0x128] ss:$16 sps:$4 sm:$0xff]  }
  0x6a   : > { %1423 = vmatprep.subr.bf16.mxu0 %v5771_v55  ;;  %v5838_v55 = vld [vmem:[%s6326_s29 + $0x14c] ss:$16 sps:$4 sm:$0xff]  }
  0x6d   : > { %1424 = vmatpush1.bf16.msra.mxu0 %v5769_v56  ;;  %v5840_v56 = vld [vmem:[%s6326_s29 + $0x148] ss:$16 sps:$4 sm:$0xff]  }
  0x6e   : > { %1425 = vmatprep.subr.bf16.mxu0 %v5777_v57  ;;  %v5841_v57 = vld [vmem:[%s6326_s29 + $0x16c] ss:$16 sps:$4 sm:$0xff]  }
  0x70   : > { %1309 = vmatmul.mubr.bf16.gmra.mrb[16].mxu0 %v5750_v58  ;;  %v5861_v58 = vld [vmem:[%s7637_s3 + $0x28] sm:$0xff]  }
  0x71   : > { %1318 = vmatprep.mubr.bf16.mxu0 %v5754_v59  ;;  %1426 = vmatpush1.bf16.msra.mxu0 %v5775_v60  ;;  %v5843_v59 = vld [vmem:[%s6326_s29 + $0x168] ss:$16 sps:$4 sm:$0xff]   ;;  %v5862_v60 = vld [vmem:[%s7637_s3 + $0x70] sm:$0xff]  }
  0x72   : > { %1427 = vmatprep.subr.bf16.mxu0 %v5783_v61  ;;  %5030 = vmatpush3.bf16.msra.mxu1 %v5861_v58  ;;  %v5844_v61 = vld [vmem:[%s6326_s29 + $0x18c] ss:$16 sps:$4 sm:$0xff]  }
  0x73   : > { %5031 = vmatprep.subr.bf16.mxu1 %v5862_v60 }
  0x75   : > { %1428 = vmatpush1.bf16.msra.mxu0 %v5781_v62  ;;  %v5863_v62 = vld [vmem:[%s7637_s3 + $0x30] sm:$0xff]  }
  0x76   : > { %1429 = vmatprep.subr.bf16.mxu0 %v5789_v63  ;;  %5032 = vmatpush3.bf16.msra.mxu1 %v5863_v62  ;;  %v5864_v63 = vld [vmem:[%s7637_s3 + $0x78] sm:$0xff]  }
  0x77   : > { %5033 = vmatprep.subr.bf16.mxu1 %v5864_v63  ;;  %v5875_v63 = vld [vmem:[%s7638_s4 + $0x20] sm:$0xff]  }
  0x78   : > { %1319 = vmatmul.mubr.bf16.gmra.mrb[20].mxu0 %v5756_v0  ;;  %v5865_v0 = vld [vmem:[%s7637_s3 + $0x38] sm:$0xff]  }
  0x79   : > { %1328 = vmatprep.mubr.bf16.mxu0 %v5760_v1  ;;  %1430 = vmatpush1.bf16.msra.mxu0 %v5787_v2  ;;  %v5846_v1 = vld [vmem:[%s6326_s29 + $0x188] ss:$16 sps:$4 sm:$0xff]   ;;  %v5847_v2 = vld [vmem:[%s6326_s29 + $0x1ac] ss:$16 sps:$4 sm:$0xff]  }
  0x7a   : > { %1431 = vmatprep.subr.bf16.mxu0 %v5795_v3  ;;  %5034 = vmatpush3.bf16.msra.mxu1 %v5865_v0  ;;  %v5866_v3 = vld [vmem:[%s7638_s4 + $0x40] sm:$0xff]  }
  0x7b   : > { %5119 = vmatprep.subr.bf16.mxu1 %v5866_v3 }
  0x7d   : > { %1432 = vmatpush1.bf16.msra.mxu0 %v5793_v4  ;;  %v5849_v4 = vld [vmem:[%s6326_s29 + $0x1a8] ss:$16 sps:$4 sm:$0xff]   ;;  %s6094_s29 = sshll.u32 %s6157_s16, 4  ;;  %s6095_s29 = int_to_ptr.vmem [resolvable:$false] %s6094_s29 }
  0x7e   : > { %1433 = vmatprep.subr.bf16.mxu0 %v5801_v5  ;;  %v617_v5 = vlaneseq  ;;  %s6096_s17 = scalar_lea.vmem %s6095_s29, 256  ;;  %p6097_p0 = scmp.lt.s32.totalorder %s7594_s20, %s6095_s29 }
  0x7f   : > { %p6098_p1 = scmp.lt.s32.totalorder %s6096_s17, %s6090_s22 }
  0x80   : > { %1329 = vmatmul.mubr.bf16.gmra.mrb[24].mxu0 %v5762_v6  ;;  %v6593_v6 = vshrl.u32 %v617_v5, 7 }
  0x81   : > { %1338 = vmatprep.mubr.bf16.mxu0 %v5766_v7  ;;  %1434 = vmatpush1.bf16.msra.mxu0 %v5799_v8  ;;  %v615_v8 = vld [vmem:[%s7636_s2] sm:$0x3]  ;;  %p6099_p2 = por %p6098_p1, %p6097_p0 }
  0x82   : > { %1435 = vmatprep.subr.bf16.mxu0 %v5807_v9  ;;  %v619_v7 = vsub.s32 0, %v6593_v6  ;;  %v623_v9 = vsub.s32 1, %v6593_v6 }
  0x83   : > { %p6100_p3 = pnand %p6099_p2, %p6093_p13 }
  0x85   : > { %1436 = vmatpush1.bf16.msra.mxu0 %v5805_v10  ;;  %v6602_v10 = vrot.slane %v615_v8, %v619_v7 }
  0x88   : > { %1339 = vmatmul.mubr.bf16.gmra.mrb[28].mxu0 %v5768_v11  ;;  %v6606_v11 = vrot.slane %v615_v8, %v623_v9 }
  0x89   : > { %1348 = vmatprep.mubr.bf16.mxu0 %v5772_v12 }
  0x90   : > { %1349 = vmatmul.mubr.bf16.gmra.mrb[32].mxu0 %v5774_v13 }
  0x91   : > { %1358 = vmatprep.mubr.bf16.mxu0 %v5778_v14 }
  0x98   : > { %1359 = vmatmul.mubr.bf16.gmra.mrb[36].mxu0 %v5780_v15 }
  0x99   : > { %1368 = vmatprep.mubr.bf16.mxu0 %v5784_v16 }
  0xa0   : > { %1369 = vmatmul.mubr.bf16.gmra.mrb[40].mxu0 %v5786_v17 }
  0xa1   : > { %1378 = vmatprep.mubr.bf16.mxu0 %v5790_v18 }
  0xa8   : > { %1379 = vmatmul.mubr.bf16.gmra.mrb[44].mxu0 %v5792_v19 }
  0xa9   : > { %1388 = vmatprep.mubr.bf16.mxu0 %v5796_v20 }
  0xb0   : > { %1389 = vmatmul.mubr.bf16.gmra.mrb[48].mxu0 %v5798_v24 }
  0xb1   : > { %1398 = vmatprep.mubr.bf16.mxu0 %v5802_v25 }
  0xb8   : > { %1399 = vmatmul.mubr.bf16.gmra.mrb[52].mxu0 %v5804_v31 }
  0xb9   : > { %4733 = vmatprep.mubr.msk.bf16.mxu0 %vm1193_vm0, %v5810_v33 }
  0xc0   : > { %1442 = vmatmul.mubr.bf16.vlgmr.msra.gmra.mrb[0].mxu0 %v5808_v36  ;;  %v5869_v36 = vld [vmem:[%s7638_s4 + $0x8] sm:$0xff]  }
  0xc1   : > { %4734 = vmatprep.mubr.msk.bf16.mxu0 %vm1193_vm0, %v5811_v37 }
  0xc8   : > { %1452 = vmatmul.mubr.bf16.gmra.mrb[4].mxu0 %v5813_v38 }
  0xc9   : > { %4735 = vmatprep.mubr.msk.bf16.mxu0 %vm1193_vm0, %v5814_v39  ;;  %v5870_v39 = vld [vmem:[%s7638_s4 + $0x50] sm:$0xff]  }
  0xd0   : > { %1462 = vmatmul.mubr.bf16.gmra.mrb[8].mxu0 %v5816_v40 }
  0xd1   : > { %4736 = vmatprep.mubr.msk.bf16.mxu0 %vm1193_vm0, %v5817_v41 }
  0xd8   : > { %1472 = vmatmul.mubr.bf16.gmra.mrb[12].mxu0 %v5819_v42 }
  0xd9   : > { %4737 = vmatprep.mubr.msk.bf16.mxu0 %vm1193_vm0, %v5820_v43 }
  0xe0   : > { %1482 = vmatmul.mubr.bf16.gmra.mrb[16].mxu0 %v5822_v44 }
  0xe1   : > { %4738 = vmatprep.mubr.msk.bf16.mxu0 %vm1193_vm0, %v5823_v45  ;;  %v5871_v45 = vld [vmem:[%s7638_s4 + $0x10] sm:$0xff]  }
  0xe8   : > { %1492 = vmatmul.mubr.bf16.gmra.mrb[20].mxu0 %v5825_v46 }
  0xe9   : > { %4739 = vmatprep.mubr.msk.bf16.mxu0 %vm1193_vm0, %v5826_v47 }
  0xf0   : > { %1502 = vmatmul.mubr.bf16.gmra.mrb[24].mxu0 %v5828_v48  ;;  %v5872_v48 = vld [vmem:[%s7638_s4 + $0x58] sm:$0xff]  }
  0xf1   : > { %4740 = vmatprep.mubr.msk.bf16.mxu0 %vm1193_vm0, %v5829_v49 }
  0xf8   : > { %1512 = vmatmul.mubr.bf16.gmra.mrb[28].mxu0 %v5831_v50 }
  0xf9   : > { %4741 = vmatprep.mubr.msk.bf16.mxu0 %vm1193_vm0, %v5832_v51 }
 0x100   : > { %1522 = vmatmul.mubr.bf16.gmra.mrb[32].mxu0 %v5834_v52 }
 0x101   : > { %4742 = vmatprep.mubr.msk.bf16.mxu0 %vm1193_vm0, %v5835_v53 }
 0x108   : > { %1532 = vmatmul.mubr.bf16.gmra.mrb[36].mxu0 %v5837_v54  ;;  %v5873_v54 = vld [vmem:[%s7638_s4 + $0x18] sm:$0xff]  }
 0x109   : > { %4743 = vmatprep.mubr.msk.bf16.mxu0 %vm1193_vm0, %v5838_v55 }
 0x110   : > { %1542 = vmatmul.mubr.bf16.gmra.mrb[40].mxu0 %v5840_v56 }
 0x111   : > { %4744 = vmatprep.mubr.msk.bf16.mxu0 %vm1193_vm0, %v5841_v57  ;;  %v5874_v57 = vld [vmem:[%s7638_s4 + $0x60] sm:$0xff]  }
 0x118   : > { %1552 = vmatmul.mubr.bf16.gmra.mrb[44].mxu0 %v5843_v59 }
 0x119   : > { %4745 = vmatprep.mubr.msk.bf16.mxu0 %vm1193_vm0, %v5844_v61 }
 0x120   : > { %1562 = vmatmul.mubr.bf16.gmra.mrb[48].mxu0 %v5846_v1 }
 0x121   : > { %4746 = vmatprep.mubr.msk.bf16.mxu0 %vm1193_vm0, %v5847_v2  ;;  %v5876_v2 = vld [vmem:[%s7638_s4 + $0x68] sm:$0xff]  }
 0x128   : > { %1572 = vmatmul.mubr.bf16.gmra.mrb[52].mxu0 %v5849_v4 }
 0x193   : > { %v1443_v12 = vpop.f32.mrb[0].mxu0 }
 0x194   : > { %v5442_v13 = vadd.f32 %v1443_v12, %v6602_v10  ;;  %v1445_v14 = vpop.f32.mrb[1].mxu0 }
 0x195   : > { %v5443_v15 = vadd.f32 %v1445_v14, %v6606_v11  ;;  %v1447_v16 = vpop.f32.mrb[2].mxu0 }
 0x196   : > { %v5444_v17 = vadd.f32 %v1447_v16, %v6602_v10  ;;  %v1449_v18 = vpop.f32.mrb[3].mxu0  ;;  %v1582_v20 = vmax.f32 %v5442_v13, 0.0  ;;  %v5877_v13 = vld [vmem:[%s7638_s4 + $0x28] sm:$0xff]   ;;  %v5878_v16 = vld [vmem:[%s7638_s4 + $0x70] sm:$0xff]  }
 0x197   : > { %v5445_v19 = vadd.f32 %v1449_v18, %v6606_v11  ;;  %v1583_v22 = vmax.f32 %v5443_v15, 0.0 }
 0x198   : > { %v1584_v21 = vmax.f32 %v5444_v17, 0.0 }
 0x199   : > { %v1585_v23 = vmax.f32 %v5445_v19, 0.0 }
 0x19a   : > { %v6612_v24 = vpack.c.bf16 %v1584_v21, %v1582_v20 }
 0x19b   : > { %v1453_v25 = vpop.f32.mrb[4].mxu0  ;;  %v6614_v26 = vpack.c.bf16 %v1585_v23, %v1583_v22  ;;  %v5879_v22 = vld [vmem:[%s7638_s4 + $0x30] sm:$0xff]  }
 0x19c   : > { %v5446_v28 = vadd.f32 %v1453_v25, %v6602_v10  ;;  %v1455_v29 = vpop.f32.mrb[5].mxu0 }
 0x19d   : > { %v5447_v31 = vadd.f32 %v1455_v29, %v6606_v11  ;;  %v1457_v32 = vpop.f32.mrb[6].mxu0  ;;  %1826 = vmatprep.mubr.bf16.mxu1 %v6614_v26 }
 0x19e   : > { %v5448_v33 = vadd.f32 %v1457_v32, %v6602_v10  ;;  %v1459_v34 = vpop.f32.mrb[7].mxu0  ;;  %1827 = vmatmul.mubr.bf16.vlgmr.msra.gmra.mrb[0].mxu1 %v6612_v24  ;;  %v1586_v37 = vmax.f32 %v5446_v28, 0.0 }
 0x19f   : > { %v5449_v35 = vadd.f32 %v1459_v34, %v6606_v11  ;;  %5120 = vmatpush3.bf16.msra.mxu1 %v5867_v27  ;;  %v1587_v40 = vmax.f32 %v5447_v31, 0.0  ;;  %v5880_v27 = vld [vmem:[%s7638_s4 + $0x78] sm:$0xff]  }
 0x1a0   : > { %v1588_v38 = vmax.f32 %v5448_v33, 0.0  ;;  %5121 = vmatprep.subr.bf16.mxu1 %v5868_v30  ;;  %v5881_v33 = vld [vmem:[%s7638_s4 + $0x38] sm:$0xff]  }
 0x1a1   : > { %v1589_v41 = vmax.f32 %v5449_v35, 0.0 }
 0x1a2   : > { %v6634_v42 = vpack.c.bf16 %v1588_v38, %v1586_v37 }
 0x1a3   : > { %v6636_v43 = vpack.c.bf16 %v1589_v41, %v1587_v40  ;;  %v1463_v44 = vpop.f32.mrb[8].mxu0  ;;  %5122 = vmatpush3.bf16.msra.mxu1 %v5869_v36 }
 0x1a4   : > { %v5450_v46 = vadd.f32 %v1463_v44, %v6602_v10  ;;  %v1465_v47 = vpop.f32.mrb[9].mxu0  ;;  %5123 = vmatprep.subr.bf16.mxu1 %v5870_v39 }
 0x1a5   : > { %v5451_v49 = vadd.f32 %v1465_v47, %v6606_v11  ;;  %v1467_v50 = vpop.f32.mrb[10].mxu0  ;;  %1834 = vmatprep.mubr.bf16.mxu1 %v6636_v43 }
 0x1a6   : > { %v5452_v51 = vadd.f32 %v1467_v50, %v6602_v10  ;;  %v1469_v52 = vpop.f32.mrb[11].mxu0  ;;  %1835 = vmatmul.mubr.bf16.gmra.mrb[4].mxu1 %v6634_v42  ;;  %v1590_v55 = vmax.f32 %v5450_v46, 0.0 }
 0x1a7   : > { %v5453_v53 = vadd.f32 %v1469_v52, %v6606_v11  ;;  %5124 = vmatpush3.bf16.msra.mxu1 %v5871_v45  ;;  %v1591_v58 = vmax.f32 %v5451_v49, 0.0 }
 0x1a8   : > { %v1592_v56 = vmax.f32 %v5452_v51, 0.0  ;;  %5125 = vmatprep.subr.bf16.mxu1 %v5872_v48 }
 0x1a9   : > { %v1593_v59 = vmax.f32 %v5453_v53, 0.0 }
 0x1aa   : > { %v6656_v60 = vpack.c.bf16 %v1592_v56, %v1590_v55 }
 0x1ab   : > { %v6658_v61 = vpack.c.bf16 %v1593_v59, %v1591_v58  ;;  %v1473_v62 = vpop.f32.mrb[12].mxu0  ;;  %5126 = vmatpush3.bf16.msra.mxu1 %v5873_v54 }
 0x1ac   : > { %v5454_v0 = vadd.f32 %v1473_v62, %v6602_v10  ;;  %v1475_v1 = vpop.f32.mrb[13].mxu0  ;;  %5127 = vmatprep.subr.bf16.mxu1 %v5874_v57 }
 0x1ad   : > { %v5455_v3 = vadd.f32 %v1475_v1, %v6606_v11  ;;  %v1477_v4 = vpop.f32.mrb[14].mxu0  ;;  %1842 = vmatprep.mubr.bf16.mxu1 %v6658_v61 }
 0x1ae   : > { %v5456_v5 = vadd.f32 %v1477_v4, %v6602_v10  ;;  %v1479_v8 = vpop.f32.mrb[15].mxu0  ;;  %1843 = vmatmul.mubr.bf16.gmra.mrb[8].mxu1 %v6656_v60  ;;  %v1594_v14 = vmax.f32 %v5454_v0, 0.0 }
 0x1af   : > { %v5457_v12 = vadd.f32 %v1479_v8, %v6606_v11  ;;  %5128 = vmatpush3.bf16.msra.mxu1 %v5875_v63  ;;  %v1595_v17 = vmax.f32 %v5455_v3, 0.0 }
 0x1b0   : > { %v1596_v15 = vmax.f32 %v5456_v5, 0.0  ;;  %5129 = vmatprep.subr.bf16.mxu1 %v5876_v2 }
 0x1b1   : > { %v1597_v18 = vmax.f32 %v5457_v12, 0.0 }
 0x1b2   : > { %v6678_v19 = vpack.c.bf16 %v1596_v15, %v1594_v14 }
 0x1b3   : > { %v6680_v20 = vpack.c.bf16 %v1597_v18, %v1595_v17  ;;  %v1483_v21 = vpop.f32.mrb[16].mxu0  ;;  %5130 = vmatpush3.bf16.msra.mxu1 %v5877_v13 }
 0x1b4   : > { %v5458_v23 = vadd.f32 %v1483_v21, %v6602_v10  ;;  %v1485_v25 = vpop.f32.mrb[17].mxu0  ;;  %5131 = vmatprep.subr.bf16.mxu1 %v5878_v16 }
 0x1b5   : > { %v5459_v28 = vadd.f32 %v1485_v25, %v6606_v11  ;;  %v1487_v29 = vpop.f32.mrb[18].mxu0  ;;  %1850 = vmatprep.mubr.bf16.mxu1 %v6680_v20 }
 0x1b6   : > { %v5460_v30 = vadd.f32 %v1487_v29, %v6602_v10  ;;  %v1489_v31 = vpop.f32.mrb[19].mxu0  ;;  %1851 = vmatmul.mubr.bf16.gmra.mrb[12].mxu1 %v6678_v19  ;;  %v1598_v34 = vmax.f32 %v5458_v23, 0.0 }
 0x1b7   : > { %v5461_v32 = vadd.f32 %v1489_v31, %v6606_v11  ;;  %5132 = vmatpush3.bf16.msra.mxu1 %v5879_v22  ;;  %v1599_v36 = vmax.f32 %v5459_v28, 0.0 }
 0x1b8   : > { %v1600_v35 = vmax.f32 %v5460_v30, 0.0  ;;  %5133 = vmatprep.subr.bf16.mxu1 %v5880_v27 }
 0x1b9   : > { %v1601_v37 = vmax.f32 %v5461_v32, 0.0 }
 0x1ba   : > { %v6697_v38 = vpack.c.bf16 %v1600_v35, %v1598_v34 }
 0x1bb   : > { %v6699_v39 = vpack.c.bf16 %v1601_v37, %v1599_v36  ;;  %v1493_v40 = vpop.f32.mrb[20].mxu0  ;;  %5134 = vmatpush3.bf16.msra.mxu1 %v5881_v33 }
 0x1bc   : > { %v5462_v41 = vadd.f32 %v1493_v40, %v6602_v10  ;;  %v1495_v44 = vpop.f32.mrb[21].mxu0 }
 0x1bd   : > { %v5463_v45 = vadd.f32 %v1495_v44, %v6606_v11  ;;  %v1497_v46 = vpop.f32.mrb[22].mxu0  ;;  %1858 = vmatprep.mubr.bf16.mxu1 %v6699_v39 }
 0x1be   : > { %v5464_v47 = vadd.f32 %v1497_v46, %v6602_v10  ;;  %v1499_v48 = vpop.f32.mrb[23].mxu0  ;;  %1859 = vmatmul.mubr.bf16.gmra.mrb[16].mxu1 %v6697_v38  ;;  %v1602_v50 = vmax.f32 %v5462_v41, 0.0 }
 0x1bf   : > { %v5465_v49 = vadd.f32 %v1499_v48, %v6606_v11  ;;  %v1603_v52 = vmax.f32 %v5463_v45, 0.0 }
 0x1c0   : > { %v1604_v51 = vmax.f32 %v5464_v47, 0.0 }
 0x1c1   : > { %v1605_v53 = vmax.f32 %v5465_v49, 0.0 }
 0x1c2   : > { %v6707_v54 = vpack.c.bf16 %v1604_v51, %v1602_v50 }
 0x1c3   : > { %v6709_v55 = vpack.c.bf16 %v1605_v53, %v1603_v52  ;;  %v1503_v56 = vpop.f32.mrb[24].mxu0 }
 0x1c4   : > { %v5466_v57 = vadd.f32 %v1503_v56, %v6602_v10  ;;  %v1505_v58 = vpop.f32.mrb[25].mxu0 }
 0x1c5   : > { %v5467_v59 = vadd.f32 %v1505_v58, %v6606_v11  ;;  %v1507_v62 = vpop.f32.mrb[26].mxu0  ;;  %1866 = vmatprep.mubr.bf16.mxu1 %v6709_v55 }
 0x1c6   : > { %v5468_v63 = vadd.f32 %v1507_v62, %v6602_v10  ;;  %v1509_v0 = vpop.f32.mrb[27].mxu0  ;;  %1867 = vmatmul.mubr.bf16.gmra.mrb[20].mxu1 %v6707_v54  ;;  %v1606_v2 = vmax.f32 %v5466_v57, 0.0 }
 0x1c7   : > { %v5469_v1 = vadd.f32 %v1509_v0, %v6606_v11  ;;  %v1607_v4 = vmax.f32 %v5467_v59, 0.0 }
 0x1c8   : > { %v1608_v3 = vmax.f32 %v5468_v63, 0.0 }
 0x1c9   : > { %v1609_v5 = vmax.f32 %v5469_v1, 0.0 }
 0x1ca   : > { %v6717_v8 = vpack.c.bf16 %v1608_v3, %v1606_v2 }
 0x1cb   : > { %v6719_v12 = vpack.c.bf16 %v1609_v5, %v1607_v4  ;;  %v1513_v13 = vpop.f32.mrb[28].mxu0 }
 0x1cc   : > { %v5470_v14 = vadd.f32 %v1513_v13, %v6602_v10  ;;  %v1515_v15 = vpop.f32.mrb[29].mxu0 }
 0x1cd   : > { %v5471_v16 = vadd.f32 %v1515_v15, %v6606_v11  ;;  %v1517_v17 = vpop.f32.mrb[30].mxu0  ;;  %1874 = vmatprep.mubr.bf16.mxu1 %v6719_v12 }
 0x1ce   : > { %v5472_v18 = vadd.f32 %v1517_v17, %v6602_v10  ;;  %v1519_v21 = vpop.f32.mrb[31].mxu0  ;;  %1875 = vmatmul.mubr.bf16.gmra.mrb[24].mxu1 %v6717_v8  ;;  %v1610_v23 = vmax.f32 %v5470_v14, 0.0 }
 0x1cf   : > { %v5473_v22 = vadd.f32 %v1519_v21, %v6606_v11  ;;  %v1611_v27 = vmax.f32 %v5471_v16, 0.0 }
 0x1d0   : > { %v1612_v25 = vmax.f32 %v5472_v18, 0.0 }
 0x1d1   : > { %v1613_v28 = vmax.f32 %v5473_v22, 0.0 }
 0x1d2   : > { %v6727_v29 = vpack.c.bf16 %v1612_v25, %v1610_v23 }
 0x1d3   : > { %v6729_v30 = vpack.c.bf16 %v1613_v28, %v1611_v27  ;;  %v1523_v31 = vpop.f32.mrb[32].mxu0 }
 0x1d4   : > { %v5474_v32 = vadd.f32 %v1523_v31, %v6602_v10  ;;  %v1525_v33 = vpop.f32.mrb[33].mxu0 }
 0x1d5   : > { %v5475_v34 = vadd.f32 %v1525_v33, %v6606_v11  ;;  %v1527_v35 = vpop.f32.mrb[34].mxu0  ;;  %1882 = vmatprep.mubr.bf16.mxu1 %v6729_v30 }
 0x1d6   : > { %v5476_v36 = vadd.f32 %v1527_v35, %v6602_v10  ;;  %v1529_v37 = vpop.f32.mrb[35].mxu0  ;;  %1883 = vmatmul.mubr.bf16.gmra.mrb[28].mxu1 %v6727_v29  ;;  %v1614_v41 = vmax.f32 %v5474_v32, 0.0 }
 0x1d7   : > { %v5477_v40 = vadd.f32 %v1529_v37, %v6606_v11  ;;  %v1615_v45 = vmax.f32 %v5475_v34, 0.0 }
 0x1d8   : > { %v1616_v44 = vmax.f32 %v5476_v36, 0.0 }
 0x1d9   : > { %v1617_v46 = vmax.f32 %v5477_v40, 0.0 }
 0x1da   : > { %v6737_v47 = vpack.c.bf16 %v1616_v44, %v1614_v41 }
 0x1db   : > { %v6739_v48 = vpack.c.bf16 %v1617_v46, %v1615_v45  ;;  %v1533_v49 = vpop.f32.mrb[36].mxu0 }
 0x1dc   : > { %v5478_v50 = vadd.f32 %v1533_v49, %v6602_v10  ;;  %v1535_v51 = vpop.f32.mrb[37].mxu0 }
 0x1dd   : > { %v5479_v52 = vadd.f32 %v1535_v51, %v6606_v11  ;;  %v1537_v53 = vpop.f32.mrb[38].mxu0  ;;  %1890 = vmatprep.mubr.bf16.mxu1 %v6739_v48 }
 0x1de   : > { %v5480_v56 = vadd.f32 %v1537_v53, %v6602_v10  ;;  %v1539_v57 = vpop.f32.mrb[39].mxu0  ;;  %1891 = vmatmul.mubr.bf16.gmra.mrb[32].mxu1 %v6737_v47  ;;  %v1618_v59 = vmax.f32 %v5478_v50, 0.0 }
 0x1df   : > { %v5481_v58 = vadd.f32 %v1539_v57, %v6606_v11  ;;  %v1619_v63 = vmax.f32 %v5479_v52, 0.0 }
 0x1e0   : > { %v1620_v62 = vmax.f32 %v5480_v56, 0.0 }
 0x1e1   : > { %v1621_v0 = vmax.f32 %v5481_v58, 0.0 }
 0x1e2   : > { %v6747_v1 = vpack.c.bf16 %v1620_v62, %v1618_v59 }
 0x1e3   : > { %v6749_v2 = vpack.c.bf16 %v1621_v0, %v1619_v63  ;;  %v1543_v3 = vpop.f32.mrb[40].mxu0 }
 0x1e4   : > { %v5482_v4 = vadd.f32 %v1543_v3, %v6602_v10  ;;  %v1545_v5 = vpop.f32.mrb[41].mxu0 }
 0x1e5   : > { %v5483_v13 = vadd.f32 %v1545_v5, %v6606_v11  ;;  %v1547_v14 = vpop.f32.mrb[42].mxu0  ;;  %1898 = vmatprep.mubr.bf16.mxu1 %v6749_v2 }
 0x1e6   : > { %v5484_v15 = vadd.f32 %v1547_v14, %v6602_v10  ;;  %v1549_v16 = vpop.f32.mrb[43].mxu0  ;;  %1899 = vmatmul.mubr.bf16.gmra.mrb[36].mxu1 %v6747_v1  ;;  %v1622_v18 = vmax.f32 %v5482_v4, 0.0 }
 0x1e7   : > { %v5485_v17 = vadd.f32 %v1549_v16, %v6606_v11  ;;  %v1623_v22 = vmax.f32 %v5483_v13, 0.0 }
 0x1e8   : > { %v1624_v21 = vmax.f32 %v5484_v15, 0.0 }
 0x1e9   : > { %v1625_v23 = vmax.f32 %v5485_v17, 0.0 }
 0x1ea   : > { %v6757_v25 = vpack.c.bf16 %v1624_v21, %v1622_v18 }
 0x1eb   : > { %v6759_v27 = vpack.c.bf16 %v1625_v23, %v1623_v22  ;;  %v1553_v28 = vpop.f32.mrb[44].mxu0 }
 0x1ec   : > { %v5486_v31 = vadd.f32 %v1553_v28, %v6602_v10  ;;  %v1555_v32 = vpop.f32.mrb[45].mxu0 }
 0x1ed   : > { %v5487_v33 = vadd.f32 %v1555_v32, %v6606_v11  ;;  %v1557_v34 = vpop.f32.mrb[46].mxu0  ;;  %1906 = vmatprep.mubr.bf16.mxu1 %v6759_v27 }
 0x1ee   : > { %v5488_v35 = vadd.f32 %v1557_v34, %v6602_v10  ;;  %v1559_v36 = vpop.f32.mrb[47].mxu0  ;;  %1907 = vmatmul.mubr.bf16.gmra.mrb[40].mxu1 %v6757_v25  ;;  %v1626_v40 = vmax.f32 %v5486_v31, 0.0 }
 0x1ef   : > { %v5489_v37 = vadd.f32 %v1559_v36, %v6606_v11  ;;  %v1627_v44 = vmax.f32 %v5487_v33, 0.0 }
 0x1f0   : > { %v1628_v41 = vmax.f32 %v5488_v35, 0.0 }
 0x1f1   : > { %v1629_v45 = vmax.f32 %v5489_v37, 0.0 }
 0x1f2   : > { %v6767_v46 = vpack.c.bf16 %v1628_v41, %v1626_v40  ;;  %v6154_v40 = vmov 0  }
 0x1f3   : > { %v6769_v49 = vpack.c.bf16 %v1629_v45, %v1627_v44  ;;  %v1563_v50 = vpop.f32.mrb[48].mxu0 }
 0x1f4   : > { %v5490_v51 = vadd.f32 %v1563_v50, %v6602_v10  ;;  %v1565_v52 = vpop.f32.mrb[49].mxu0 }
 0x1f5   : > { %v5491_v53 = vadd.f32 %v1565_v52, %v6606_v11  ;;  %v1567_v56 = vpop.f32.mrb[50].mxu0  ;;  %1914 = vmatprep.mubr.bf16.mxu1 %v6769_v49 }
 0x1f6   : > { %v5492_v57 = vadd.f32 %v1567_v56, %v6602_v10  ;;  %v1569_v58 = vpop.f32.mrb[51].mxu0  ;;  %1915 = vmatmul.mubr.bf16.gmra.mrb[44].mxu1 %v6767_v46  ;;  %v1630_v62 = vmax.f32 %v5490_v51, 0.0 }
 0x1f7   : > { %v5493_v59 = vadd.f32 %v1569_v58, %v6606_v11  ;;  %v1631_v0 = vmax.f32 %v5491_v53, 0.0 }
 0x1f8   : > { %v1632_v63 = vmax.f32 %v5492_v57, 0.0 }
 0x1f9   : > { %v1633_v3 = vmax.f32 %v5493_v59, 0.0 }
 0x1fa   : > { %v6777_v4 = vpack.c.bf16 %v1632_v63, %v1630_v62 }
 0x1fb   : > { %v1663_v5 = vpack.c.bf16 %v1633_v3, %v1631_v0  ;;  %v1573_v13 = vpop.f32.mrb[52].mxu0 }
 0x1fc   : > { %v5494_v14 = vadd.f32 %v1573_v13, %v6602_v10  ;;  %v1575_v15 = vpop.f32.mrb[53].mxu0 }
 0x1fd   : > { %v5495_v16 = vadd.f32 %v1575_v15, %v6606_v11  ;;  %v1577_v17 = vpop.f32.mrb[54].mxu0  ;;  %1922 = vmatprep.mubr.bf16.mxu1 %v1663_v5 }
 0x1fe   : > { %v5496_v18 = vadd.f32 %v1577_v17, %v6602_v10  ;;  %v1579_v21 = vpop.f32.mrb[55].mxu0  ;;  %1923 = vmatmul.mubr.bf16.gmra.mrb[48].mxu1 %v6777_v4  ;;  %v1634_v23 = vmax.f32 %v5494_v14, 0.0  ;;  %v5882_v10 = vld [vmem:[%s7639_s5 + $0x80] ss:$8 sps:$4 sm:$0xff]  }
 0x1ff   : > { %v5497_v22 = vadd.f32 %v1579_v21, %v6606_v11  ;;  %v1635_v31 = vmax.f32 %v5495_v16, 0.0  ;;  %v5884_v11 = vld [vmem:[%s7639_s5 + $0x84] ss:$8 sps:$4 sm:$0xff]  }
 0x200   : > { %v1636_v28 = vmax.f32 %v5496_v18, 0.0  ;;  %2458 = vmatprep.subr.bf16.mxu1 %v5884_v11 }
 0x201   : > { %v1637_v32 = vmax.f32 %v5497_v22, 0.0  ;;  %v5908_v22 = vld [vmem:[%s7639_s5 + $0x4] ss:$8 sps:$4 sm:$0xff]  }
 0x202   : > { %v6784_v33 = vpack.c.bf16 %v1636_v28, %v1634_v23 }
 0x203   : > { %v1665_v34 = vpack.c.bf16 %v1637_v32, %v1635_v31 }
 0x205   : > { %1930 = vmatprep.mubr.bf16.mxu1 %v1665_v34 }
 0x206   : > { %1931 = vmatmul.mubr.bf16.gmra.mrb[52].mxu1 %v6784_v33 }
 0x207   : > { %2099 = vmatprep.mubr.bf16.mxu1 %v6614_v26  ;;  %v5887_v26 = vld [vmem:[%s7639_s5 + $0x94] ss:$8 sps:$4 sm:$0xff]  }
 0x20e   : > { %2100 = vmatmul.mubr.bf16.vlgmr.msra.gmra.mrb[56].mxu1 %v6612_v24  ;;  %v5885_v24 = vld [vmem:[%s7639_s5 + $0x90] ss:$8 sps:$4 sm:$0xff]  }
 0x20f   : > { %2107 = vmatprep.mubr.bf16.mxu1 %v6636_v43  ;;  %2459 = vmatpush1.bf16.msra.mxu1 %v5882_v10  ;;  %v5890_v43 = vld [vmem:[%s7639_s5 + $0xa4] ss:$8 sps:$4 sm:$0xff]  }
 0x210   : > { %2460 = vmatprep.subr.bf16.mxu1 %v5887_v26 }
 0x213   : > { %2461 = vmatpush1.bf16.msra.mxu1 %v5885_v24 }
 0x214   : > { %2462 = vmatprep.subr.bf16.mxu1 %v5890_v43 }
 0x216   : > { %2108 = vmatmul.mubr.bf16.gmra.mrb[60].mxu1 %v6634_v42  ;;  %v5888_v42 = vld [vmem:[%s7639_s5 + $0xa0] ss:$8 sps:$4 sm:$0xff]  }
 0x217   : > { %2115 = vmatprep.mubr.bf16.mxu1 %v6658_v61  ;;  %2463 = vmatpush1.bf16.msra.mxu1 %v5888_v42  ;;  %v5893_v61 = vld [vmem:[%s7639_s5 + $0xb4] ss:$8 sps:$4 sm:$0xff]  }
 0x218   : > { %2464 = vmatprep.subr.bf16.mxu1 %v5893_v61 }
 0x21e   : > { %2116 = vmatmul.mubr.bf16.gmra.mrb[64].mxu1 %v6656_v60  ;;  %v5891_v60 = vld [vmem:[%s7639_s5 + $0xb0] ss:$8 sps:$4 sm:$0xff]  }
 0x21f   : > { %2123 = vmatprep.mubr.bf16.mxu1 %v6680_v20  ;;  %2465 = vmatpush1.bf16.msra.mxu1 %v5891_v60  ;;  %v5896_v20 = vld [vmem:[%s7639_s5 + $0xc4] ss:$8 sps:$4 sm:$0xff]  }
 0x220   : > { %2466 = vmatprep.subr.bf16.mxu1 %v5896_v20 }
 0x226   : > { %2124 = vmatmul.mubr.bf16.gmra.mrb[68].mxu1 %v6678_v19  ;;  %v5894_v19 = vld [vmem:[%s7639_s5 + $0xc0] ss:$8 sps:$4 sm:$0xff]  }
 0x227   : > { %2131 = vmatprep.mubr.bf16.mxu1 %v6699_v39  ;;  %2467 = vmatpush1.bf16.msra.mxu1 %v5894_v19  ;;  %v5897_v39 = vld [vmem:[%s7639_s5 + $0xd0] ss:$8 sps:$4 sm:$0xff]  }
 0x22e   : > { %2132 = vmatmul.mubr.bf16.gmra.mrb[72].mxu1 %v6697_v38  ;;  %v5899_v38 = vld [vmem:[%s7639_s5 + $0xd4] ss:$8 sps:$4 sm:$0xff]  }
 0x22f   : > { %2139 = vmatprep.mubr.bf16.mxu1 %v6709_v55  ;;  %2468 = vmatprep.subr.bf16.mxu1 %v5899_v38 }
 0x230   : > { %2469 = vmatpush1.bf16.msra.mxu1 %v5897_v39 }
 0x236   : > { %2140 = vmatmul.mubr.bf16.gmra.mrb[76].mxu1 %v6707_v54 }
 0x237   : > { %2147 = vmatprep.mubr.bf16.mxu1 %v6719_v12 }
 0x23e   : > { %2148 = vmatmul.mubr.bf16.gmra.mrb[80].mxu1 %v6717_v8 }
 0x23f   : > { %2155 = vmatprep.mubr.bf16.mxu1 %v6729_v30 }
 0x246   : > { %2156 = vmatmul.mubr.bf16.gmra.mrb[84].mxu1 %v6727_v29  ;;  %v5902_v29 = vld [vmem:[%s7639_s5 + $0xe4] ss:$8 sps:$4 sm:$0xff]  }
 0x247   : > { %2163 = vmatprep.mubr.bf16.mxu1 %v6739_v48  ;;  %2470 = vmatprep.subr.bf16.mxu1 %v5902_v29 }
 0x24e   : > { %2164 = vmatmul.mubr.bf16.gmra.mrb[88].mxu1 %v6737_v47  ;;  %v5900_v47 = vld [vmem:[%s7639_s5 + $0xe0] ss:$8 sps:$4 sm:$0xff]  }
 0x24f   : > { %2171 = vmatprep.mubr.bf16.mxu1 %v6749_v2  ;;  %2471 = vmatpush1.bf16.msra.mxu1 %v5900_v47  ;;  %v5903_v2 = vld [vmem:[%s7639_s5 + $0xf0] ss:$8 sps:$4 sm:$0xff]  }
 0x256   : > { %2172 = vmatmul.mubr.bf16.gmra.mrb[92].mxu1 %v6747_v1  ;;  %v5905_v1 = vld [vmem:[%s7639_s5 + $0xf4] ss:$8 sps:$4 sm:$0xff]  }
 0x257   : > { %2179 = vmatprep.mubr.bf16.mxu1 %v6759_v27  ;;  %2472 = vmatprep.subr.bf16.mxu1 %v5905_v1 }
 0x258   : > { %2473 = vmatpush1.bf16.msra.mxu1 %v5903_v2 }
 0x259   : > { %2621 = vmatprep.subr.bf16.mxu1 %v5908_v22 }
 0x25e   : > { %2180 = vmatmul.mubr.bf16.gmra.mrb[96].mxu1 %v6757_v25 }
 0x25f   : > { %2187 = vmatprep.mubr.bf16.mxu1 %v6769_v49 }
 0x266   : > { %2188 = vmatmul.mubr.bf16.gmra.mrb[100].mxu1 %v6767_v46 }
 0x267   : > { %2195 = vmatprep.mubr.bf16.mxu1 %v1663_v5 }
 0x26e   : > { %2196 = vmatmul.mubr.bf16.gmra.mrb[104].mxu1 %v6777_v4 }
 0x26f   : > { %2203 = vmatprep.mubr.bf16.mxu1 %v1665_v34 }
 0x271   : > { %v5035_v54 = vpop.f32.mrb[0].mxu1 }
 0x272   : > { %v5036_v55 = vpop.f32.mrb[1].mxu1 }
 0x273   : > { %v6848_v8 = vadd.f32 %v5036_v55, %v5035_v54  ;;  %v5038_v12 = vpop.f32.mrb[2].mxu1 }
 0x274   : > { %v5039_v30 = vpop.f32.mrb[3].mxu1 }
 0x275   : > { %v6856_v48 = vadd.f32 %v5039_v30, %v5038_v12 }
 0x276   : > { %2204 = vmatmul.mubr.bf16.gmra.mrb[108].mxu1 %v6784_v33 }
 0x277   : > { %2490 = vmatprep.mubr.bf16.mxu1 %v6154_v40 }
 0x279   : > { %v5041_v25 = vpop.f32.mrb[4].mxu1 }
 0x27a   : > { %v5042_v27 = vpop.f32.mrb[5].mxu1 }
 0x27b   : > { %v6865_v35 = vadd.f32 %v5042_v27, %v5041_v25  ;;  %v5044_v36 = vpop.f32.mrb[6].mxu1 }
 0x27c   : > { %v5045_v37 = vpop.f32.mrb[7].mxu1 }
 0x27d   : > { %v6868_v41 = vadd.f32 %v5045_v37, %v5044_v36 }
 0x281   : > { %v5047_v44 = vpop.f32.mrb[8].mxu1 }
 0x282   : > { %v5048_v45 = vpop.f32.mrb[9].mxu1 }
 0x283   : > { %v6870_v46 = vadd.f32 %v5048_v45, %v5047_v44  ;;  %v5050_v49 = vpop.f32.mrb[10].mxu1 }
 0x284   : > { %v5051_v50 = vpop.f32.mrb[11].mxu1 }
 0x285   : > { %v6872_v51 = vadd.f32 %v5051_v50, %v5050_v49 }
 0x289   : > { %v5053_v52 = vpop.f32.mrb[12].mxu1 }
 0x28a   : > { %v5054_v53 = vpop.f32.mrb[13].mxu1 }
 0x28b   : > { %v6874_v56 = vadd.f32 %v5054_v53, %v5053_v52  ;;  %v5056_v57 = vpop.f32.mrb[14].mxu1 }
 0x28c   : > { %v5057_v58 = vpop.f32.mrb[15].mxu1 }
 0x28d   : > { %v6876_v59 = vadd.f32 %v5057_v58, %v5056_v57 }
 0x291   : > { %v5059_v62 = vpop.f32.mrb[16].mxu1 }
 0x292   : > { %v5060_v63 = vpop.f32.mrb[17].mxu1 }
 0x293   : > { %v6878_v0 = vadd.f32 %v5060_v63, %v5059_v62  ;;  %v5062_v3 = vpop.f32.mrb[18].mxu1 }
 0x294   : > { %v5063_v4 = vpop.f32.mrb[19].mxu1 }
 0x295   : > { %v6880_v5 = vadd.f32 %v5063_v4, %v5062_v3 }
 0x299   : > { %v5065_v13 = vpop.f32.mrb[20].mxu1 }
 0x29a   : > { %v5066_v14 = vpop.f32.mrb[21].mxu1 }
 0x29b   : > { %v6882_v15 = vadd.f32 %v5066_v14, %v5065_v13  ;;  %v5068_v16 = vpop.f32.mrb[22].mxu1 }
 0x29c   : > { %v5069_v17 = vpop.f32.mrb[23].mxu1 }
 0x29d   : > { %v6884_v18 = vadd.f32 %v5069_v17, %v5068_v16 }
 0x2a1   : > { %v5071_v21 = vpop.f32.mrb[24].mxu1 }
 0x2a2   : > { %v5072_v23 = vpop.f32.mrb[25].mxu1 }
 0x2a3   : > { %v6889_v28 = vadd.f32 %v5072_v23, %v5071_v21  ;;  %v5074_v31 = vpop.f32.mrb[26].mxu1 }
 0x2a4   : > { %v5075_v32 = vpop.f32.mrb[27].mxu1 }
 0x2a5   : > { %v6891_v33 = vadd.f32 %v5075_v32, %v5074_v31 }
 0x2a9   : > { %v5077_v34 = vpop.f32.mrb[28].mxu1 }
 0x2aa   : > { %v5078_v10 = vpop.f32.mrb[29].mxu1 }
 0x2ab   : > { %v6893_v11 = vadd.f32 %v5078_v10, %v5077_v34  ;;  %v5080_v24 = vpop.f32.mrb[30].mxu1 }
 0x2ac   : > { %v5081_v26 = vpop.f32.mrb[31].mxu1 }
 0x2ad   : > { %v6895_v42 = vadd.f32 %v5081_v26, %v5080_v24 }
 0x2b1   : > { %v5083_v43 = vpop.f32.mrb[32].mxu1 }
 0x2b2   : > { %v5084_v60 = vpop.f32.mrb[33].mxu1 }
 0x2b3   : > { %v6897_v61 = vadd.f32 %v5084_v60, %v5083_v43  ;;  %v5086_v19 = vpop.f32.mrb[34].mxu1 }
 0x2b4   : > { %v5087_v20 = vpop.f32.mrb[35].mxu1 }
 0x2b5   : > { %v6899_v38 = vadd.f32 %v5087_v20, %v5086_v19 }
 0x2b9   : > { %v5089_v39 = vpop.f32.mrb[36].mxu1 }
 0x2ba   : > { %v5090_v54 = vpop.f32.mrb[37].mxu1 }
 0x2bb   : > { %v6901_v55 = vadd.f32 %v5090_v54, %v5089_v39  ;;  %v5092_v12 = vpop.f32.mrb[38].mxu1 }
 0x2bc   : > { %v5093_v29 = vpop.f32.mrb[39].mxu1 }
 0x2bd   : > { %v6903_v30 = vadd.f32 %v5093_v29, %v5092_v12 }
 0x2c1   : > { %v5095_v47 = vpop.f32.mrb[40].mxu1 }
 0x2c2   : > { %v5096_v1 = vpop.f32.mrb[41].mxu1 }
 0x2c3   : > { %v6905_v2 = vadd.f32 %v5096_v1, %v5095_v47  ;;  %v5098_v25 = vpop.f32.mrb[42].mxu1 }
 0x2c4   : > { %v5099_v27 = vpop.f32.mrb[43].mxu1 }
 0x2c5   : > { %v6907_v36 = vadd.f32 %v5099_v27, %v5098_v25 }
 0x2c9   : > { %v5101_v37 = vpop.f32.mrb[44].mxu1 }
 0x2ca   : > { %v5102_v44 = vpop.f32.mrb[45].mxu1 }
 0x2cb   : > { %v6909_v45 = vadd.f32 %v5102_v44, %v5101_v37  ;;  %v5104_v49 = vpop.f32.mrb[46].mxu1 }
 0x2cc   : > { %v5105_v50 = vpop.f32.mrb[47].mxu1 }
 0x2cd   : > { %v6911_v52 = vadd.f32 %v5105_v50, %v5104_v49 }
 0x2d1   : > { %v5107_v53 = vpop.f32.mrb[48].mxu1 }
 0x2d2   : > { %v5108_v57 = vpop.f32.mrb[49].mxu1 }
 0x2d3   : > { %v6913_v58 = vadd.f32 %v5108_v57, %v5107_v53  ;;  %v5110_v62 = vpop.f32.mrb[50].mxu1 }
 0x2d4   : > { %v5111_v63 = vpop.f32.mrb[51].mxu1 }
 0x2d5   : > { %v6915_v3 = vadd.f32 %v5111_v63, %v5110_v62 }
 0x2d9   : > { %v5113_v4 = vpop.f32.mrb[52].mxu1 }
 0x2da   : > { %v5114_v13 = vpop.f32.mrb[53].mxu1 }
 0x2db   : > { %v6917_v14 = vadd.f32 %v5114_v13, %v5113_v4  ;;  %v5116_v16 = vpop.f32.mrb[54].mxu1 }
 0x2dc   : > { %v5117_v17 = vpop.f32.mrb[55].mxu1 }
 0x2dd   : > { %v6919_v21 = vadd.f32 %v5117_v17, %v5116_v16  ;;  %v5911_v16 = vld [vmem:[%s7639_s5 + $0x14] ss:$8 sps:$4 sm:$0xff]  }
 0x2e1   : > { %v5135_v22 = vpop.f32.mrb[56].mxu1 }
 0x2e2   : > { %v5136_v23 = vpop.f32.mrb[57].mxu1 }
 0x2e3   : > { %v5137_v31 = vadd.f32 %v5136_v23, %v5135_v22  ;;  %v5138_v32 = vpop.f32.mrb[58].mxu1 }
 0x2e4   : > { %v5139_v34 = vpop.f32.mrb[59].mxu1 }
 0x2e5   : > { %v2212_v10 = vmax.f32 %v6848_v8, %v5137_v31  ;;  %v5140_v24 = vadd.f32 %v5139_v34, %v5138_v32  ;;  %v5914_v31 = vld [vmem:[%s7639_s5 + $0x24] ss:$8 sps:$4 sm:$0xff]  }
 0x2e7   : > { %v2213_v26 = vmax.f32 %v6856_v48, %v5140_v24 }
 0x2e9   : > { %v6923_v43 = vmax.f32 %v2212_v10, %v2213_v26  ;;  %v5141_v60 = vpop.f32.mrb[60].mxu1 }
 0x2ea   : > { %v5142_v19 = vpop.f32.mrb[61].mxu1 }
 0x2eb   : > { %v5143_v20 = vadd.f32 %v5142_v19, %v5141_v60  ;;  %v5144_v39 = vpop.f32.mrb[62].mxu1 }
 0x2ec   : > { %v5145_v54 = vpop.f32.mrb[63].mxu1 }
 0x2ed   : > { %v2214_v12 = vmax.f32 %v6865_v35, %v5143_v20  ;;  %v5146_v29 = vadd.f32 %v5145_v54, %v5144_v39  ;;  %v5915_v54 = vld [vmem:[%s7639_s5 + $0x30] ss:$8 sps:$4 sm:$0xff]  }
 0x2ef   : > { %v2215_v47 = vmax.f32 %v6868_v41, %v5146_v29  ;;  %v5906_v41 = vld [vmem:[%s7639_s5] ss:$8 sps:$4 sm:$0xff]   ;;  %v5920_v29 = vld [vmem:[%s7639_s5 + $0x44] ss:$8 sps:$4 sm:$0xff]  }
 0x2f1   : > { %v6927_v1 = vmax.f32 %v2214_v12, %v2215_v47  ;;  %v5147_v25 = vpop.f32.mrb[64].mxu1 }
 0x2f2   : > { %v5148_v27 = vpop.f32.mrb[65].mxu1 }
 0x2f3   : > { %v2334_v8 = vpack.c.bf16 %v6927_v1, %v6923_v43  ;;  %v5149_v48 = vadd.f32 %v5148_v27, %v5147_v25  ;;  %v5150_v37 = vpop.f32.mrb[66].mxu1  ;;  %v5936_v43 = vld [vmem:[%s7639_s5 + $0x120] ss:$8 sps:$4 sm:$0xff]  }
 0x2f4   : > { %v5151_v44 = vpop.f32.mrb[67].mxu1 }
 0x2f5   : > { %v2216_v49 = vmax.f32 %v6870_v46, %v5149_v48  ;;  %v5152_v50 = vadd.f32 %v5151_v44, %v5150_v37 }
 0x2f7   : > { %v2217_v53 = vmax.f32 %v6872_v51, %v5152_v50  ;;  %v5909_v51 = vld [vmem:[%s7639_s5 + $0x10] ss:$8 sps:$4 sm:$0xff]  }
 0x2f9   : > { %v2278_v57 = vmax.f32 %v2216_v49, %v2217_v53  ;;  %v5153_v35 = vpop.f32.mrb[68].mxu1 }
 0x2fa   : > { %v5154_v62 = vpop.f32.mrb[69].mxu1 }
 0x2fb   : > { %v2356_v63 = vpack.c.bf16 %v2278_v57, %v6927_v1  ;;  %v5155_v4 = vadd.f32 %v5154_v62, %v5153_v35  ;;  %v5156_v13 = vpop.f32.mrb[70].mxu1  ;;  %v5926_v62 = vld [vmem:[%s7639_s5 + $0x64] ss:$8 sps:$4 sm:$0xff]  }
 0x2fc   : > { %v5157_v17 = vpop.f32.mrb[71].mxu1 }
 0x2fd   : > { %v2218_v46 = vmax.f32 %v6874_v56, %v5155_v4  ;;  %v5158_v22 = vadd.f32 %v5157_v17, %v5156_v13  ;;  %2491 = vmatmul.mubr.bf16.vlgmr.msra.gmra.mrb[112].mxu1 %v2356_v63  ;;  %v5912_v56 = vld [vmem:[%s7639_s5 + $0x20] ss:$8 sps:$4 sm:$0xff]  }
 0x2fe   : > { %2500 = vmatprep.mubr.bf16.mxu1 %v6154_v40  ;;  %2622 = vmatpush1.bf16.msra.mxu1 %v5906_v41  ;;  %v5924_v4 = vld [vmem:[%s7639_s5 + $0x60] ss:$8 sps:$4 sm:$0xff]  }
 0x2ff   : > { %v2219_v23 = vmax.f32 %v6876_v59, %v5158_v22  ;;  %2623 = vmatprep.subr.bf16.mxu1 %v5911_v16  ;;  %v5917_v59 = vld [vmem:[%s7639_s5 + $0x34] ss:$8 sps:$4 sm:$0xff]  }
 0x301   : > { %v2282_v32 = vmax.f32 %v2218_v46, %v2219_v23  ;;  %v5159_v34 = vpop.f32.mrb[72].mxu1  ;;  %v5927_v23 = vld [vmem:[%s7639_s5 + $0x70] ss:$8 sps:$4 sm:$0xff]  }
 0x302   : > { %v5160_v10 = vpop.f32.mrb[73].mxu1  ;;  %2624 = vmatpush1.bf16.msra.mxu1 %v5909_v51 }
 0x303   : > { %v5161_v24 = vadd.f32 %v5160_v10, %v5159_v34  ;;  %v5162_v26 = vpop.f32.mrb[74].mxu1  ;;  %2625 = vmatprep.subr.bf16.mxu1 %v5914_v31  ;;  %v6955_v60 = vpack.c.bf16 %v2282_v32, %v2278_v57  ;;  %v5921_v57 = vld [vmem:[%s7639_s5 + $0x50] ss:$8 sps:$4 sm:$0xff]  }
 0x304   : > { %v5163_v19 = vpop.f32.mrb[75].mxu1 }
 0x305   : > { %v2220_v20 = vmax.f32 %v6878_v0, %v5161_v24  ;;  %v5164_v39 = vadd.f32 %v5163_v19, %v5162_v26  ;;  %v5918_v0 = vld [vmem:[%s7639_s5 + $0x40] ss:$8 sps:$4 sm:$0xff]  }
 0x306   : > { %2626 = vmatpush1.bf16.msra.mxu1 %v5912_v56 }
 0x307   : > { %v2221_v12 = vmax.f32 %v6880_v5, %v5164_v39  ;;  %2627 = vmatprep.subr.bf16.mxu1 %v5917_v59  ;;  %v5923_v5 = vld [vmem:[%s7639_s5 + $0x54] ss:$8 sps:$4 sm:$0xff]  }
 0x309   : > { %v2286_v47 = vmax.f32 %v2220_v20, %v2221_v12  ;;  %v5165_v25 = vpop.f32.mrb[76].mxu1 }
 0x30a   : > { %v5166_v27 = vpop.f32.mrb[77].mxu1  ;;  %2628 = vmatpush1.bf16.msra.mxu1 %v5915_v54 }
 0x30b   : > { %v5167_v48 = vadd.f32 %v5166_v27, %v5165_v25  ;;  %v5168_v37 = vpop.f32.mrb[78].mxu1  ;;  %v6968_v44 = vpack.c.bf16 %v2286_v47, %v2282_v32  ;;  %2629 = vmatprep.subr.bf16.mxu1 %v5920_v29  ;;  %v5932_v32 = vld [vmem:[%s7639_s5 + $0x104] ss:$8 sps:$4 sm:$0xff]  }
 0x30c   : > { %v5169_v49 = vpop.f32.mrb[79].mxu1 }
 0x30d   : > { %v2222_v50 = vmax.f32 %v6882_v15, %v5167_v48  ;;  %v5170_v53 = vadd.f32 %v5169_v49, %v5168_v37  ;;  %2501 = vmatmul.mubr.bf16.gmra.mrb[116].mxu1 %v6968_v44 }
 0x30e   : > { %2510 = vmatprep.mubr.bf16.mxu1 %v6154_v40  ;;  %2630 = vmatpush1.bf16.msra.mxu1 %v5918_v0 }
 0x30f   : > { %v2223_v35 = vmax.f32 %v6884_v18, %v5170_v53  ;;  %2631 = vmatprep.subr.bf16.mxu1 %v5923_v5  ;;  %v5929_v18 = vld [vmem:[%s7639_s5 + $0x74] ss:$8 sps:$4 sm:$0xff]  }
 0x311   : > { %v2290_v41 = vmax.f32 %v2222_v50, %v2223_v35  ;;  %v5171_v63 = vpop.f32.mrb[80].mxu1 }
 0x312   : > { %v5172_v15 = vpop.f32.mrb[81].mxu1  ;;  %2632 = vmatpush1.bf16.msra.mxu1 %v5921_v57 }
 0x313   : > { %v5173_v13 = vadd.f32 %v5172_v15, %v5171_v63  ;;  %v5174_v16 = vpop.f32.mrb[82].mxu1  ;;  %2633 = vmatprep.subr.bf16.mxu1 %v5926_v62  ;;  %v6989_v17 = vpack.c.bf16 %v2290_v41, %v2286_v47 }
 0x314   : > { %v5175_v46 = vpop.f32.mrb[83].mxu1 }
 0x315   : > { %v2224_v22 = vmax.f32 %v6889_v28, %v5173_v13  ;;  %v5176_v51 = vadd.f32 %v5175_v46, %v5174_v16 }
 0x316   : > { %2634 = vmatpush1.bf16.msra.mxu1 %v5924_v4 }
 0x317   : > { %v2225_v31 = vmax.f32 %v6891_v33, %v5176_v51  ;;  %2635 = vmatprep.subr.bf16.mxu1 %v5929_v18 }
 0x319   : > { %v2294_v34 = vmax.f32 %v2224_v22, %v2225_v31  ;;  %v5177_v10 = vpop.f32.mrb[84].mxu1 }
 0x31a   : > { %v5178_v56 = vpop.f32.mrb[85].mxu1  ;;  %2636 = vmatpush1.bf16.msra.mxu1 %v5927_v23 }
 0x31b   : > { %v5179_v24 = vadd.f32 %v5178_v56, %v5177_v10  ;;  %v5180_v26 = vpop.f32.mrb[86].mxu1  ;;  %v6999_v28 = vpack.c.bf16 %v2294_v34, %v2290_v41  ;;  %2816 = vmatprep.subr.bf16.mxu1 %v5932_v32 }
 0x31c   : > { %v5181_v59 = vpop.f32.mrb[87].mxu1 }
 0x31d   : > { %v2226_v19 = vmax.f32 %v6893_v11, %v5179_v24  ;;  %v5182_v20 = vadd.f32 %v5181_v59, %v5180_v26  ;;  %2511 = vmatmul.mubr.bf16.gmra.mrb[120].mxu1 %v6999_v28  ;;  %v5930_v59 = vld [vmem:[%s7639_s5 + $0x100] ss:$8 sps:$4 sm:$0xff]  }
 0x31e   : > { %2520 = vmatprep.mubr.bf16.mxu1 %v6154_v40 }
 0x31f   : > { %v2227_v33 = vmax.f32 %v6895_v42, %v5182_v20 }
 0x321   : > { %v2298_v39 = vmax.f32 %v2226_v19, %v2227_v33  ;;  %v5183_v54 = vpop.f32.mrb[88].mxu1 }
 0x322   : > { %v5184_v12 = vpop.f32.mrb[89].mxu1 }
 0x323   : > { %v5185_v29 = vadd.f32 %v5184_v12, %v5183_v54  ;;  %v5186_v47 = vpop.f32.mrb[90].mxu1  ;;  %v7005_v25 = vpack.c.bf16 %v2298_v39, %v2294_v34  ;;  %v5933_v12 = vld [vmem:[%s7639_s5 + $0x110] ss:$8 sps:$4 sm:$0xff]  }
 0x324   : > { %v5187_v27 = vpop.f32.mrb[91].mxu1 }
 0x325   : > { %v2228_v0 = vmax.f32 %v6897_v61, %v5185_v29  ;;  %v5188_v48 = vadd.f32 %v5187_v27, %v5186_v47  ;;  %v5938_v47 = vld [vmem:[%s7639_s5 + $0x124] ss:$8 sps:$4 sm:$0xff]  }
 0x327   : > { %v2229_v11 = vmax.f32 %v6899_v38, %v5188_v48 }
 0x329   : > { %v2302_v37 = vmax.f32 %v2228_v0, %v2229_v11  ;;  %v5189_v5 = vpop.f32.mrb[92].mxu1 }
 0x32a   : > { %v5190_v49 = vpop.f32.mrb[93].mxu1 }
 0x32b   : > { %v5191_v50 = vadd.f32 %v5190_v49, %v5189_v5  ;;  %v5192_v53 = vpop.f32.mrb[94].mxu1  ;;  %v7009_v57 = vpack.c.bf16 %v2302_v37, %v2298_v39  ;;  %v5939_v49 = vld [vmem:[%s7639_s5 + $0x130] ss:$8 sps:$4 sm:$0xff]  }
 0x32c   : > { %v5193_v42 = vpop.f32.mrb[95].mxu1 }
 0x32d   : > { %v2230_v35 = vmax.f32 %v6901_v55, %v5191_v50  ;;  %v5194_v62 = vadd.f32 %v5193_v42, %v5192_v53  ;;  %2521 = vmatmul.mubr.bf16.gmra.mrb[124].mxu1 %v7009_v57  ;;  %v5944_v53 = vld [vmem:[%s7639_s5 + $0x144] ss:$8 sps:$4 sm:$0xff]  }
 0x32e   : > { %2530 = vmatprep.mubr.bf16.mxu1 %v6154_v40 }
 0x32f   : > { %v2231_v61 = vmax.f32 %v6903_v30, %v5194_v62  ;;  %v5945_v62 = vld [vmem:[%s7639_s5 + $0x150] ss:$8 sps:$4 sm:$0xff]  }
 0x331   : > { %v2306_v41 = vmax.f32 %v2230_v35, %v2231_v61  ;;  %v5195_v63 = vpop.f32.mrb[96].mxu1  ;;  %v5947_v35 = vld [vmem:[%s7639_s5 + $0x154] ss:$8 sps:$4 sm:$0xff]   ;;  %v5950_v61 = vld [vmem:[%s7639_s5 + $0x164] ss:$8 sps:$4 sm:$0xff]  }
 0x332   : > { %v5196_v38 = vpop.f32.mrb[97].mxu1 }
 0x333   : > { %v5197_v15 = vadd.f32 %v5196_v38, %v5195_v63  ;;  %v5198_v4 = vpop.f32.mrb[98].mxu1  ;;  %v7015_v13 = vpack.c.bf16 %v2306_v41, %v2302_v37  ;;  %v5953_v63 = vld [vmem:[%s7639_s5 + $0x174] ss:$8 sps:$4 sm:$0xff]   ;;  %v6002_v38 = vld [vmem:[%s7641_s7 + $0x40] sm:$0xff]  }
 0x334   : > { %v5199_v16 = vpop.f32.mrb[99].mxu1  ;;  %5219 = vmatprep.subr.bf16.mxu0 %v6002_v38 }
 0x335   : > { %v2232_v18 = vmax.f32 %v6905_v2, %v5197_v15  ;;  %v5200_v46 = vadd.f32 %v5199_v16, %v5198_v4  ;;  %v6003_v15 = vld [vmem:[%s7641_s7] sm:$0xff]   ;;  %v6004_v4 = vld [vmem:[%s7641_s7 + $0x48] sm:$0xff]   ;;  %v5951_v16 = vld [vmem:[%s7639_s5 + $0x170] ss:$8 sps:$4 sm:$0xff]  }
 0x336   : > { %5220 = vmatpush3.bf16.msra.mxu0 %v6003_v15 }
 0x337   : > { %v2233_v55 = vmax.f32 %v6907_v36, %v5200_v46  ;;  %v6005_v46 = vld [vmem:[%s7641_s7 + $0x8] sm:$0xff]   ;;  %5221 = vmatprep.subr.bf16.mxu0 %v6004_v4 }
 0x339   : > { %v2310_v22 = vmax.f32 %v2232_v18, %v2233_v55  ;;  %v5201_v51 = vpop.f32.mrb[100].mxu1  ;;  %v5956_v18 = vld [vmem:[%s7639_s5 + $0x184] ss:$8 sps:$4 sm:$0xff]   ;;  %v6006_v55 = vld [vmem:[%s7641_s7 + $0x50] sm:$0xff]  }
 0x33a   : > { %v5202_v23 = vpop.f32.mrb[101].mxu1  ;;  %5222 = vmatpush3.bf16.msra.mxu0 %v6005_v46 }
 0x33b   : > { %v5203_v31 = vadd.f32 %v5202_v23, %v5201_v51  ;;  %v5204_v32 = vpop.f32.mrb[102].mxu1  ;;  %v7019_v34 = vpack.c.bf16 %v2310_v22, %v2306_v41  ;;  %v5948_v41 = vld [vmem:[%s7639_s5 + $0x160] ss:$8 sps:$4 sm:$0xff]   ;;  %5223 = vmatprep.subr.bf16.mxu0 %v6006_v55  ;;  %v6008_v51 = vld [vmem:[%s7641_s7 + $0x58] sm:$0xff]  }
 0x33c   : > { %v5205_v30 = vpop.f32.mrb[103].mxu1  ;;  %v6009_v23 = vld [vmem:[%s7641_s7 + $0x18] sm:$0xff]  }
 0x33d   : > { %v2234_v10 = vmax.f32 %v6909_v45, %v5203_v31  ;;  %v5206_v56 = vadd.f32 %v5205_v30, %v5204_v32  ;;  %2531 = vmatmul.mubr.bf16.gmra.mrb[128].mxu1 %v7019_v34  ;;  %v5935_v45 = vld [vmem:[%s7639_s5 + $0x114] ss:$8 sps:$4 sm:$0xff]   ;;  %v6010_v31 = vld [vmem:[%s7641_s7 + $0x60] sm:$0xff]  }
 0x33e   : > { %2653 = vmatprep.mubr.bf16.mxu1 %v6154_v40  ;;  %v5954_v32 = vld [vmem:[%s7639_s5 + $0x180] ss:$8 sps:$4 sm:$0xff]   ;;  %v5959_v30 = vld [vmem:[%s7639_s5 + $0x194] ss:$8 sps:$4 sm:$0xff]  }
 0x33f   : > { %v2235_v2 = vmax.f32 %v6911_v52, %v5206_v56  ;;  %v6012_v56 = vld [vmem:[%s7641_s7 + $0x68] sm:$0xff]  }
 0x341   : > { %v7025_v24 = vmax.f32 %v2234_v10, %v2235_v2  ;;  %v5207_v36 = vpop.f32.mrb[104].mxu1  ;;  %v6011_v10 = vld [vmem:[%s7641_s7 + $0x20] sm:$0xff]   ;;  %v5957_v2 = vld [vmem:[%s7639_s5 + $0x190] ss:$8 sps:$4 sm:$0xff]  }
 0x342   : > { %v5208_v26 = vpop.f32.mrb[105].mxu1 }
 0x343   : > { %v5209_v19 = vadd.f32 %v5208_v26, %v5207_v36  ;;  %v5210_v20 = vpop.f32.mrb[106].mxu1  ;;  %v7034_v33 = vpack.c.bf16 %v7025_v24, %v2310_v22  ;;  %v6007_v22 = vld [vmem:[%s7641_s7 + $0x10] sm:$0xff]   ;;  %v5962_v36 = vld [vmem:[%s7639_s5 + $0x1a4] ss:$8 sps:$4 sm:$0xff]  }
 0x344   : > { %v5211_v39 = vpop.f32.mrb[107].mxu1  ;;  %5224 = vmatpush3.bf16.msra.mxu0 %v6007_v22  ;;  %v6014_v26 = vld [vmem:[%s7641_s7 + $0x70] sm:$0xff]   ;;  %v6020_v22 = vld [vmem:[%s7642_s8 + $0x48] sm:$0xff]  }
 0x345   : > { %v2236_v52 = vmax.f32 %v6913_v58, %v5209_v19  ;;  %v5212_v54 = vadd.f32 %v5211_v39, %v5210_v20  ;;  %2654 = vmatmul.mubr.bf16.vlgmr.msra.gmra.mrb[112].mxu1 %v2334_v8  ;;  %5225 = vmatprep.subr.bf16.mxu0 %v6008_v51  ;;  %v5965_v19 = vld [vmem:[%s7639_s5 + $0x1b4] ss:$8 sps:$4 sm:$0xff]   ;;  %v5963_v39 = vld [vmem:[%s7639_s5 + $0x1b0] ss:$8 sps:$4 sm:$0xff]  }
 0x346   : > { %2817 = vmatpush1.bf16.msra.mxu1 %v5930_v59  ;;  %2663 = vmatprep.mubr.bf16.mxu1 %v6154_v40  ;;  %v5960_v59 = vld [vmem:[%s7639_s5 + $0x1a0] ss:$8 sps:$4 sm:$0xff]   ;;  %v6015_v20 = vld [vmem:[%s7641_s7 + $0x30] sm:$0xff]  }
 0x347   : > { %v2237_v29 = vmax.f32 %v6915_v3, %v5212_v54  ;;  %2818 = vmatprep.subr.bf16.mxu1 %v5935_v45  ;;  %v5941_v3 = vld [vmem:[%s7639_s5 + $0x134] ss:$8 sps:$4 sm:$0xff]  }
 0x348   : > { %5226 = vmatpush3.bf16.msra.mxu0 %v6009_v23  ;;  %v6016_v45 = vld [vmem:[%s7641_s7 + $0x78] sm:$0xff]  }
 0x349   : > { %v7048_v58 = vmax.f32 %v2236_v52, %v2237_v29  ;;  %v5213_v27 = vpop.f32.mrb[108].mxu1  ;;  %5227 = vmatprep.subr.bf16.mxu0 %v6010_v31  ;;  %v5968_v52 = vld [vmem:[%s7639_s5 + $0x1c4] ss:$8 sps:$4 sm:$0xff]   ;;  %v6017_v54 = vld [vmem:[%s7641_s7 + $0x38] sm:$0xff]  }
 0x34a   : > { %v5214_v0 = vpop.f32.mrb[109].mxu1  ;;  %2819 = vmatpush1.bf16.msra.mxu1 %v5933_v12  ;;  %v5966_v12 = vld [vmem:[%s7639_s5 + $0x1c0] ss:$8 sps:$4 sm:$0xff]   ;;  %v5971_v29 = vld [vmem:[%s7639_s5 + $0x1d4] ss:$8 sps:$4 sm:$0xff]  }
 0x34b   : > { %v5215_v1 = vadd.f32 %v5214_v0, %v5213_v27  ;;  %v5216_v8 = vpop.f32.mrb[110].mxu1  ;;  %2820 = vmatprep.subr.bf16.mxu1 %v5938_v47  ;;  %v2933_v48 = vpack.c.bf16 %v7048_v58, %v7025_v24  ;;  %v5969_v47 = vld [vmem:[%s7639_s5 + $0x1d0] ss:$8 sps:$4 sm:$0xff]   ;;  %v5974_v27 = vld [vmem:[%s7639_s5 + $0x1e4] ss:$8 sps:$4 sm:$0xff]  }
 0x34c   : > { %v5217_v11 = vpop.f32.mrb[111].mxu1  ;;  %5228 = vmatpush3.bf16.msra.mxu0 %v6011_v10  ;;  %v5972_v0 = vld [vmem:[%s7639_s5 + $0x1e0] ss:$8 sps:$4 sm:$0xff]  }
 0x34d   : > { %v2238_v37 = vmax.f32 %v6917_v14, %v5215_v1  ;;  %v5218_v5 = vadd.f32 %v5217_v11, %v5216_v8  ;;  %2664 = vmatmul.mubr.bf16.gmra.mrb[116].mxu1 %v6955_v60  ;;  %v5942_v14 = vld [vmem:[%s7639_s5 + $0x140] ss:$8 sps:$4 sm:$0xff]   ;;  %5229 = vmatprep.subr.bf16.mxu0 %v6012_v56  ;;  %v5975_v1 = vld [vmem:[%s7639_s5 + $0x1f0] ss:$8 sps:$4 sm:$0xff]   ;;  %v5980_v8 = vld [vmem:[%s7639_s5 + $0x204] ss:$8 sps:$4 sm:$0xff]  }
 0x34e   : > { %2821 = vmatpush1.bf16.msra.mxu1 %v5936_v43  ;;  %2673 = vmatprep.mubr.bf16.mxu1 %v6154_v40  ;;  %v5977_v43 = vld [vmem:[%s7639_s5 + $0x1f4] ss:$8 sps:$4 sm:$0xff]   ;;  %v6021_v10 = vld [vmem:[%s7642_s8 + $0x8] sm:$0xff]  }
 0x34f   : > { %v2239_v50 = vmax.f32 %v6919_v21, %v5218_v5  ;;  %2822 = vmatprep.subr.bf16.mxu1 %v5941_v3  ;;  %v5978_v3 = vld [vmem:[%s7639_s5 + $0x200] ss:$8 sps:$4 sm:$0xff]   ;;  %v5983_v11 = vld [vmem:[%s7639_s5 + $0x214] ss:$8 sps:$4 sm:$0xff]   ;;  %v5986_v5 = vld [vmem:[%s7639_s5 + $0x224] ss:$8 sps:$4 sm:$0xff]  }
 0x351   : > { %v7068_v42 = vmax.f32 %v2238_v37, %v2239_v50  ;;  %v5981_v37 = vld [vmem:[%s7639_s5 + $0x210] ss:$8 sps:$4 sm:$0xff]  }
 0x352   : > { %2823 = vmatpush1.bf16.msra.mxu1 %v5939_v49  ;;  %v5984_v49 = vld [vmem:[%s7639_s5 + $0x220] ss:$8 sps:$4 sm:$0xff]   ;;  %v5987_v50 = vld [vmem:[%s7639_s5 + $0x230] ss:$8 sps:$4 sm:$0xff]  }
 0x353   : > { %2824 = vmatprep.subr.bf16.mxu1 %v5944_v53  ;;  %v3148_v21 = vpack.c.bf16 %v7068_v42, %v7048_v58  ;;  %v5992_v53 = vld [vmem:[%s7639_s5 + $0x244] ss:$8 sps:$4 sm:$0xff]  }
 0x355   : > { %2674 = vmatmul.mubr.bf16.gmra.mrb[120].mxu1 %v6989_v17 }
 0x356   : > { %2825 = vmatpush1.bf16.msra.mxu1 %v5942_v14  ;;  %2683 = vmatprep.mubr.bf16.mxu1 %v6154_v40  ;;  %v5990_v14 = vld [vmem:[%s7639_s5 + $0x240] ss:$8 sps:$4 sm:$0xff]  }
 0x357   : > { %2826 = vmatprep.subr.bf16.mxu1 %v5947_v35  ;;  %v5993_v35 = vld [vmem:[%s7639_s5 + $0x250] ss:$8 sps:$4 sm:$0xff]  }
 0x35a   : > { %2827 = vmatpush1.bf16.msra.mxu1 %v5945_v62  ;;  %v5998_v62 = vld [vmem:[%s7639_s5 + $0x264] ss:$8 sps:$4 sm:$0xff]  }
 0x35b   : > { %2828 = vmatprep.subr.bf16.mxu1 %v5950_v61  ;;  %v5996_v61 = vld [vmem:[%s7639_s5 + $0x260] ss:$8 sps:$4 sm:$0xff]  }
 0x35d   : > { %2684 = vmatmul.mubr.bf16.gmra.mrb[124].mxu1 %v7005_v25 }
 0x35e   : > { %2693 = vmatprep.mubr.bf16.mxu1 %v6154_v40  ;;  %2829 = vmatpush1.bf16.msra.mxu1 %v5948_v41  ;;  %v5999_v41 = vld [vmem:[%s7639_s5 + $0x270] ss:$8 sps:$4 sm:$0xff]  }
 0x35f   : > { %2830 = vmatprep.subr.bf16.mxu1 %v5953_v63 }
 0x362   : > { %2831 = vmatpush1.bf16.msra.mxu1 %v5951_v16 }
 0x363   : > { %3031 = vmatprep.subr.bf16.mxu1 %v5956_v18  ;;  %v6019_v18 = vld [vmem:[%s7642_s8] sm:$0xff]  }
 0x365   : > { %2694 = vmatmul.mubr.bf16.gmra.mrb[128].mxu1 %v7015_v13 }
 0x366   : > { %2848 = vmatprep.mubr.bf16.mxu1 %v6154_v40 }
 0x36d   : > { %2849 = vmatmul.mubr.bf16.vlgmr.msra.gmra.mrb[112].mxu1 %v6955_v60  ;;  %v6013_v60 = vld [vmem:[%s7641_s7 + $0x28] sm:$0xff]  }
 0x36e   : > { %3032 = vmatpush1.bf16.msra.mxu1 %v5954_v32  ;;  %2858 = vmatprep.mubr.bf16.mxu1 %v6154_v40 }
 0x36f   : > { %3033 = vmatprep.subr.bf16.mxu1 %v5959_v30  ;;  %5230 = vmatpush3.bf16.msra.mxu0 %v6013_v60 }
 0x370   : > { %5231 = vmatprep.subr.bf16.mxu0 %v6014_v26 }
 0x372   : > { %3034 = vmatpush1.bf16.msra.mxu1 %v5957_v2 }
 0x373   : > { %3035 = vmatprep.subr.bf16.mxu1 %v5962_v36  ;;  %5232 = vmatpush3.bf16.msra.mxu0 %v6015_v20  ;;  %v6022_v36 = vld [vmem:[%s7642_s8 + $0x50] sm:$0xff]  }
 0x374   : > { %5233 = vmatprep.subr.bf16.mxu0 %v6016_v45  ;;  %v6023_v45 = vld [vmem:[%s7642_s8 + $0x10] sm:$0xff]  }
 0x375   : > { %2859 = vmatmul.mubr.bf16.gmra.mrb[116].mxu1 %v6989_v17 }
 0x376   : > { %3036 = vmatpush1.bf16.msra.mxu1 %v5960_v59  ;;  %2868 = vmatprep.mubr.bf16.mxu1 %v6154_v40 }
 0x377   : > { %3037 = vmatprep.subr.bf16.mxu1 %v5965_v19  ;;  %5234 = vmatpush3.bf16.msra.mxu0 %v6017_v54  ;;  %v6024_v54 = vld [vmem:[%s7642_s8 + $0x58] sm:$0xff]  }
 0x37a   : > { %3038 = vmatpush1.bf16.msra.mxu1 %v5963_v39 }
 0x37b   : > { %3039 = vmatprep.subr.bf16.mxu1 %v5968_v52 }
 0x37d   : > { %2869 = vmatmul.mubr.bf16.gmra.mrb[120].mxu1 %v7005_v25 }
 0x37e   : > { %3040 = vmatpush1.bf16.msra.mxu1 %v5966_v12  ;;  %2878 = vmatprep.mubr.bf16.mxu1 %v6154_v40 }
 0x37f   : > { %3041 = vmatprep.subr.bf16.mxu1 %v5971_v29 }
 0x382   : > { %3042 = vmatpush1.bf16.msra.mxu1 %v5969_v47 }
 0x383   : > { %3043 = vmatprep.subr.bf16.mxu1 %v5974_v27 }
 0x385   : > { %2879 = vmatmul.mubr.bf16.gmra.mrb[124].mxu1 %v7015_v13 }
 0x386   : > { %2888 = vmatprep.mubr.bf16.mxu1 %v6154_v40  ;;  %3044 = vmatpush1.bf16.msra.mxu1 %v5972_v0 }
 0x387   : > { %3045 = vmatprep.subr.bf16.mxu1 %v5977_v43  ;;  %v6025_v43 = vld [vmem:[%s7642_s8 + $0x18] sm:$0xff]  }
 0x38a   : > { %3046 = vmatpush1.bf16.msra.mxu1 %v5975_v1 }
 0x38b   : > { %3246 = vmatprep.subr.bf16.mxu1 %v5980_v8 }
 0x38d   : > { %2889 = vmatmul.mubr.bf16.gmra.mrb[128].mxu1 %v7034_v33 }
 0x38e   : > { %3063 = vmatprep.mubr.bf16.mxu1 %v6154_v40 }
 0x395   : > { %3064 = vmatmul.mubr.bf16.vlgmr.msra.gmra.mrb[112].mxu1 %v6968_v44  ;;  %v5989_v44 = vld [vmem:[%s7639_s5 + $0x234] ss:$8 sps:$4 sm:$0xff]  }
 0x396   : > { %3247 = vmatpush1.bf16.msra.mxu1 %v5978_v3  ;;  %3073 = vmatprep.mubr.bf16.mxu1 %v6154_v40  ;;  %v6026_v3 = vld [vmem:[%s7642_s8 + $0x60] sm:$0xff]  }
 0x397   : > { %3248 = vmatprep.subr.bf16.mxu1 %v5983_v11 }
 0x39a   : > { %3249 = vmatpush1.bf16.msra.mxu1 %v5981_v37 }
 0x39b   : > { %3250 = vmatprep.subr.bf16.mxu1 %v5986_v5 }
 0x39d   : > { %3074 = vmatmul.mubr.bf16.gmra.mrb[116].mxu1 %v6999_v28  ;;  %v5995_v28 = vld [vmem:[%s7639_s5 + $0x254] ss:$8 sps:$4 sm:$0xff]  }
 0x39e   : > { %3251 = vmatpush1.bf16.msra.mxu1 %v5984_v49  ;;  %3083 = vmatprep.mubr.bf16.mxu1 %v6154_v40 }
 0x39f   : > { %3252 = vmatprep.subr.bf16.mxu1 %v5989_v44 }
 0x3a2   : > { %3253 = vmatpush1.bf16.msra.mxu1 %v5987_v50  ;;  %v6027_v50 = vld [vmem:[%s7642_s8 + $0x20] sm:$0xff]  }
 0x3a3   : > { %3254 = vmatprep.subr.bf16.mxu1 %v5992_v53 }
 0x3a5   : > { %3084 = vmatmul.mubr.bf16.gmra.mrb[120].mxu1 %v7009_v57  ;;  %v6001_v57 = vld [vmem:[%s7639_s5 + $0x274] ss:$8 sps:$4 sm:$0xff]  }
 0x3a6   : > { %3255 = vmatpush1.bf16.msra.mxu1 %v5990_v14  ;;  %3093 = vmatprep.mubr.bf16.mxu1 %v6154_v40 }
 0x3a7   : > { %3256 = vmatprep.subr.bf16.mxu1 %v5995_v28  ;;  %v6028_v28 = vld [vmem:[%s7642_s8 + $0x68] sm:$0xff]  }
 0x3aa   : > { %3257 = vmatpush1.bf16.msra.mxu1 %v5993_v35 }
 0x3ab   : > { %3258 = vmatprep.subr.bf16.mxu1 %v5998_v62 }
 0x3ad   : > { %3094 = vmatmul.mubr.bf16.gmra.mrb[124].mxu1 %v7019_v34 }
 0x3ae   : > { %3103 = vmatprep.mubr.bf16.mxu1 %v6154_v40  ;;  %3259 = vmatpush1.bf16.msra.mxu1 %v5996_v61 }
 0x3af   : > { %3260 = vmatprep.subr.bf16.mxu1 %v6001_v57 }
 0x3b2   : > { %3261 = vmatpush1.bf16.msra.mxu1 %v5999_v41 }
 0x3b5   : > { %3104 = vmatmul.mubr.bf16.gmra.mrb[128].mxu1 %v2933_v48 }
 0x3b6   : > { %3278 = vmatprep.mubr.bf16.mxu1 %v6154_v40 }
 0x3bd   : > { %3279 = vmatmul.mubr.bf16.vlgmr.msra.gmra.mrb[112].mxu1 %v6989_v17  ;;  %v6018_v17 = vld [vmem:[%s7642_s8 + $0x40] sm:$0xff]  }
 0x3be   : > { %3288 = vmatprep.mubr.bf16.mxu1 %v6154_v40  ;;  %5265 = vmatprep.subr.bf16.mxu0 %v6018_v17  ;;  %v6029_v17 = vld [vmem:[%s7642_s8 + $0x28] sm:$0xff]  }
 0x3c5   : > { %3289 = vmatmul.mubr.bf16.gmra.mrb[116].mxu1 %v7005_v25  ;;  %v3349_v25 = vld [vmem:[%s7640_s6] sm:$0x3] }
 0x3c6   : > { %3298 = vmatprep.mubr.bf16.mxu1 %v6154_v40 }
 0x3cd   : > { %3299 = vmatmul.mubr.bf16.gmra.mrb[120].mxu1 %v7015_v13  ;;  %v7284_v13 = vrot.slane %v3349_v25, %v619_v7 }
 0x3ce   : > { %3308 = vmatprep.mubr.bf16.mxu1 %v6154_v40 }
 0x3d5   : > { %3309 = vmatmul.mubr.bf16.gmra.mrb[124].mxu1 %v7034_v33 }
 0x3d6   : > { %3318 = vmatprep.mubr.bf16.mxu1 %v6154_v40  ;;  %v7288_v40 = vrot.slane %v3349_v25, %v623_v9 }
 0x3dd   : > { %3319 = vmatmul.mubr.bf16.gmra.mrb[128].mxu1 %v3148_v21 }
 0x490   : > { %v3280_v34 = vpop.f32.mrb[112].mxu1 }
 0x491   : > { %v3361_v24 = vadd.f32 %v7284_v13, %v3280_v34  ;;  %v3282_v33 = vpop.f32.mrb[113].mxu1 }
 0x492   : > { %v3362_v58 = vadd.f32 %v7288_v40, %v3282_v33  ;;  %v3284_v48 = vpop.f32.mrb[114].mxu1 }
 0x493   : > { %v3363_v42 = vadd.f32 %v7284_v13, %v3284_v48  ;;  %v3286_v21 = vpop.f32.mrb[115].mxu1  ;;  %v3381_v38 = vmax.f32 %v3361_v24, 0.0  ;;  %v6030_v24 = vld [vmem:[%s7642_s8 + $0x70] sm:$0xff]  }
 0x494   : > { %v3364_v63 = vadd.f32 %v7288_v40, %v3286_v21  ;;  %v3382_v7 = vmax.f32 %v3362_v58, 0.0 }
 0x495   : > { %v3383_v15 = vmax.f32 %v3363_v42, 0.0 }
 0x496   : > { %v3384_v4 = vmax.f32 %v3364_v63, 0.0  ;;  %v6031_v63 = vld [vmem:[%s7642_s8 + $0x30] sm:$0xff]  }
 0x497   : > { %v7294_v16 = vpack.c.bf16 %v3383_v15, %v3381_v38 }
 0x498   : > { %v7296_v6 = vpack.c.bf16 %v3384_v4, %v3382_v7  ;;  %v3290_v9 = vpop.f32.mrb[116].mxu1  ;;  %v6032_v7 = vld [vmem:[%s7642_s8 + $0x78] sm:$0xff]  }
 0x499   : > { %v3365_v46 = vadd.f32 %v7284_v13, %v3290_v9  ;;  %v3292_v55 = vpop.f32.mrb[117].mxu1 }
 0x49a   : > { %v3366_v51 = vadd.f32 %v7288_v40, %v3292_v55  ;;  %v3294_v23 = vpop.f32.mrb[118].mxu1  ;;  %3571 = vmatprep.mubr.bf16.mxu0 %v7296_v6 }
 0x49b   : > { %v3367_v31 = vadd.f32 %v7284_v13, %v3294_v23  ;;  %v3296_v32 = vpop.f32.mrb[119].mxu1  ;;  %3572 = vmatmul.mubr.bf16.vlgmr.msra.gmra.mrb[56].mxu0 %v7294_v16  ;;  %v3385_v56 = vmax.f32 %v3365_v46, 0.0 }
 0x49c   : > { %v3368_v30 = vadd.f32 %v7288_v40, %v3296_v32  ;;  %5266 = vmatpush3.bf16.msra.mxu0 %v6019_v18  ;;  %v3386_v60 = vmax.f32 %v3366_v51, 0.0 }
 0x49d   : > { %v3387_v2 = vmax.f32 %v3367_v31, 0.0  ;;  %5267 = vmatprep.subr.bf16.mxu0 %v6020_v22  ;;  %v6033_v22 = vld [vmem:[%s7642_s8 + $0x38] sm:$0xff]  }
 0x49e   : > { %v3388_v26 = vmax.f32 %v3368_v30, 0.0 }
 0x49f   : > { %v7316_v59 = vpack.c.bf16 %v3387_v2, %v3385_v56  ;;  %v6038_v56 = vld [vmem:[%s7643_s9 + $0x50] sm:$0xff]  }
 0x4a0   : > { %v7318_v19 = vpack.c.bf16 %v3388_v26, %v3386_v60  ;;  %v3300_v20 = vpop.f32.mrb[120].mxu1  ;;  %5268 = vmatpush3.bf16.msra.mxu0 %v6021_v10  ;;  %v6039_v2 = vld [vmem:[%s7643_s9 + $0x10] sm:$0xff]   ;;  %v6041_v60 = vld [vmem:[%s7643_s9 + $0x18] sm:$0xff]   ;;  %v6042_v26 = vld [vmem:[%s7643_s9 + $0x60] sm:$0xff]  }
 0x4a1   : > { %v3369_v39 = vadd.f32 %v7284_v13, %v3300_v20  ;;  %v3302_v52 = vpop.f32.mrb[121].mxu1  ;;  %5269 = vmatprep.subr.bf16.mxu0 %v6022_v36  ;;  %v6040_v36 = vld [vmem:[%s7643_s9 + $0x58] sm:$0xff]   ;;  %v6045_v20 = vld [vmem:[%s7643_s9 + $0x28] sm:$0xff]  }
 0x4a2   : > { %v3370_v12 = vadd.f32 %v7288_v40, %v3302_v52  ;;  %v3304_v29 = vpop.f32.mrb[122].mxu1  ;;  %3579 = vmatprep.mubr.bf16.mxu0 %v7318_v19  ;;  %v6048_v52 = vld [vmem:[%s7643_s9 + $0x78] sm:$0xff]  }
 0x4a3   : > { %v3371_v47 = vadd.f32 %v7284_v13, %v3304_v29  ;;  %v3306_v27 = vpop.f32.mrb[123].mxu1  ;;  %3580 = vmatmul.mubr.bf16.gmra.mrb[60].mxu0 %v7316_v59  ;;  %v3389_v1 = vmax.f32 %v3369_v39, 0.0  ;;  %v6047_v39 = vld [vmem:[%s7643_s9 + $0x30] sm:$0xff]   ;;  %v6155_v29 = vmov 0.0  }
 0x4a4   : > { %v3372_v0 = vadd.f32 %v7288_v40, %v3306_v27  ;;  %5270 = vmatpush3.bf16.msra.mxu0 %v6023_v45  ;;  %v3390_v11 = vmax.f32 %v3370_v12, 0.0  ;;  %v6046_v45 = vld [vmem:[%s7643_s9 + $0x70] sm:$0xff]   ;;  %v6050_v12 = vld [vmem:[%s7643_s9 + $0xc0] sm:$0xff]   ;;  %5402 = vmatprep.subr.bf16.mxu1 %v6155_v29 }
 0x4a5   : > { %v3391_v8 = vmax.f32 %v3371_v47, 0.0  ;;  %5271 = vmatprep.subr.bf16.mxu0 %v6024_v54  ;;  %v6049_v54 = vld [vmem:[%s7643_s9 + $0x38] sm:$0xff]   ;;  %5418 = vmatprep.mubr.msk.bf16.mxu1 %vm6156_vm1, %v6155_v29 }
 0x4a6   : > { %v3392_v37 = vmax.f32 %v3372_v0, 0.0 }
 0x4a7   : > { %v3405_v5 = vpack.c.bf16 %v3391_v8, %v3389_v1 }
 0x4a8   : > { %v3406_v49 = vpack.c.bf16 %v3392_v37, %v3390_v11  ;;  %v3310_v44 = vpop.f32.mrb[124].mxu1  ;;  %5272 = vmatpush3.bf16.msra.mxu0 %v6025_v43 }
 0x4a9   : > { %v3373_v53 = vadd.f32 %v7284_v13, %v3310_v44  ;;  %v3312_v14 = vpop.f32.mrb[125].mxu1  ;;  %5273 = vmatprep.subr.bf16.mxu0 %v6026_v3 }
 0x4aa   : > { %v3374_v35 = vadd.f32 %v7288_v40, %v3312_v14  ;;  %v3314_v62 = vpop.f32.mrb[126].mxu1  ;;  %3587 = vmatprep.mubr.bf16.mxu0 %v3406_v49 }
 0x4ab   : > { %v3375_v61 = vadd.f32 %v7284_v13, %v3314_v62  ;;  %v3316_v57 = vpop.f32.mrb[127].mxu1  ;;  %3588 = vmatmul.mubr.bf16.gmra.mrb[64].mxu0 %v3405_v5  ;;  %v3393_v25 = vmax.f32 %v3373_v53, 0.0 }
 0x4ac   : > { %v3376_v41 = vadd.f32 %v7288_v40, %v3316_v57  ;;  %5274 = vmatpush3.bf16.msra.mxu0 %v6027_v50  ;;  %v3394_v33 = vmax.f32 %v3374_v35, 0.0 }
 0x4ad   : > { %v3395_v34 = vmax.f32 %v3375_v61, 0.0  ;;  %5275 = vmatprep.subr.bf16.mxu0 %v6028_v28 }
 0x4ae   : > { %v3396_v58 = vmax.f32 %v3376_v41, 0.0 }
 0x4af   : > { %v3407_v48 = vpack.c.bf16 %v3395_v34, %v3393_v25 }
 0x4b0   : > { %v3408_v42 = vpack.c.bf16 %v3396_v58, %v3394_v33  ;;  %v3320_v21 = vpop.f32.mrb[128].mxu1  ;;  %5276 = vmatpush3.bf16.msra.mxu0 %v6029_v17 }
 0x4b1   : > { %v3377_v38 = vadd.f32 %v7284_v13, %v3320_v21  ;;  %v3322_v15 = vpop.f32.mrb[129].mxu1  ;;  %5277 = vmatprep.subr.bf16.mxu0 %v6030_v24 }
 0x4b2   : > { %v3378_v4 = vadd.f32 %v7288_v40, %v3322_v15  ;;  %v3324_v9 = vpop.f32.mrb[130].mxu1  ;;  %3595 = vmatprep.mubr.bf16.mxu0 %v3408_v42 }
 0x4b3   : > { %v3379_v18 = vadd.f32 %v7284_v13, %v3324_v9  ;;  %v3326_v46 = vpop.f32.mrb[131].mxu1  ;;  %3596 = vmatmul.mubr.bf16.gmra.mrb[68].mxu0 %v3407_v48  ;;  %v3397_v51 = vmax.f32 %v3377_v38, 0.0  ;;  %v6034_v13 = vld [vmem:[%s7643_s9 + $0x40] sm:$0xff]  }
 0x4b4   : > { %v3380_v55 = vadd.f32 %v7288_v40, %v3326_v46  ;;  %5278 = vmatpush3.bf16.msra.mxu0 %v6031_v63  ;;  %v3398_v31 = vmax.f32 %v3378_v4, 0.0  ;;  %v6035_v40 = vld [vmem:[%s7643_s9] sm:$0xff]  }
 0x4b5   : > { %v3399_v23 = vmax.f32 %v3379_v18, 0.0  ;;  %5279 = vmatprep.subr.bf16.mxu0 %v6032_v7 }
 0x4b6   : > { %v3400_v32 = vmax.f32 %v3380_v55, 0.0 }
 0x4b7   : > { %v3409_v30 = vpack.c.bf16 %v3399_v23, %v3397_v51 }
 0x4b8   : > { %v3410_v10 = vpack.c.bf16 %v3400_v32, %v3398_v31  ;;  %5280 = vmatpush3.bf16.msra.mxu0 %v6033_v22 }
 0x4b9   : > { %5311 = vmatprep.subr.bf16.mxu0 %v6034_v13 }
 0x4ba   : > { %3603 = vmatprep.mubr.bf16.mxu0 %v3410_v10 }
 0x4bb   : > { %3604 = vmatmul.mubr.bf16.gmra.mrb[72].mxu0 %v3409_v30 }
 0x4bc   : > { %3772 = vmatprep.mubr.bf16.mxu0 %v7296_v6  ;;  %v6037_v6 = vld [vmem:[%s7643_s9 + $0x8] sm:$0xff]  }
 0x4c3   : > { %3773 = vmatmul.mubr.bf16.vlgmr.msra.gmra.mrb[76].mxu0 %v7294_v16  ;;  %v6036_v16 = vld [vmem:[%s7643_s9 + $0x48] sm:$0xff]  }
 0x4c4   : > { %3780 = vmatprep.mubr.bf16.mxu0 %v7318_v19  ;;  %5312 = vmatpush3.bf16.msra.mxu0 %v6035_v40  ;;  %v6044_v19 = vld [vmem:[%s7643_s9 + $0x68] sm:$0xff]  }
 0x4c5   : > { %5313 = vmatprep.subr.bf16.mxu0 %v6036_v16 }
 0x4c8   : > { %5314 = vmatpush3.bf16.msra.mxu0 %v6037_v6 }
 0x4c9   : > { %5315 = vmatprep.subr.bf16.mxu0 %v6038_v56 }
 0x4cb   : > { %3781 = vmatmul.mubr.bf16.gmra.mrb[80].mxu0 %v7316_v59  ;;  %v6043_v59 = vld [vmem:[%s7643_s9 + $0x20] sm:$0xff]  }
 0x4cc   : > { %3788 = vmatprep.mubr.bf16.mxu0 %v3406_v49  ;;  %5316 = vmatpush3.bf16.msra.mxu0 %v6039_v2 }
 0x4cd   : > { %5317 = vmatprep.subr.bf16.mxu0 %v6040_v36 }
 0x4d0   : > { %5318 = vmatpush3.bf16.msra.mxu0 %v6041_v60  ;;  %v6051_v60 = vld [vmem:[%s7643_s9 + $0x80] sm:$0xff]  }
 0x4d1   : > { %5319 = vmatprep.subr.bf16.mxu0 %v6042_v26 }
 0x4d3   : > { %3789 = vmatmul.mubr.bf16.gmra.mrb[84].mxu0 %v3405_v5 }
 0x4d4   : > { %3796 = vmatprep.mubr.bf16.mxu0 %v3408_v42  ;;  %5320 = vmatpush3.bf16.msra.mxu0 %v6043_v59 }
 0x4d5   : > { %5321 = vmatprep.subr.bf16.mxu0 %v6044_v19  ;;  %v6052_v19 = vld [vmem:[%s7643_s9 + $0xc8] sm:$0xff]  }
 0x4d8   : > { %5322 = vmatpush3.bf16.msra.mxu0 %v6045_v20 }
 0x4d9   : > { %5323 = vmatprep.subr.bf16.mxu0 %v6046_v45 }
 0x4db   : > { %3797 = vmatmul.mubr.bf16.gmra.mrb[88].mxu0 %v3407_v48 }
 0x4dc   : > { %3804 = vmatprep.mubr.bf16.mxu0 %v3410_v10  ;;  %5324 = vmatpush3.bf16.msra.mxu0 %v6047_v39 }
 0x4dd   : > { %5325 = vmatprep.subr.bf16.mxu0 %v6048_v52  ;;  %v6053_v52 = vld [vmem:[%s7643_s9 + $0x88] sm:$0xff]  }
 0x4e0   : > { %5326 = vmatpush3.bf16.msra.mxu0 %v6049_v54  ;;  %v6054_v54 = vld [vmem:[%s7643_s9 + $0xd0] sm:$0xff]  }
 0x4e1   : > { %5333 = vmatprep.subr.bf16.mxu0 %v6050_v12 }
 0x4e3   : > { %3805 = vmatmul.mubr.bf16.gmra.mrb[92].mxu0 %v3409_v30 }
 0x56e   : > { %v5235_v47 = vpop.f32.mrb[56].mxu0 }
 0x56f   : > { %v5236_v27 = vpop.f32.mrb[57].mxu0 }
 0x570   : > { %v5237_v0 = vadd.f32 %v5236_v27, %v5235_v47  ;;  %v5238_v43 = vpop.f32.mrb[58].mxu0 }
 0x571   : > { %v5239_v1 = vpop.f32.mrb[59].mxu0 }
 0x572   : > { %v5240_v8 = vadd.f32 %v5239_v1, %v5238_v43  ;;  %v6055_v1 = vld [vmem:[%s7643_s9 + $0x90] sm:$0xff]  }
 0x576   : > { %v5241_v3 = vpop.f32.mrb[60].mxu0 }
 0x577   : > { %v5242_v11 = vpop.f32.mrb[61].mxu0 }
 0x578   : > { %v5243_v37 = vadd.f32 %v5242_v11, %v5241_v3  ;;  %v5244_v5 = vpop.f32.mrb[62].mxu0  ;;  %v6056_v3 = vld [vmem:[%s7643_s9 + $0xd8] sm:$0xff]  }
 0x579   : > { %v5245_v49 = vpop.f32.mrb[63].mxu0 }
 0x57a   : > { %v5246_v44 = vadd.f32 %v5245_v49, %v5244_v5  ;;  %v6057_v49 = vld [vmem:[%s7643_s9 + $0x98] sm:$0xff]  }
 0x57e   : > { %v5247_v50 = vpop.f32.mrb[64].mxu0 }
 0x57f   : > { %v5248_v53 = vpop.f32.mrb[65].mxu0 }
 0x580   : > { %v5249_v14 = vadd.f32 %v5248_v53, %v5247_v50  ;;  %v5250_v28 = vpop.f32.mrb[66].mxu0 }
 0x581   : > { %v5251_v35 = vpop.f32.mrb[67].mxu0 }
 0x582   : > { %v5252_v62 = vadd.f32 %v5251_v35, %v5250_v28 }
 0x586   : > { %v5253_v61 = vpop.f32.mrb[68].mxu0 }
 0x587   : > { %v5254_v57 = vpop.f32.mrb[69].mxu0 }
 0x588   : > { %v7425_v41 = vadd.f32 %v5254_v57, %v5253_v61  ;;  %v5256_v17 = vpop.f32.mrb[70].mxu0  ;;  %v6059_v61 = vld [vmem:[%s7643_s9 + $0xa0] sm:$0xff]  }
 0x589   : > { %v5257_v25 = vpop.f32.mrb[71].mxu0 }
 0x58a   : > { %v5258_v34 = vadd.f32 %v5257_v25, %v5256_v17 }
 0x58e   : > { %v5259_v24 = vpop.f32.mrb[72].mxu0 }
 0x58f   : > { %v5260_v33 = vpop.f32.mrb[73].mxu0 }
 0x590   : > { %v7427_v58 = vadd.f32 %v5260_v33, %v5259_v24  ;;  %v5262_v48 = vpop.f32.mrb[74].mxu0  ;;  %v6061_v24 = vld [vmem:[%s7643_s9 + $0xa8] sm:$0xff]   ;;  %v6062_v33 = vld [vmem:[%s7643_s9 + $0xf0] sm:$0xff]  }
 0x591   : > { %v5263_v42 = vpop.f32.mrb[75].mxu0 }
 0x592   : > { %v7429_v21 = vadd.f32 %v5263_v42, %v5262_v48  ;;  %v6064_v42 = vld [vmem:[%s7643_s9 + $0xf8] sm:$0xff]  }
 0x596   : > { %v5281_v63 = vpop.f32.mrb[76].mxu0 }
 0x597   : > { %v5282_v38 = vpop.f32.mrb[77].mxu0 }
 0x598   : > { %v5283_v15 = vadd.f32 %v5282_v38, %v5281_v63  ;;  %v5284_v7 = vpop.f32.mrb[78].mxu0  ;;  %v6066_v63 = vld [vmem:[%s7643_s9 + $0x100] sm:$0xff]  }
 0x599   : > { %v5285_v4 = vpop.f32.mrb[79].mxu0 }
 0x59a   : > { %v3813_v9 = vmax.f32 %v5237_v0, %v5283_v15  ;;  %v5286_v18 = vadd.f32 %v5285_v4, %v5284_v7  ;;  %v6067_v15 = vld [vmem:[%s7643_s9 + $0x108] sm:$0xff]   ;;  %v6068_v7 = vld [vmem:[%s7643_s9 + $0x110] sm:$0xff]   ;;  %v6069_v4 = vld [vmem:[%s7643_s9 + $0x118] sm:$0xff]  }
 0x59c   : > { %v3814_v46 = vmax.f32 %v5240_v8, %v5286_v18  ;;  %v6071_v18 = vld [vmem:[%s7643_s9 + $0x128] sm:$0xff]  }
 0x59e   : > { %v3835_v55 = vmax.f32 %v3813_v9, %v3814_v46  ;;  %v5287_v22 = vpop.f32.mrb[80].mxu0  ;;  %v6070_v9 = vld [vmem:[%s7643_s9 + $0x120] sm:$0xff]   ;;  %v6072_v46 = vld [vmem:[%s7643_s9 + $0x130] sm:$0xff]  }
 0x59f   : > { %v5288_v51 = vpop.f32.mrb[81].mxu0 }
 0x5a0   : > { %v5289_v23 = vadd.f32 %v5288_v51, %v5287_v22  ;;  %v5290_v31 = vpop.f32.mrb[82].mxu0  ;;  %v3858_v26 = vpack.c.bf16 %v3835_v55, %v3835_v55  ;;  %v6073_v55 = vld [vmem:[%s7643_s9 + $0x138] sm:$0xff]   ;;  %v6074_v51 = vld [vmem:[%s7645_s11] sm:$0xff]  }
 0x5a1   : > { %v5291_v32 = vpop.f32.mrb[83].mxu0  ;;  %5403 = vmatpush3.bf16.msra.mxu1 %v6074_v51 }
 0x5a2   : > { %v3815_v30 = vmax.f32 %v5243_v37, %v5289_v23  ;;  %v5292_v10 = vadd.f32 %v5291_v32, %v5290_v31  ;;  %5404 = vmatprep.subr.bf16.mxu1 %v6155_v29  ;;  %v6075_v23 = vld [vmem:[%s7645_s11 + $0x8] sm:$0xff]   ;;  %v6076_v31 = vld [vmem:[%s7645_s11 + $0x10] sm:$0xff]   ;;  %v6077_v32 = vld [vmem:[%s7645_s11 + $0x18] sm:$0xff]  }
 0x5a4   : > { %v3816_v13 = vmax.f32 %v5246_v44, %v5292_v10  ;;  %v6058_v44 = vld [vmem:[%s7643_s9 + $0xe0] sm:$0xff]   ;;  %v6079_v10 = vld [vmem:[%s7645_s11 + $0x28] sm:$0xff]  }
 0x5a5   : > { %5405 = vmatpush3.bf16.msra.mxu1 %v6075_v23 }
 0x5a6   : > { %v5293_v40 = vpop.f32.mrb[84].mxu0  ;;  %v3839_v16 = vmax.f32 %v3815_v30, %v3816_v13  ;;  %5406 = vmatprep.subr.bf16.mxu1 %v6155_v29  ;;  %v6078_v30 = vld [vmem:[%s7645_s11 + $0x20] sm:$0xff]   ;;  %v6080_v13 = vld [vmem:[%s7645_s11 + $0x30] sm:$0xff]  }
 0x5a7   : > { %v5294_v6 = vpop.f32.mrb[85].mxu0 }
 0x5a8   : > { %v5295_v56 = vadd.f32 %v5294_v6, %v5293_v40  ;;  %v5296_v2 = vpop.f32.mrb[86].mxu0  ;;  %v3859_v36 = vpack.c.bf16 %v3839_v16, %v3839_v16  ;;  %v6081_v40 = vld [vmem:[%s7645_s11 + $0x38] sm:$0xff]   ;;  %v6082_v16 = vld [vmem:[%s7647_s13] sm:$0xff]   ;;  %v6083_v6 = vld [vmem:[%s7647_s13 + $0x8] sm:$0xff]  }
 0x5a9   : > { %v5297_v59 = vpop.f32.mrb[87].mxu0  ;;  %5407 = vmatpush3.bf16.msra.mxu1 %v6076_v31 }
 0x5aa   : > { %v3817_v20 = vmax.f32 %v5249_v14, %v5295_v56  ;;  %v5298_v45 = vadd.f32 %v5297_v59, %v5296_v2  ;;  %4222 = vmatprep.mubr.bf16.mxu0 %v3859_v36  ;;  %5408 = vmatprep.subr.bf16.mxu1 %v6155_v29  ;;  %v6084_v56 = vld [vmem:[%s7647_s13 + $0x10] sm:$0xff]   ;;  %v6085_v2 = vld [vmem:[%s7647_s13 + $0x18] sm:$0xff]   ;;  %v6086_v36 = vld [vmem:[%s7647_s13 + $0x20] sm:$0xff]  }
 0x5ab   : > { %4223 = vmatmul.mubr.bf16.vlgmr.msra.gmra.mrb[96].mxu0 %v3858_v26 }
 0x5ac   : > { %v3818_v39 = vmax.f32 %v5252_v62, %v5298_v45  ;;  %5334 = vmatpush3.bf16.msra.mxu0 %v6051_v60  ;;  %v6087_v60 = vld [vmem:[%s7647_s13 + $0x28] sm:$0xff]  }
 0x5ad   : > { %5335 = vmatprep.subr.bf16.mxu0 %v6052_v19  ;;  %5409 = vmatpush3.bf16.msra.mxu1 %v6077_v32 }
 0x5ae   : > { %v3843_v12 = vmax.f32 %v3817_v20, %v3818_v39  ;;  %v5299_v47 = vpop.f32.mrb[88].mxu0  ;;  %5410 = vmatprep.subr.bf16.mxu1 %v6155_v29  ;;  %v4955_v39 = vld [vmem:[%s7644_s10] ss:$0 sm:$0xff] }
 0x5af   : > { %v5300_v27 = vpop.f32.mrb[89].mxu0 }
 0x5b0   : > { %v5301_v0 = vadd.f32 %v5300_v27, %v5299_v47  ;;  %5336 = vmatpush3.bf16.msra.mxu0 %v6053_v52  ;;  %v5302_v43 = vpop.f32.mrb[90].mxu0  ;;  %v3860_v38 = vpack.c.bf16 %v3843_v12, %v3843_v12 }
 0x5b1   : > { %v5303_v8 = vpop.f32.mrb[91].mxu0  ;;  %5337 = vmatprep.subr.bf16.mxu0 %v6054_v54  ;;  %5411 = vmatpush3.bf16.msra.mxu1 %v6078_v30 }
 0x5b2   : > { %v3819_v11 = vmax.f32 %v7425_v41, %v5301_v0  ;;  %v5304_v37 = vadd.f32 %v5303_v8, %v5302_v43  ;;  %v6060_v41 = vld [vmem:[%s7643_s9 + $0xe8] sm:$0xff]   ;;  %5412 = vmatprep.subr.bf16.mxu1 %v6155_v29 }
 0x5b4   : > { %v3820_v5 = vmax.f32 %v5258_v34, %v5304_v37  ;;  %5338 = vmatpush3.bf16.msra.mxu0 %v6055_v1 }
 0x5b5   : > { %5339 = vmatprep.subr.bf16.mxu0 %v6056_v3  ;;  %5413 = vmatpush3.bf16.msra.mxu1 %v6079_v10 }
 0x5b6   : > { %v5305_v50 = vpop.f32.mrb[92].mxu0  ;;  %v3847_v53 = vmax.f32 %v3819_v11, %v3820_v5  ;;  %5414 = vmatprep.subr.bf16.mxu1 %v6155_v29 }
 0x5b7   : > { %v5306_v14 = vpop.f32.mrb[93].mxu0 }
 0x5b8   : > { %v5307_v28 = vadd.f32 %v5306_v14, %v5305_v50  ;;  %5340 = vmatpush3.bf16.msra.mxu0 %v6057_v49  ;;  %v5308_v35 = vpop.f32.mrb[94].mxu0  ;;  %v3861_v62 = vpack.c.bf16 %v3847_v53, %v3847_v53  ;;  %v6089_v50 = vld [vmem:[%s7647_s13 + $0x38] sm:$0xff]   ;;  %v4996_v53 = vld [vmem:[%s7646_s12] ss:$0 sm:$0xff] }
 0x5b9   : > { %v5309_v57 = vpop.f32.mrb[95].mxu0  ;;  %5341 = vmatprep.subr.bf16.mxu0 %v6058_v44  ;;  %5415 = vmatpush3.bf16.msra.mxu1 %v6080_v13  ;;  %v6088_v44 = vld [vmem:[%s7647_s13 + $0x30] sm:$0xff]  }
 0x5ba   : > { %v3821_v17 = vmax.f32 %v7427_v58, %v5307_v28  ;;  %v5310_v25 = vadd.f32 %v5309_v57, %v5308_v35  ;;  %4262 = vmatprep.mubr.bf16.mxu0 %v3861_v62  ;;  %v6063_v58 = vld [vmem:[%s7643_s9 + $0xb0] sm:$0xff]   ;;  %5416 = vmatprep.subr.bf16.mxu1 %v6155_v29 }
 0x5bc   : > { %v3822_v34 = vmax.f32 %v7429_v21, %v5310_v25  ;;  %5342 = vmatpush3.bf16.msra.mxu0 %v6059_v61  ;;  %v6065_v21 = vld [vmem:[%s7643_s9 + $0xb8] sm:$0xff]  }
 0x5bd   : > { %5343 = vmatprep.subr.bf16.mxu0 %v6060_v41  ;;  %5417 = vmatpush3.bf16.msra.mxu1 %v6081_v40 }
 0x5be   : > { %v3851_v48 = vmax.f32 %v3821_v17, %v3822_v34 }
 0x5c0   : > { %5344 = vmatpush3.bf16.msra.mxu0 %v6061_v24  ;;  %v3862_v22 = vpack.c.bf16 %v3851_v48, %v3851_v48 }
 0x5c1   : > { %5345 = vmatprep.subr.bf16.mxu0 %v6062_v33 }
 0x5c4   : > { %5346 = vmatpush3.bf16.msra.mxu0 %v6063_v58 }
 0x5c5   : > { %5347 = vmatprep.subr.bf16.mxu0 %v6064_v42 }
 0x5c8   : > { %5348 = vmatpush3.bf16.msra.mxu0 %v6065_v21 }
 0x5c9   : > { %5382 = vmatprep.subr.bf16.mxu0 %v6155_v29 }
 0x5cb   : > { %4263 = vmatmul.mubr.bf16.vlgmr.msra.gmra.mrb[100].mxu0 %v3860_v38 }
 0x5cc   : > { %5383 = vmatpush3.bf16.msra.mxu0 %v6066_v63  ;;  %5398 = vmatprep.mubr.msk.bf16.mxu0 %vm6156_vm1, %v6155_v29 }
 0x5cd   : > { %5384 = vmatprep.subr.bf16.mxu0 %v6155_v29 }
 0x5d0   : > { %5385 = vmatpush3.bf16.msra.mxu0 %v6067_v15 }
 0x5d1   : > { %5386 = vmatprep.subr.bf16.mxu0 %v6155_v29 }
 0x5d4   : > { %5387 = vmatpush3.bf16.msra.mxu0 %v6068_v7 }
 0x5d5   : > { %5388 = vmatprep.subr.bf16.mxu0 %v6155_v29 }
 0x5d8   : > { %5389 = vmatpush3.bf16.msra.mxu0 %v6069_v4 }
 0x5d9   : > { %5390 = vmatprep.subr.bf16.mxu0 %v6155_v29 }
 0x5dc   : > { %5391 = vmatpush3.bf16.msra.mxu0 %v6070_v9 }
 0x5dd   : > { %5392 = vmatprep.subr.bf16.mxu0 %v6155_v29 }
 0x5e0   : > { %5393 = vmatpush3.bf16.msra.mxu0 %v6071_v18 }
 0x5e1   : > { %5394 = vmatprep.subr.bf16.mxu0 %v6155_v29 }
 0x5e4   : > { %5395 = vmatpush3.bf16.msra.mxu0 %v6072_v46 }
 0x5e5   : > { %5396 = vmatprep.subr.bf16.mxu0 %v6155_v29 }
 0x5e8   : > { %5397 = vmatpush3.bf16.msra.mxu0 %v6073_v55 }
 0x5e9   : > { %5422 = vmatprep.subr.bf16.mxu0 %v6155_v29 }
 0x5eb   : > { %5399 = vmatmul.mubr.bf16.vlgmr.msra.gmra.mrb[104].mxu0 %v3862_v22 }
 0x5ec   : > { %5438 = vmatprep.mubr.msk.bf16.mxu0 %vm6156_vm1, %v6155_v29  ;;  %5423 = vmatpush3.bf16.msra.mxu0 %v6082_v16 }
 0x5ed   : > { %5424 = vmatprep.subr.bf16.mxu0 %v6155_v29 }
 0x5f0   : > { %5425 = vmatpush3.bf16.msra.mxu0 %v6083_v6 }
 0x5f1   : > { %5426 = vmatprep.subr.bf16.mxu0 %v6155_v29 }
 0x5f4   : > { %5427 = vmatpush3.bf16.msra.mxu0 %v6084_v56 }
 0x5f5   : > { %5428 = vmatprep.subr.bf16.mxu0 %v6155_v29 }
 0x5f8   : > { %5429 = vmatpush3.bf16.msra.mxu0 %v6085_v2 }
 0x5f9   : > { %5430 = vmatprep.subr.bf16.mxu0 %v6155_v29 }
 0x5fc   : > { %5431 = vmatpush3.bf16.msra.mxu0 %v6086_v36 }
 0x5fd   : > { %5432 = vmatprep.subr.bf16.mxu0 %v6155_v29 }
 0x600   : > { %5433 = vmatpush3.bf16.msra.mxu0 %v6087_v60 }
 0x601   : > { %5434 = vmatprep.subr.bf16.mxu0 %v6155_v29 }
 0x604   : > { %5435 = vmatpush3.bf16.msra.mxu0 %v6088_v44 }
 0x605   : > { %5436 = vmatprep.subr.bf16.mxu0 %v6155_v29  ;;  %v5005_v29 = vld [vmem:[%s7648_s14] ss:$0 sm:$0xff] }
 0x608   : > { %5437 = vmatpush3.bf16.msra.mxu0 %v6089_v50 }
 0x67e   : > { %v5327_v26 = vpop.f32.mrb[96].mxu0 }
 0x67f   : > { %v5328_v59 = vpop.f32.mrb[97].mxu0 }
 0x680   : > { %v5329_v19 = vadd.f32 %v5328_v59, %v5327_v26  ;;  %v5330_v20 = vpop.f32.mrb[98].mxu0 }
 0x681   : > { %v5331_v45 = vpop.f32.mrb[99].mxu0 }
 0x682   : > { %v4225_v12 = vadd.f32 %v5329_v19, %v4955_v39 }
 0x69e   : > { %v5349_v52 = vpop.f32.mrb[100].mxu0 }
 0x69f   : > { %v5350_v54 = vpop.f32.mrb[101].mxu0 }
 0x6a0   : > { %v5351_v47 = vadd.f32 %v5350_v54, %v5349_v52  ;;  %v5352_v27 = vpop.f32.mrb[102].mxu0 }
 0x6a1   : > { %v5353_v0 = vpop.f32.mrb[103].mxu0 }
 0x6a2   : > { %v4265_v43 = vadd.f32 %v5351_v47, %v4225_v12 }
 0x6be   : > { %v4304_v1 = vpop.f32.mrb[104].mxu0 }
 0x6bf   : > { %v4305_v8 = vadd.f32 %v4304_v1, %v4265_v43  ;;  %v5400_v3 = vpop.f32.mrb[105].mxu0 }
 0x6c0   : > { %v4307_v11 = vpop.f32.mrb[106].mxu0 }
 0x6c1   : > { %v4310_v37 = vmax.f32 %v4305_v8, 0.0  ;;  %v5401_v5 = vpop.f32.mrb[107].mxu0 }
 0x6c3   : > { %v4311_v49 = vpack.c.bf16 %v4310_v37, %v4310_v37 }
 0x6c5   : > { %5419 = vmatmul.mubr.bf16.vlgmr.msra.gmra.mrb[132].mxu1 %v4311_v49 }
 0x798   : > { %v4417_v14 = vpop.f32.mrb[132].mxu1 }
 0x799   : > { %v4418_v28 = vadd.f32 %v4996_v53, %v4417_v14  ;;  %v5420_v35 = vpop.f32.mrb[133].mxu1 }
 0x79a   : > { %v4420_v62 = vpop.f32.mrb[134].mxu1 }
 0x79b   : > { %v4423_v61 = vmax.f32 %v4418_v28, 0.0  ;;  %v5421_v57 = vpop.f32.mrb[135].mxu1 }
 0x79d   : > { %v4424_v41 = vpack.c.bf16 %v4423_v61, %v4423_v61 }
 0x79f   : > { %5439 = vmatmul.mubr.bf16.vlgmr.msra.gmra.mrb[108].mxu0 %v4424_v41 }
 0x872   : > { %v4530_v17 = vpop.f32.mrb[108].mxu0 }
 0x873   : > { %v4531_v25 = vadd.f32 %v5005_v29, %v4530_v17  ;;  %v5440_v34 = vpop.f32.mrb[109].mxu0 }
 0x874   : > { %v4533_v24 = vpop.f32.mrb[110].mxu0 }
 0x875   : > { %4536 = vst [vmem:[%s490_s23] sm:$0xff] %v4531_v25  ;;  %v5441_v33 = vpop.f32.mrb[111].mxu0 }
 0x876   : > { %6103 = shalt.err (!%p6100_p3)
}
 0x877   : > { %s6104_s26 = scalar_lea.hbm %s7592_s27, 128  ;;  %s6108_s18 = scalar_lea.hbm %s7649_s15, 256 }
 0x878   : > { %p6105_p4 = scmp.ne.s32.totalorder %s7592_s27, %s6104_s26  ;;  %p6109_p9 = scmp.lt.u32.totalorder %s7592_s27, %s7649_s15 }
 0x879   : > { %p6110_p10 = scmp.lt.u32.totalorder %s6108_s18, %s6104_s26  ;;  %p6112_p12 = scmp.lt.u32.totalorder %s6104_s26, %s7592_s27 }
 0x87a   : > { %p6106_p7 = pnand %p6105_p4, %p6276_p5 }
 0x87b   : > { %p6111_p11 = por %p6110_p10, %p6109_p9 }
 0x87c   : > { %p6107_p8 = pneg %p6106_p7 }
 0x87d   : > { %p6113_p13 = por %p6112_p12, %p6111_p11 }
 0x87f   : > { %p6114_p0 = pnand %p6113_p13, %p6107_p8 }
 0x881   : > { %6117 = shalt.err (!%p6114_p0)
}
 0x882   : > { %5634 = dma.vmem_to_hbm [thread:$0]  (%p6276_p5), %s7594_s20, 128, %s7592_s27, %s4538_s24  }
 0x883 PF: > { %s7662_s22 = sld [smem:[#allocation9_spill]]  ;;  %p5640_p1 = scmp.ge.s32.totalorder %s6152_s21, 2 }
 0x885   : > { %p5637_p2 = pnand %p5640_p1, %p6280_p6 }
 0x889   : > { %s4563_s17 = sand.u32 1, %s7662_s22  }
 0x88a   : > { %s4564_s30 = scalar_lea.sflag [#allocation7], %s4563_s17 }
 0x88b   : > { %6135 = dma.done.wait (!%p5637_p2), %s4564_s30, 128  }
 0x88c   : > { %6137 = vsyncadd (!%p5637_p2), %s4564_s30, 4294967168  ;;  %s7664_s21 = sld [smem:[#allocation11_spill]]  ;;  %s7665_s26 = sld [smem:[#allocation10_spill]] }
 0x88d   : > { %s7666_s20 = sld [smem:[#allocation12_spill]]  ;;  %s7667_s18 = smov %s6144_s19 }
 0x892   : > { %p25_p3 = scmp.ge.s32.totalorder %s7664_s21, 4   ;;  %s7668_s19 = smov %s7665_s26 }
 0x894   :  { %27 = sbr.rel (!%p25_p3) target bundleno = 3 (0x3), region = 119 }
 0x89b   :  { %4569 = vsyncpa [#allocation7], 1 }
 0x89c   :  { %4571 = vsyncpa [#allocation7 + $0x1], 1 }

</bundles_post_ra>
